<compile_context>
chip_gen: v5e
topology: v5e:2x2
jax: 0.10.0
libtpu: 0.0.40
codegen_flags: <defaults>
</compile_context>

<pallas_src>
import functools

import jax
import jax.numpy as jnp
from jax.experimental import pallas as pl
from jax.experimental.pallas import tpu as pltpu


def _round_up(x, m):
    return (x + m - 1) // m * m


def _srcnn_kernel(x_ref, w1_ref, b1_ref, w2_ref, b2_ref, w3_ref, b3_ref,
                  wpos_ref, o_ref, slab_ref, ypad_ref, *,
                  H, W, K1, K3, F, C_in, C_out, OFF):
    """Fused SRCNN forward for one image (grid over batch).

    x_ref:    (1, (H+K1-1)*W, K1*C_in)  kw-packed im2col input, bf16.
    w1_ref:   (K1*K1*C_in, F)           bf16, rows ordered (kh, kw, c).
    w2_ref:   (F, F)                    bf16 (the 1x1 conv).
    w3_ref:   (K3*K3*C_out, F)          bf16, rows ordered (kh, kw, co).
    b*_ref:   f32 biases; b3 is (C_out, 1) for the transposed output layout.
    wpos_ref: (1, H*W) int32, w-coordinate (p % W) of each flattened position.
    o_ref:    (1, C_out, H*W)           lane-dense output block.
    slab_ref: (H*W, K1*K1*C_in) bf16 VMEM scratch  (conv1 depth-243 slab).
    ypad_ref: (K3*K3*C_out, PADW) f32 VMEM scratch (conv3 padded tap planes).
    """
    HW = H * W
    KC = K1 * C_in                     # per-kh packed depth (kw, c) = 27
    T3 = K3 * K3 * C_out               # conv3 tap-plane rows = 75
    pad3 = (K3 - 1) // 2
    MARGIN = pad3 * W + pad3           # max |flattened shift| for conv3
    f32 = jnp.float32
    bf16 = jnp.bfloat16

    # ---- conv1 (9x9, 3 -> 128): widen to the full (kh,kw,c) im2col slab ----
    # in VMEM, then a single deep MXU matmul (HW, 243) x (243, 128).
    for kh in range(K1):
        # rows [kh*W, kh*W + HW) of the packed input are x_pad[kh+h, w+kw, c]
        slab_ref[:, pl.ds(kh * KC, KC)] = x_ref[0, pl.ds(kh * W, HW), :]
    h1 = jnp.dot(slab_ref[...], w1_ref[...], preferred_element_type=f32)
    h1 = jnp.maximum(h1 + b1_ref[...], 0.0)                     # (HW, F) f32

    # ---- conv2 (1x1, 128 -> 128): fused epilogue matmul --------------------
    h2 = jnp.dot(h1.astype(bf16), w2_ref[...], preferred_element_type=f32)
    h2 = jnp.maximum(h2 + b2_ref[...], 0.0)                     # (HW, F) f32

    # ---- conv3 (5x5, 128 -> 3): one wide matmul + shifted/masked adds ------
    h2t = jnp.transpose(h2).astype(bf16)                        # (F, HW)
    taps = jnp.dot(w3_ref[...], h2t, preferred_element_type=f32)  # (T3, HW)

    # Zero-padded staging buffer: out-of-range height taps read zeros; the
    # interior write is lane-aligned (OFF is a multiple of 128).  Borders are
    # re-zeroed every grid step (scratch persists across batch elements).
    ypad_ref[:, pl.ds(OFF - MARGIN, MARGIN)] = jnp.zeros((T3, MARGIN), f32)
    ypad_ref[:, pl.ds(OFF + HW, MARGIN)] = jnp.zeros((T3, MARGIN), f32)
    ypad_ref[:, pl.ds(OFF, HW)] = taps

    wpos = wpos_ref[...]                                        # (1, HW) int32
    acc = jnp.zeros((C_out, HW), f32)
    for kh in range(K3):
        for kw in range(K3):
            dh, dw = kh - pad3, kw - pad3
            t = kh * K3 + kw
            s = dh * W + dw                                     # flattened shift
            tap = ypad_ref[pl.ds(t * C_out, C_out), pl.ds(OFF + s, HW)]
            if dw == 0:
                acc = acc + tap                   # height bounds handled by padding
            else:
                ok = (wpos >= -dw) & (wpos < W - dw)            # width bounds
                acc = acc + jnp.where(ok, tap, 0.0)
    o_ref[0] = (acc + b3_ref[...]).astype(o_ref.dtype)          # (C_out, HW)


def srcnn_pallas(x_nchw, params):
    """x_nchw: (N, Cin, H, W) float32.  Returns (N, Cout, H, W)."""
    N, C, H, W = x_nchw.shape
    w1, b1 = params["w1"], params["b1"]        # (9,9,C,F), (F,)
    w2, b2 = params["w2"], params["b2"]        # (1,1,F,F), (F,)
    w3, b3 = params["w3"], params["b3"]        # (5,5,F,Cout), (Cout,)
    K1, F = w1.shape[0], w1.shape[-1]
    K3, C_out = w3.shape[0], w3.shape[-1]
    p1 = (K1 - 1) // 2
    p3 = (K3 - 1) // 2
    HW = H * W
    Hp = H + 2 * p1                    # padded height for conv1
    KC = K1 * C                        # per-kh packed depth (kw, c) = 27
    T3 = K3 * K3 * C_out               # conv3 tap-plane rows = 75
    MARGIN = p3 * W + p3
    OFF = _round_up(MARGIN, 128)       # lane-aligned interior of the pad buffer
    PADW = _round_up(OFF + HW + MARGIN, 128)
    bf16 = jnp.bfloat16

    # --- narrow kw-packed im2col of the tiny 3-channel input (done in XLA);
    # the 9x kh expansion happens in-kernel in VMEM so HBM traffic stays low.
    # x_packed[n, h'*W + w, kw*C + c] = x_pad[n, h', w + kw, c]
    xh = jnp.transpose(x_nchw, (0, 2, 3, 1))                        # NHWC
    xh = jnp.pad(xh, ((0, 0), (p1, p1), (p1, p1), (0, 0)))          # (N,Hp,W+2p1,C)
    cols = [xh[:, :, kw:kw + W, :] for kw in range(K1)]
    x_packed = jnp.concatenate(cols, axis=-1).reshape(N, Hp * W, KC).astype(bf16)

    # --- weights: bf16 matmul operands, f32 biases.
    w1p = w1.reshape(K1 * K1 * C, F).astype(bf16)          # rows (kh, kw, c)
    w2m = w2.reshape(F, F).astype(bf16)
    w3t = jnp.transpose(w3, (0, 1, 3, 2)).reshape(T3, F).astype(bf16)  # (75, F)
    b1r = b1.reshape(1, F).astype(jnp.float32)
    b2r = b2.reshape(1, F).astype(jnp.float32)
    b3r = b3.reshape(C_out, 1).astype(jnp.float32)
    wpos = (jnp.arange(HW, dtype=jnp.int32) % W).reshape(1, HW)

    kernel = functools.partial(_srcnn_kernel, H=H, W=W, K1=K1, K3=K3, F=F,
                               C_in=C, C_out=C_out, OFF=OFF)

    out = pl.pallas_call(
        kernel,
        out_shape=jax.ShapeDtypeStruct((N, C_out, HW), x_nchw.dtype),
        grid_spec=pltpu.PrefetchScalarGridSpec(
            num_scalar_prefetch=0,
            grid=(N,),
            in_specs=[
                pl.BlockSpec((1, Hp * W, KC), lambda n: (n, 0, 0)),
                pl.BlockSpec((K1 * K1 * C, F), lambda n: (0, 0)),
                pl.BlockSpec((1, F), lambda n: (0, 0)),
                pl.BlockSpec((F, F), lambda n: (0, 0)),
                pl.BlockSpec((1, F), lambda n: (0, 0)),
                pl.BlockSpec((T3, F), lambda n: (0, 0)),
                pl.BlockSpec((C_out, 1), lambda n: (0, 0)),
                pl.BlockSpec((1, HW), lambda n: (0, 0)),
            ],
            out_specs=pl.BlockSpec((1, C_out, HW), lambda n: (n, 0, 0)),
            scratch_shapes=[
                pltpu.VMEM((HW, K1 * K1 * C), bf16),         # conv1 depth-243 slab
                pltpu.VMEM((T3, PADW), jnp.float32),         # conv3 padded taps
            ],
        ),
        compiler_params=pltpu.CompilerParams(
            dimension_semantics=("parallel",),
        ),
    )(x_packed, w1p, b1r, w2m, b2r, w3t, b3r, wpos)

    # (N, C_out, H*W) lane-dense -> NCHW is just a reshape (no transpose).
    return out.reshape(N, C_out, H, W)


def init_params(key, num_channels=3, base_filter=128, std=0.02):
    """Deterministic synthetic init (normal weights, zero biases) matching
    the shapes declared in Net.__init__ / normal_init, stored HWIO."""
    k1, k2, k3 = jax.random.split(key, 3)
    return {
        "w1": jax.random.normal(k1, (9, 9, num_channels, base_filter), jnp.float32) * std,
        "b1": jnp.zeros((base_filter,), jnp.float32),
        "w2": jax.random.normal(k2, (1, 1, base_filter, base_filter), jnp.float32) * std,
        "b2": jnp.zeros((base_filter,), jnp.float32),
        "w3": jax.random.normal(k3, (5, 5, base_filter, num_channels), jnp.float32) * std,
        "b3": jnp.zeros((num_channels,), jnp.float32),
    }


@jax.jit
def srcnn_forward(x_nchw, params):
    return srcnn_pallas(x_nchw, params)


def _reference_forward(x_nchw, params):
    """Pure-JAX reference (lax conv) mirroring the kernel's numerics:
    bf16 matmul operands, f32 accumulation / bias / ReLU."""
    bf16 = jnp.bfloat16

    def conv(x, w, b, pad, relu):
        y = jax.lax.conv_general_dilated(
            x.astype(bf16), w.astype(bf16), window_strides=(1, 1),
            padding=[(pad, pad), (pad, pad)],
            dimension_numbers=("NHWC", "HWIO", "NHWC"),
            preferred_element_type=jnp.float32,
        ) + b
        return jnp.maximum(y, 0.0) if relu else y

    x = jnp.transpose(x_nchw, (0, 2, 3, 1))
    h = conv(x, params["w1"], params["b1"], 4, True)
    h = conv(h, params["w2"], params["b2"], 0, True)
    h = conv(h, params["w3"], params["b3"], 2, False)
    return jnp.transpose(h, (0, 3, 1, 2))


if __name__ == "__main__":
    key = jax.random.PRNGKey(0)
    k_x, k_p = jax.random.split(key)

    # Small shapes consistent with the module: N=2, C=3 (num_channels), 16x16.
    x = jax.random.normal(k_x, (2, 3, 16, 16), jnp.float32)
    params = init_params(k_p, num_channels=3, base_filter=128)

    out = srcnn_forward(x, params)
    out = jax.block_until_ready(out)
    assert out.shape == (2, 3, 16, 16), out.shape

    ref = jax.block_until_ready(_reference_forward(x, params))
    # Both sides use bf16 operands with f32 accumulation; remaining diffs are
    # only f32 summation-order rounding.
    err = float(jnp.max(jnp.abs(out - ref)))
    assert jnp.allclose(out, ref, atol=2e-3, rtol=2e-3), err

    print("KERNEL_OK")
</pallas_src>

<mosaic_0001>
module attributes {stable_mosaic.version = 11 : i64} {
  func.func @_srcnn_kernel(%arg0: i32, %arg1: memref<1x384x27xbf16, #tpu.memory_space<vmem>>, %arg2: memref<243x128xbf16, #tpu.memory_space<vmem>>, %arg3: memref<1x128xf32, #tpu.memory_space<vmem>>, %arg4: memref<128x128xbf16, #tpu.memory_space<vmem>>, %arg5: memref<1x128xf32, #tpu.memory_space<vmem>>, %arg6: memref<75x128xbf16, #tpu.memory_space<vmem>>, %arg7: memref<3x1xf32, #tpu.memory_space<vmem>>, %arg8: memref<1x256xi32, #tpu.memory_space<vmem>>, %arg9: memref<1x3x256xf32, #tpu.memory_space<vmem>>, %arg10: memref<256x243xbf16, #tpu.memory_space<vmem>>, %arg11: memref<75x512xf32, #tpu.memory_space<vmem>>) attributes {dimension_semantics = [#tpu.dimension_semantics<parallel>], iteration_bounds = array<i64: 2>, scalar_prefetch = 0 : i64, scratch_operands = 2 : i64, tpu.core_type = #tpu.core_type<tc>, window_params = [{transform_indices = @transform_0, window_bounds = array<i64: 1, 384, 27>}, {pipeline_mode = #tpu.pipeline_mode<synchronous>, transform_indices = @transform_1, window_bounds = array<i64: 243, 128>}, {pipeline_mode = #tpu.pipeline_mode<synchronous>, transform_indices = @transform_2, window_bounds = array<i64: 1, 128>}, {pipeline_mode = #tpu.pipeline_mode<synchronous>, transform_indices = @transform_3, window_bounds = array<i64: 128, 128>}, {pipeline_mode = #tpu.pipeline_mode<synchronous>, transform_indices = @transform_4, window_bounds = array<i64: 1, 128>}, {pipeline_mode = #tpu.pipeline_mode<synchronous>, transform_indices = @transform_5, window_bounds = array<i64: 75, 128>}, {pipeline_mode = #tpu.pipeline_mode<synchronous>, transform_indices = @transform_6, window_bounds = array<i64: 3, 1>}, {pipeline_mode = #tpu.pipeline_mode<synchronous>, transform_indices = @transform_7, window_bounds = array<i64: 1, 256>}, {transform_indices = @transform_8, window_bounds = array<i64: 1, 3, 256>}]} {
    %c0 = arith.constant 0 : index
    %c0_0 = arith.constant 0 : index
    %c0_1 = arith.constant 0 : index
    %0 = vector.load %arg1[%c0, %c0_0, %c0_1] : memref<1x384x27xbf16, #tpu.memory_space<vmem>>, vector<1x256x27xbf16>
    %1 = vector.shape_cast %0 : vector<1x256x27xbf16> to vector<256x27xbf16>
    %c0_2 = arith.constant 0 : index
    %c0_3 = arith.constant 0 : index
    %2 = vector.load %arg10[%c0_2, %c0_3] : memref<256x243xbf16, #tpu.memory_space<vmem>>, vector<256x27xbf16>
    tpu.vector_store %arg10[%c0_2, %c0_3], %1 {strides = array<i32>} : memref<256x243xbf16, #tpu.memory_space<vmem>>, vector<256x27xbf16>,
    %c0_4 = arith.constant 0 : index
    %c16 = arith.constant 16 : index
    %c0_5 = arith.constant 0 : index
    %3 = vector.load %arg1[%c0_4, %c16, %c0_5] : memref<1x384x27xbf16, #tpu.memory_space<vmem>>, vector<1x256x27xbf16>
    %4 = vector.shape_cast %3 : vector<1x256x27xbf16> to vector<256x27xbf16>
    %c0_6 = arith.constant 0 : index
    %c27 = arith.constant 27 : index
    %5 = vector.load %arg10[%c0_6, %c27] : memref<256x243xbf16, #tpu.memory_space<vmem>>, vector<256x27xbf16>
    tpu.vector_store %arg10[%c0_6, %c27], %4 {strides = array<i32>} : memref<256x243xbf16, #tpu.memory_space<vmem>>, vector<256x27xbf16>,
    %c0_7 = arith.constant 0 : index
    %c32 = arith.constant 32 : index
    %c0_8 = arith.constant 0 : index
    %6 = vector.load %arg1[%c0_7, %c32, %c0_8] : memref<1x384x27xbf16, #tpu.memory_space<vmem>>, vector<1x256x27xbf16>
    %7 = vector.shape_cast %6 : vector<1x256x27xbf16> to vector<256x27xbf16>
    %c0_9 = arith.constant 0 : index
    %c54 = arith.constant 54 : index
    %8 = vector.load %arg10[%c0_9, %c54] : memref<256x243xbf16, #tpu.memory_space<vmem>>, vector<256x27xbf16>
    tpu.vector_store %arg10[%c0_9, %c54], %7 {strides = array<i32>} : memref<256x243xbf16, #tpu.memory_space<vmem>>, vector<256x27xbf16>,
    %c0_10 = arith.constant 0 : index
    %c48 = arith.constant 48 : index
    %c0_11 = arith.constant 0 : index
    %9 = vector.load %arg1[%c0_10, %c48, %c0_11] : memref<1x384x27xbf16, #tpu.memory_space<vmem>>, vector<1x256x27xbf16>
    %10 = vector.shape_cast %9 : vector<1x256x27xbf16> to vector<256x27xbf16>
    %c0_12 = arith.constant 0 : index
    %c81 = arith.constant 81 : index
    %11 = vector.load %arg10[%c0_12, %c81] : memref<256x243xbf16, #tpu.memory_space<vmem>>, vector<256x27xbf16>
    tpu.vector_store %arg10[%c0_12, %c81], %10 {strides = array<i32>} : memref<256x243xbf16, #tpu.memory_space<vmem>>, vector<256x27xbf16>,
    %c0_13 = arith.constant 0 : index
    %c64 = arith.constant 64 : index
    %c0_14 = arith.constant 0 : index
    %12 = vector.load %arg1[%c0_13, %c64, %c0_14] : memref<1x384x27xbf16, #tpu.memory_space<vmem>>, vector<1x256x27xbf16>
    %13 = vector.shape_cast %12 : vector<1x256x27xbf16> to vector<256x27xbf16>
    %c0_15 = arith.constant 0 : index
    %c108 = arith.constant 108 : index
    %14 = vector.load %arg10[%c0_15, %c108] : memref<256x243xbf16, #tpu.memory_space<vmem>>, vector<256x27xbf16>
    tpu.vector_store %arg10[%c0_15, %c108], %13 {strides = array<i32>} : memref<256x243xbf16, #tpu.memory_space<vmem>>, vector<256x27xbf16>,
    %c0_16 = arith.constant 0 : index
    %c80 = arith.constant 80 : index
    %c0_17 = arith.constant 0 : index
    %15 = vector.load %arg1[%c0_16, %c80, %c0_17] : memref<1x384x27xbf16, #tpu.memory_space<vmem>>, vector<1x256x27xbf16>
    %16 = vector.shape_cast %15 : vector<1x256x27xbf16> to vector<256x27xbf16>
    %c0_18 = arith.constant 0 : index
    %c135 = arith.constant 135 : index
    %17 = vector.load %arg10[%c0_18, %c135] : memref<256x243xbf16, #tpu.memory_space<vmem>>, vector<256x27xbf16>
    tpu.vector_store %arg10[%c0_18, %c135], %16 {strides = array<i32>} : memref<256x243xbf16, #tpu.memory_space<vmem>>, vector<256x27xbf16>,
    %c0_19 = arith.constant 0 : index
    %c96 = arith.constant 96 : index
    %c0_20 = arith.constant 0 : index
    %18 = vector.load %arg1[%c0_19, %c96, %c0_20] : memref<1x384x27xbf16, #tpu.memory_space<vmem>>, vector<1x256x27xbf16>
    %19 = vector.shape_cast %18 : vector<1x256x27xbf16> to vector<256x27xbf16>
    %c0_21 = arith.constant 0 : index
    %c162 = arith.constant 162 : index
    %20 = vector.load %arg10[%c0_21, %c162] : memref<256x243xbf16, #tpu.memory_space<vmem>>, vector<256x27xbf16>
    tpu.vector_store %arg10[%c0_21, %c162], %19 {strides = array<i32>} : memref<256x243xbf16, #tpu.memory_space<vmem>>, vector<256x27xbf16>,
    %c0_22 = arith.constant 0 : index
    %c112 = arith.constant 112 : index
    %c0_23 = arith.constant 0 : index
    %21 = vector.load %arg1[%c0_22, %c112, %c0_23] : memref<1x384x27xbf16, #tpu.memory_space<vmem>>, vector<1x256x27xbf16>
    %22 = vector.shape_cast %21 : vector<1x256x27xbf16> to vector<256x27xbf16>
    %c0_24 = arith.constant 0 : index
    %c189 = arith.constant 189 : index
    %23 = vector.load %arg10[%c0_24, %c189] : memref<256x243xbf16, #tpu.memory_space<vmem>>, vector<256x27xbf16>
    tpu.vector_store %arg10[%c0_24, %c189], %22 {strides = array<i32>} : memref<256x243xbf16, #tpu.memory_space<vmem>>, vector<256x27xbf16>,
    %c0_25 = arith.constant 0 : index
    %c128 = arith.constant 128 : index
    %c0_26 = arith.constant 0 : index
    %24 = vector.load %arg1[%c0_25, %c128, %c0_26] : memref<1x384x27xbf16, #tpu.memory_space<vmem>>, vector<1x256x27xbf16>
    %25 = vector.shape_cast %24 : vector<1x256x27xbf16> to vector<256x27xbf16>
    %c0_27 = arith.constant 0 : index
    %c216 = arith.constant 216 : index
    %26 = vector.load %arg10[%c0_27, %c216] : memref<256x243xbf16, #tpu.memory_space<vmem>>, vector<256x27xbf16>
    tpu.vector_store %arg10[%c0_27, %c216], %25 {strides = array<i32>} : memref<256x243xbf16, #tpu.memory_space<vmem>>, vector<256x27xbf16>,
    %c0_28 = arith.constant 0 : index
    %c0_29 = arith.constant 0 : index
    %27 = vector.load %arg10[%c0_28, %c0_29] : memref<256x243xbf16, #tpu.memory_space<vmem>>, vector<256x243xbf16>
    %c0_30 = arith.constant 0 : index
    %c0_31 = arith.constant 0 : index
    %28 = vector.load %arg2[%c0_30, %c0_31] : memref<243x128xbf16, #tpu.memory_space<vmem>>, vector<243x128xbf16>
    %cst = arith.constant dense<0.000000e+00> : vector<256x128xf32>
    %29 = tpu.matmul %27, %28, %cst {dimension_numbers = #tpu.dot_dimension_numbers<[1], [0], [0], [1], [0, 0, 1, 1], [], []>} : vector<256x243xbf16>, vector<243x128xbf16>, vector<256x128xf32> -> vector<256x128xf32>
    %c0_32 = arith.constant 0 : index
    %c0_33 = arith.constant 0 : index
    %30 = vector.load %arg3[%c0_32, %c0_33] : memref<1x128xf32, #tpu.memory_space<vmem>>, vector<1x128xf32>
    %31 = vector.broadcast %30 : vector<1x128xf32> to vector<256x128xf32>
    %32 = arith.addf %29, %31 : vector<256x128xf32>
    %cst_34 = arith.constant 0.000000e+00 : f32
    %33 = vector.broadcast %cst_34 : f32 to vector<256x128xf32>
    %34 = arith.maximumf %32, %33 : vector<256x128xf32>
    %35 = arith.truncf %34 : vector<256x128xf32> to vector<256x128xbf16>
    %c0_35 = arith.constant 0 : index
    %c0_36 = arith.constant 0 : index
    %36 = vector.load %arg4[%c0_35, %c0_36] : memref<128x128xbf16, #tpu.memory_space<vmem>>, vector<128x128xbf16>
    %cst_37 = arith.constant dense<0.000000e+00> : vector<256x128xf32>
    %37 = tpu.matmul %35, %36, %cst_37 {dimension_numbers = #tpu.dot_dimension_numbers<[1], [0], [0], [1], [0, 0, 1, 1], [], []>} : vector<256x128xbf16>, vector<128x128xbf16>, vector<256x128xf32> -> vector<256x128xf32>
    %c0_38 = arith.constant 0 : index
    %c0_39 = arith.constant 0 : index
    %38 = vector.load %arg5[%c0_38, %c0_39] : memref<1x128xf32, #tpu.memory_space<vmem>>, vector<1x128xf32>
    %39 = vector.broadcast %38 : vector<1x128xf32> to vector<256x128xf32>
    %40 = arith.addf %37, %39 : vector<256x128xf32>
    %cst_40 = arith.constant 0.000000e+00 : f32
    %41 = vector.broadcast %cst_40 : f32 to vector<256x128xf32>
    %42 = arith.maximumf %40, %41 : vector<256x128xf32>
    %43 = tpu.transpose %42, [1, 0] : vector<256x128xf32> -> vector<128x256xf32>
    %44 = arith.truncf %43 : vector<128x256xf32> to vector<128x256xbf16>
    %c0_41 = arith.constant 0 : index
    %c0_42 = arith.constant 0 : index
    %45 = vector.load %arg6[%c0_41, %c0_42] : memref<75x128xbf16, #tpu.memory_space<vmem>>, vector<75x128xbf16>
    %cst_43 = arith.constant dense<0.000000e+00> : vector<75x256xf32>
    %46 = tpu.matmul %45, %44, %cst_43 {dimension_numbers = #tpu.dot_dimension_numbers<[1], [0], [0], [1], [0, 0, 1, 1], [], []>} : vector<75x128xbf16>, vector<128x256xbf16>, vector<75x256xf32> -> vector<75x256xf32>
    %cst_44 = arith.constant 0.000000e+00 : f32
    %47 = vector.broadcast %cst_44 : f32 to vector<75x34xf32>
    %c0_45 = arith.constant 0 : index
    %c94 = arith.constant 94 : index
    %48 = vector.load %arg11[%c0_45, %c94] : memref<75x512xf32, #tpu.memory_space<vmem>>, vector<75x34xf32>
    tpu.vector_store %arg11[%c0_45, %c94], %47 {strides = array<i32>} : memref<75x512xf32, #tpu.memory_space<vmem>>, vector<75x34xf32>,
    %cst_46 = arith.constant 0.000000e+00 : f32
    %49 = vector.broadcast %cst_46 : f32 to vector<75x34xf32>
    %c0_47 = arith.constant 0 : index
    %c384 = arith.constant 384 : index
    %50 = vector.load %arg11[%c0_47, %c384] : memref<75x512xf32, #tpu.memory_space<vmem>>, vector<75x34xf32>
    tpu.vector_store %arg11[%c0_47, %c384], %49 {strides = array<i32>} : memref<75x512xf32, #tpu.memory_space<vmem>>, vector<75x34xf32>,
    %c0_48 = arith.constant 0 : index
    %c128_49 = arith.constant 128 : index
    %51 = vector.load %arg11[%c0_48, %c128_49] : memref<75x512xf32, #tpu.memory_space<vmem>>, vector<75x256xf32>
    tpu.vector_store %arg11[%c0_48, %c128_49], %46 {strides = array<i32>} : memref<75x512xf32, #tpu.memory_space<vmem>>, vector<75x256xf32>,
    %c0_50 = arith.constant 0 : index
    %c0_51 = arith.constant 0 : index
    %52 = vector.load %arg8[%c0_50, %c0_51] : memref<1x256xi32, #tpu.memory_space<vmem>>, vector<1x256xi32>
    %cst_52 = arith.constant 0.000000e+00 : f32
    %53 = vector.broadcast %cst_52 : f32 to vector<3x256xf32>
    %c0_53 = arith.constant 0 : index
    %c94_54 = arith.constant 94 : index
    %54 = vector.load %arg11[%c0_53, %c94_54] : memref<75x512xf32, #tpu.memory_space<vmem>>, vector<3x256xf32>
    %c2_i32 = arith.constant 2 : i32
    %55 = vector.broadcast %c2_i32 : i32 to vector<1x256xi32>
    %56 = arith.cmpi sge, %52, %55 : vector<1x256xi32>
    %c18_i32 = arith.constant 18 : i32
    %57 = vector.broadcast %c18_i32 : i32 to vector<1x256xi32>
    %58 = arith.cmpi slt, %52, %57 : vector<1x256xi32>
    %59 = arith.andi %56, %58 : vector<1x256xi1>
    %cst_55 = arith.constant 0.000000e+00 : f32
    %60 = vector.shape_cast %59 : vector<1x256xi1> to vector<1x256xi1>
    %61 = vector.broadcast %60 : vector<1x256xi1> to vector<3x256xi1>
    %62 = vector.broadcast %cst_55 : f32 to vector<3x256xf32>
    %63 = arith.select %61, %54, %62 : vector<3x256xi1>, vector<3x256xf32>
    %64 = arith.addf %53, %63 : vector<3x256xf32>
    %c3 = arith.constant 3 : index
    %c95 = arith.constant 95 : index
    %65 = vector.load %arg11[%c3, %c95] : memref<75x512xf32, #tpu.memory_space<vmem>>, vector<3x256xf32>
    %c1_i32 = arith.constant 1 : i32
    %66 = vector.broadcast %c1_i32 : i32 to vector<1x256xi32>
    %67 = arith.cmpi sge, %52, %66 : vector<1x256xi32>
    %c17_i32 = arith.constant 17 : i32
    %68 = vector.broadcast %c17_i32 : i32 to vector<1x256xi32>
    %69 = arith.cmpi slt, %52, %68 : vector<1x256xi32>
    %70 = arith.andi %67, %69 : vector<1x256xi1>
    %cst_56 = arith.constant 0.000000e+00 : f32
    %71 = vector.shape_cast %70 : vector<1x256xi1> to vector<1x256xi1>
    %72 = vector.broadcast %71 : vector<1x256xi1> to vector<3x256xi1>
    %73 = vector.broadcast %cst_56 : f32 to vector<3x256xf32>
    %74 = arith.select %72, %65, %73 : vector<3x256xi1>, vector<3x256xf32>
    %75 = arith.addf %64, %74 : vector<3x256xf32>
    %c6 = arith.constant 6 : index
    %c96_57 = arith.constant 96 : index
    %76 = vector.load %arg11[%c6, %c96_57] : memref<75x512xf32, #tpu.memory_space<vmem>>, vector<3x256xf32>
    %77 = arith.addf %75, %76 : vector<3x256xf32>
    %c9 = arith.constant 9 : index
    %c97 = arith.constant 97 : index
    %78 = vector.load %arg11[%c9, %c97] : memref<75x512xf32, #tpu.memory_space<vmem>>, vector<3x256xf32>
    %c-1_i32 = arith.constant -1 : i32
    %79 = vector.broadcast %c-1_i32 : i32 to vector<1x256xi32>
    %80 = arith.cmpi sge, %52, %79 : vector<1x256xi32>
    %c15_i32 = arith.constant 15 : i32
    %81 = vector.broadcast %c15_i32 : i32 to vector<1x256xi32>
    %82 = arith.cmpi slt, %52, %81 : vector<1x256xi32>
    %83 = arith.andi %80, %82 : vector<1x256xi1>
    %cst_58 = arith.constant 0.000000e+00 : f32
    %84 = vector.shape_cast %83 : vector<1x256xi1> to vector<1x256xi1>
    %85 = vector.broadcast %84 : vector<1x256xi1> to vector<3x256xi1>
    %86 = vector.broadcast %cst_58 : f32 to vector<3x256xf32>
    %87 = arith.select %85, %78, %86 : vector<3x256xi1>, vector<3x256xf32>
    %88 = arith.addf %77, %87 : vector<3x256xf32>
    %c12 = arith.constant 12 : index
    %c98 = arith.constant 98 : index
    %89 = vector.load %arg11[%c12, %c98] : memref<75x512xf32, #tpu.memory_space<vmem>>, vector<3x256xf32>
    %c-2_i32 = arith.constant -2 : i32
    %90 = vector.broadcast %c-2_i32 : i32 to vector<1x256xi32>
    %91 = arith.cmpi sge, %52, %90 : vector<1x256xi32>
    %c14_i32 = arith.constant 14 : i32
    %92 = vector.broadcast %c14_i32 : i32 to vector<1x256xi32>
    %93 = arith.cmpi slt, %52, %92 : vector<1x256xi32>
    %94 = arith.andi %91, %93 : vector<1x256xi1>
    %cst_59 = arith.constant 0.000000e+00 : f32
    %95 = vector.shape_cast %94 : vector<1x256xi1> to vector<1x256xi1>
    %96 = vector.broadcast %95 : vector<1x256xi1> to vector<3x256xi1>
    %97 = vector.broadcast %cst_59 : f32 to vector<3x256xf32>
    %98 = arith.select %96, %89, %97 : vector<3x256xi1>, vector<3x256xf32>
    %99 = arith.addf %88, %98 : vector<3x256xf32>
    %c15 = arith.constant 15 : index
    %c110 = arith.constant 110 : index
    %100 = vector.load %arg11[%c15, %c110] : memref<75x512xf32, #tpu.memory_space<vmem>>, vector<3x256xf32>
    %c2_i32_60 = arith.constant 2 : i32
    %101 = vector.broadcast %c2_i32_60 : i32 to vector<1x256xi32>
    %102 = arith.cmpi sge, %52, %101 : vector<1x256xi32>
    %c18_i32_61 = arith.constant 18 : i32
    %103 = vector.broadcast %c18_i32_61 : i32 to vector<1x256xi32>
    %104 = arith.cmpi slt, %52, %103 : vector<1x256xi32>
    %105 = arith.andi %102, %104 : vector<1x256xi1>
    %cst_62 = arith.constant 0.000000e+00 : f32
    %106 = vector.shape_cast %105 : vector<1x256xi1> to vector<1x256xi1>
    %107 = vector.broadcast %106 : vector<1x256xi1> to vector<3x256xi1>
    %108 = vector.broadcast %cst_62 : f32 to vector<3x256xf32>
    %109 = arith.select %107, %100, %108 : vector<3x256xi1>, vector<3x256xf32>
    %110 = arith.addf %99, %109 : vector<3x256xf32>
    %c18 = arith.constant 18 : index
    %c111 = arith.constant 111 : index
    %111 = vector.load %arg11[%c18, %c111] : memref<75x512xf32, #tpu.memory_space<vmem>>, vector<3x256xf32>
    %c1_i32_63 = arith.constant 1 : i32
    %112 = vector.broadcast %c1_i32_63 : i32 to vector<1x256xi32>
    %113 = arith.cmpi sge, %52, %112 : vector<1x256xi32>
    %c17_i32_64 = arith.constant 17 : i32
    %114 = vector.broadcast %c17_i32_64 : i32 to vector<1x256xi32>
    %115 = arith.cmpi slt, %52, %114 : vector<1x256xi32>
    %116 = arith.andi %113, %115 : vector<1x256xi1>
    %cst_65 = arith.constant 0.000000e+00 : f32
    %117 = vector.shape_cast %116 : vector<1x256xi1> to vector<1x256xi1>
    %118 = vector.broadcast %117 : vector<1x256xi1> to vector<3x256xi1>
    %119 = vector.broadcast %cst_65 : f32 to vector<3x256xf32>
    %120 = arith.select %118, %111, %119 : vector<3x256xi1>, vector<3x256xf32>
    %121 = arith.addf %110, %120 : vector<3x256xf32>
    %c21 = arith.constant 21 : index
    %c112_66 = arith.constant 112 : index
    %122 = vector.load %arg11[%c21, %c112_66] : memref<75x512xf32, #tpu.memory_space<vmem>>, vector<3x256xf32>
    %123 = arith.addf %121, %122 : vector<3x256xf32>
    %c24 = arith.constant 24 : index
    %c113 = arith.constant 113 : index
    %124 = vector.load %arg11[%c24, %c113] : memref<75x512xf32, #tpu.memory_space<vmem>>, vector<3x256xf32>
    %c-1_i32_67 = arith.constant -1 : i32
    %125 = vector.broadcast %c-1_i32_67 : i32 to vector<1x256xi32>
    %126 = arith.cmpi sge, %52, %125 : vector<1x256xi32>
    %c15_i32_68 = arith.constant 15 : i32
    %127 = vector.broadcast %c15_i32_68 : i32 to vector<1x256xi32>
    %128 = arith.cmpi slt, %52, %127 : vector<1x256xi32>
    %129 = arith.andi %126, %128 : vector<1x256xi1>
    %cst_69 = arith.constant 0.000000e+00 : f32
    %130 = vector.shape_cast %129 : vector<1x256xi1> to vector<1x256xi1>
    %131 = vector.broadcast %130 : vector<1x256xi1> to vector<3x256xi1>
    %132 = vector.broadcast %cst_69 : f32 to vector<3x256xf32>
    %133 = arith.select %131, %124, %132 : vector<3x256xi1>, vector<3x256xf32>
    %134 = arith.addf %123, %133 : vector<3x256xf32>
    %c27_70 = arith.constant 27 : index
    %c114 = arith.constant 114 : index
    %135 = vector.load %arg11[%c27_70, %c114] : memref<75x512xf32, #tpu.memory_space<vmem>>, vector<3x256xf32>
    %c-2_i32_71 = arith.constant -2 : i32
    %136 = vector.broadcast %c-2_i32_71 : i32 to vector<1x256xi32>
    %137 = arith.cmpi sge, %52, %136 : vector<1x256xi32>
    %c14_i32_72 = arith.constant 14 : i32
    %138 = vector.broadcast %c14_i32_72 : i32 to vector<1x256xi32>
    %139 = arith.cmpi slt, %52, %138 : vector<1x256xi32>
    %140 = arith.andi %137, %139 : vector<1x256xi1>
    %cst_73 = arith.constant 0.000000e+00 : f32
    %141 = vector.shape_cast %140 : vector<1x256xi1> to vector<1x256xi1>
    %142 = vector.broadcast %141 : vector<1x256xi1> to vector<3x256xi1>
    %143 = vector.broadcast %cst_73 : f32 to vector<3x256xf32>
    %144 = arith.select %142, %135, %143 : vector<3x256xi1>, vector<3x256xf32>
    %145 = arith.addf %134, %144 : vector<3x256xf32>
    %c30 = arith.constant 30 : index
    %c126 = arith.constant 126 : index
    %146 = vector.load %arg11[%c30, %c126] : memref<75x512xf32, #tpu.memory_space<vmem>>, vector<3x256xf32>
    %c2_i32_74 = arith.constant 2 : i32
    %147 = vector.broadcast %c2_i32_74 : i32 to vector<1x256xi32>
    %148 = arith.cmpi sge, %52, %147 : vector<1x256xi32>
    %c18_i32_75 = arith.constant 18 : i32
    %149 = vector.broadcast %c18_i32_75 : i32 to vector<1x256xi32>
    %150 = arith.cmpi slt, %52, %149 : vector<1x256xi32>
    %151 = arith.andi %148, %150 : vector<1x256xi1>
    %cst_76 = arith.constant 0.000000e+00 : f32
    %152 = vector.shape_cast %151 : vector<1x256xi1> to vector<1x256xi1>
    %153 = vector.broadcast %152 : vector<1x256xi1> to vector<3x256xi1>
    %154 = vector.broadcast %cst_76 : f32 to vector<3x256xf32>
    %155 = arith.select %153, %146, %154 : vector<3x256xi1>, vector<3x256xf32>
    %156 = arith.addf %145, %155 : vector<3x256xf32>
    %c33 = arith.constant 33 : index
    %c127 = arith.constant 127 : index
    %157 = vector.load %arg11[%c33, %c127] : memref<75x512xf32, #tpu.memory_space<vmem>>, vector<3x256xf32>
    %c1_i32_77 = arith.constant 1 : i32
    %158 = vector.broadcast %c1_i32_77 : i32 to vector<1x256xi32>
    %159 = arith.cmpi sge, %52, %158 : vector<1x256xi32>
    %c17_i32_78 = arith.constant 17 : i32
    %160 = vector.broadcast %c17_i32_78 : i32 to vector<1x256xi32>
    %161 = arith.cmpi slt, %52, %160 : vector<1x256xi32>
    %162 = arith.andi %159, %161 : vector<1x256xi1>
    %cst_79 = arith.constant 0.000000e+00 : f32
    %163 = vector.shape_cast %162 : vector<1x256xi1> to vector<1x256xi1>
    %164 = vector.broadcast %163 : vector<1x256xi1> to vector<3x256xi1>
    %165 = vector.broadcast %cst_79 : f32 to vector<3x256xf32>
    %166 = arith.select %164, %157, %165 : vector<3x256xi1>, vector<3x256xf32>
    %167 = arith.addf %156, %166 : vector<3x256xf32>
    %c36 = arith.constant 36 : index
    %c128_80 = arith.constant 128 : index
    %168 = vector.load %arg11[%c36, %c128_80] : memref<75x512xf32, #tpu.memory_space<vmem>>, vector<3x256xf32>
    %169 = arith.addf %167, %168 : vector<3x256xf32>
    %c39 = arith.constant 39 : index
    %c129 = arith.constant 129 : index
    %170 = vector.load %arg11[%c39, %c129] : memref<75x512xf32, #tpu.memory_space<vmem>>, vector<3x256xf32>
    %c-1_i32_81 = arith.constant -1 : i32
    %171 = vector.broadcast %c-1_i32_81 : i32 to vector<1x256xi32>
    %172 = arith.cmpi sge, %52, %171 : vector<1x256xi32>
    %c15_i32_82 = arith.constant 15 : i32
    %173 = vector.broadcast %c15_i32_82 : i32 to vector<1x256xi32>
    %174 = arith.cmpi slt, %52, %173 : vector<1x256xi32>
    %175 = arith.andi %172, %174 : vector<1x256xi1>
    %cst_83 = arith.constant 0.000000e+00 : f32
    %176 = vector.shape_cast %175 : vector<1x256xi1> to vector<1x256xi1>
    %177 = vector.broadcast %176 : vector<1x256xi1> to vector<3x256xi1>
    %178 = vector.broadcast %cst_83 : f32 to vector<3x256xf32>
    %179 = arith.select %177, %170, %178 : vector<3x256xi1>, vector<3x256xf32>
    %180 = arith.addf %169, %179 : vector<3x256xf32>
    %c42 = arith.constant 42 : index
    %c130 = arith.constant 130 : index
    %181 = vector.load %arg11[%c42, %c130] : memref<75x512xf32, #tpu.memory_space<vmem>>, vector<3x256xf32>
    %c-2_i32_84 = arith.constant -2 : i32
    %182 = vector.broadcast %c-2_i32_84 : i32 to vector<1x256xi32>
    %183 = arith.cmpi sge, %52, %182 : vector<1x256xi32>
    %c14_i32_85 = arith.constant 14 : i32
    %184 = vector.broadcast %c14_i32_85 : i32 to vector<1x256xi32>
    %185 = arith.cmpi slt, %52, %184 : vector<1x256xi32>
    %186 = arith.andi %183, %185 : vector<1x256xi1>
    %cst_86 = arith.constant 0.000000e+00 : f32
    %187 = vector.shape_cast %186 : vector<1x256xi1> to vector<1x256xi1>
    %188 = vector.broadcast %187 : vector<1x256xi1> to vector<3x256xi1>
    %189 = vector.broadcast %cst_86 : f32 to vector<3x256xf32>
    %190 = arith.select %188, %181, %189 : vector<3x256xi1>, vector<3x256xf32>
    %191 = arith.addf %180, %190 : vector<3x256xf32>
    %c45 = arith.constant 45 : index
    %c142 = arith.constant 142 : index
    %192 = vector.load %arg11[%c45, %c142] : memref<75x512xf32, #tpu.memory_space<vmem>>, vector<3x256xf32>
    %c2_i32_87 = arith.constant 2 : i32
    %193 = vector.broadcast %c2_i32_87 : i32 to vector<1x256xi32>
    %194 = arith.cmpi sge, %52, %193 : vector<1x256xi32>
    %c18_i32_88 = arith.constant 18 : i32
    %195 = vector.broadcast %c18_i32_88 : i32 to vector<1x256xi32>
    %196 = arith.cmpi slt, %52, %195 : vector<1x256xi32>
    %197 = arith.andi %194, %196 : vector<1x256xi1>
    %cst_89 = arith.constant 0.000000e+00 : f32
    %198 = vector.shape_cast %197 : vector<1x256xi1> to vector<1x256xi1>
    %199 = vector.broadcast %198 : vector<1x256xi1> to vector<3x256xi1>
    %200 = vector.broadcast %cst_89 : f32 to vector<3x256xf32>
    %201 = arith.select %199, %192, %200 : vector<3x256xi1>, vector<3x256xf32>
    %202 = arith.addf %191, %201 : vector<3x256xf32>
    %c48_90 = arith.constant 48 : index
    %c143 = arith.constant 143 : index
    %203 = vector.load %arg11[%c48_90, %c143] : memref<75x512xf32, #tpu.memory_space<vmem>>, vector<3x256xf32>
    %c1_i32_91 = arith.constant 1 : i32
    %204 = vector.broadcast %c1_i32_91 : i32 to vector<1x256xi32>
    %205 = arith.cmpi sge, %52, %204 : vector<1x256xi32>
    %c17_i32_92 = arith.constant 17 : i32
    %206 = vector.broadcast %c17_i32_92 : i32 to vector<1x256xi32>
    %207 = arith.cmpi slt, %52, %206 : vector<1x256xi32>
    %208 = arith.andi %205, %207 : vector<1x256xi1>
    %cst_93 = arith.constant 0.000000e+00 : f32
    %209 = vector.shape_cast %208 : vector<1x256xi1> to vector<1x256xi1>
    %210 = vector.broadcast %209 : vector<1x256xi1> to vector<3x256xi1>
    %211 = vector.broadcast %cst_93 : f32 to vector<3x256xf32>
    %212 = arith.select %210, %203, %211 : vector<3x256xi1>, vector<3x256xf32>
    %213 = arith.addf %202, %212 : vector<3x256xf32>
    %c51 = arith.constant 51 : index
    %c144 = arith.constant 144 : index
    %214 = vector.load %arg11[%c51, %c144] : memref<75x512xf32, #tpu.memory_space<vmem>>, vector<3x256xf32>
    %215 = arith.addf %213, %214 : vector<3x256xf32>
    %c54_94 = arith.constant 54 : index
    %c145 = arith.constant 145 : index
    %216 = vector.load %arg11[%c54_94, %c145] : memref<75x512xf32, #tpu.memory_space<vmem>>, vector<3x256xf32>
    %c-1_i32_95 = arith.constant -1 : i32
    %217 = vector.broadcast %c-1_i32_95 : i32 to vector<1x256xi32>
    %218 = arith.cmpi sge, %52, %217 : vector<1x256xi32>
    %c15_i32_96 = arith.constant 15 : i32
    %219 = vector.broadcast %c15_i32_96 : i32 to vector<1x256xi32>
    %220 = arith.cmpi slt, %52, %219 : vector<1x256xi32>
    %221 = arith.andi %218, %220 : vector<1x256xi1>
    %cst_97 = arith.constant 0.000000e+00 : f32
    %222 = vector.shape_cast %221 : vector<1x256xi1> to vector<1x256xi1>
    %223 = vector.broadcast %222 : vector<1x256xi1> to vector<3x256xi1>
    %224 = vector.broadcast %cst_97 : f32 to vector<3x256xf32>
    %225 = arith.select %223, %216, %224 : vector<3x256xi1>, vector<3x256xf32>
    %226 = arith.addf %215, %225 : vector<3x256xf32>
    %c57 = arith.constant 57 : index
    %c146 = arith.constant 146 : index
    %227 = vector.load %arg11[%c57, %c146] : memref<75x512xf32, #tpu.memory_space<vmem>>, vector<3x256xf32>
    %c-2_i32_98 = arith.constant -2 : i32
    %228 = vector.broadcast %c-2_i32_98 : i32 to vector<1x256xi32>
    %229 = arith.cmpi sge, %52, %228 : vector<1x256xi32>
    %c14_i32_99 = arith.constant 14 : i32
    %230 = vector.broadcast %c14_i32_99 : i32 to vector<1x256xi32>
    %231 = arith.cmpi slt, %52, %230 : vector<1x256xi32>
    %232 = arith.andi %229, %231 : vector<1x256xi1>
    %cst_100 = arith.constant 0.000000e+00 : f32
    %233 = vector.shape_cast %232 : vector<1x256xi1> to vector<1x256xi1>
    %234 = vector.broadcast %233 : vector<1x256xi1> to vector<3x256xi1>
    %235 = vector.broadcast %cst_100 : f32 to vector<3x256xf32>
    %236 = arith.select %234, %227, %235 : vector<3x256xi1>, vector<3x256xf32>
    %237 = arith.addf %226, %236 : vector<3x256xf32>
    %c60 = arith.constant 60 : index
    %c158 = arith.constant 158 : index
    %238 = vector.load %arg11[%c60, %c158] : memref<75x512xf32, #tpu.memory_space<vmem>>, vector<3x256xf32>
    %c2_i32_101 = arith.constant 2 : i32
    %239 = vector.broadcast %c2_i32_101 : i32 to vector<1x256xi32>
    %240 = arith.cmpi sge, %52, %239 : vector<1x256xi32>
    %c18_i32_102 = arith.constant 18 : i32
    %241 = vector.broadcast %c18_i32_102 : i32 to vector<1x256xi32>
    %242 = arith.cmpi slt, %52, %241 : vector<1x256xi32>
    %243 = arith.andi %240, %242 : vector<1x256xi1>
    %cst_103 = arith.constant 0.000000e+00 : f32
    %244 = vector.shape_cast %243 : vector<1x256xi1> to vector<1x256xi1>
    %245 = vector.broadcast %244 : vector<1x256xi1> to vector<3x256xi1>
    %246 = vector.broadcast %cst_103 : f32 to vector<3x256xf32>
    %247 = arith.select %245, %238, %246 : vector<3x256xi1>, vector<3x256xf32>
    %248 = arith.addf %237, %247 : vector<3x256xf32>
    %c63 = arith.constant 63 : index
    %c159 = arith.constant 159 : index
    %249 = vector.load %arg11[%c63, %c159] : memref<75x512xf32, #tpu.memory_space<vmem>>, vector<3x256xf32>
    %c1_i32_104 = arith.constant 1 : i32
    %250 = vector.broadcast %c1_i32_104 : i32 to vector<1x256xi32>
    %251 = arith.cmpi sge, %52, %250 : vector<1x256xi32>
    %c17_i32_105 = arith.constant 17 : i32
    %252 = vector.broadcast %c17_i32_105 : i32 to vector<1x256xi32>
    %253 = arith.cmpi slt, %52, %252 : vector<1x256xi32>
    %254 = arith.andi %251, %253 : vector<1x256xi1>
    %cst_106 = arith.constant 0.000000e+00 : f32
    %255 = vector.shape_cast %254 : vector<1x256xi1> to vector<1x256xi1>
    %256 = vector.broadcast %255 : vector<1x256xi1> to vector<3x256xi1>
    %257 = vector.broadcast %cst_106 : f32 to vector<3x256xf32>
    %258 = arith.select %256, %249, %257 : vector<3x256xi1>, vector<3x256xf32>
    %259 = arith.addf %248, %258 : vector<3x256xf32>
    %c66 = arith.constant 66 : index
    %c160 = arith.constant 160 : index
    %260 = vector.load %arg11[%c66, %c160] : memref<75x512xf32, #tpu.memory_space<vmem>>, vector<3x256xf32>
    %261 = arith.addf %259, %260 : vector<3x256xf32>
    %c69 = arith.constant 69 : index
    %c161 = arith.constant 161 : index
    %262 = vector.load %arg11[%c69, %c161] : memref<75x512xf32, #tpu.memory_space<vmem>>, vector<3x256xf32>
    %c-1_i32_107 = arith.constant -1 : i32
    %263 = vector.broadcast %c-1_i32_107 : i32 to vector<1x256xi32>
    %264 = arith.cmpi sge, %52, %263 : vector<1x256xi32>
    %c15_i32_108 = arith.constant 15 : i32
    %265 = vector.broadcast %c15_i32_108 : i32 to vector<1x256xi32>
    %266 = arith.cmpi slt, %52, %265 : vector<1x256xi32>
    %267 = arith.andi %264, %266 : vector<1x256xi1>
    %cst_109 = arith.constant 0.000000e+00 : f32
    %268 = vector.shape_cast %267 : vector<1x256xi1> to vector<1x256xi1>
    %269 = vector.broadcast %268 : vector<1x256xi1> to vector<3x256xi1>
    %270 = vector.broadcast %cst_109 : f32 to vector<3x256xf32>
    %271 = arith.select %269, %262, %270 : vector<3x256xi1>, vector<3x256xf32>
    %272 = arith.addf %261, %271 : vector<3x256xf32>
    %c72 = arith.constant 72 : index
    %c162_110 = arith.constant 162 : index
    %273 = vector.load %arg11[%c72, %c162_110] : memref<75x512xf32, #tpu.memory_space<vmem>>, vector<3x256xf32>
    %c-2_i32_111 = arith.constant -2 : i32
    %274 = vector.broadcast %c-2_i32_111 : i32 to vector<1x256xi32>
    %275 = arith.cmpi sge, %52, %274 : vector<1x256xi32>
    %c14_i32_112 = arith.constant 14 : i32
    %276 = vector.broadcast %c14_i32_112 : i32 to vector<1x256xi32>
    %277 = arith.cmpi slt, %52, %276 : vector<1x256xi32>
    %278 = arith.andi %275, %277 : vector<1x256xi1>
    %cst_113 = arith.constant 0.000000e+00 : f32
    %279 = vector.shape_cast %278 : vector<1x256xi1> to vector<1x256xi1>
    %280 = vector.broadcast %279 : vector<1x256xi1> to vector<3x256xi1>
    %281 = vector.broadcast %cst_113 : f32 to vector<3x256xf32>
    %282 = arith.select %280, %273, %281 : vector<3x256xi1>, vector<3x256xf32>
    %283 = arith.addf %272, %282 : vector<3x256xf32>
    %c0_114 = arith.constant 0 : index
    %c0_115 = arith.constant 0 : index
    %284 = vector.load %arg7[%c0_114, %c0_115] : memref<3x1xf32, #tpu.memory_space<vmem>>, vector<3x1xf32>
    %285 = vector.broadcast %284 : vector<3x1xf32> to vector<3x256xf32>
    %286 = arith.addf %283, %285 : vector<3x256xf32>
    %c0_116 = arith.constant 0 : index
    %c0_117 = arith.constant 0 : index
    %c0_118 = arith.constant 0 : index
    %287 = vector.load %arg9[%c0_116, %c0_117, %c0_118] : memref<1x3x256xf32, #tpu.memory_space<vmem>>, vector<1x3x256xf32>
    %288 = vector.shape_cast %287 : vector<1x3x256xf32> to vector<3x256xf32>
    %289 = vector.shape_cast %286 : vector<3x256xf32> to vector<1x3x256xf32>
    tpu.vector_store %arg9[%c0_116, %c0_117, %c0_118], %289 {strides = array<i32>} : memref<1x3x256xf32, #tpu.memory_space<vmem>>, vector<1x3x256xf32>,
    return
  }
  func.func @transform_0(%arg0: i32) -> (i32, i32, i32) {
    %c0_i32 = arith.constant 0 : i32
    %c0_i32_0 = arith.constant 0 : i32
    %c0_i32_1 = arith.constant 0 : i32
    return %arg0, %c0_i32, %c0_i32_0 : i32, i32, i32
  }
  func.func @transform_1(%arg0: i32) -> (i32, i32) {
    %c0_i32 = arith.constant 0 : i32
    %c0_i32_0 = arith.constant 0 : i32
    %c0_i32_1 = arith.constant 0 : i32
    return %c0_i32, %c0_i32_0 : i32, i32
  }
  func.func @transform_2(%arg0: i32) -> (i32, i32) {
    %c0_i32 = arith.constant 0 : i32
    %c0_i32_0 = arith.constant 0 : i32
    %c0_i32_1 = arith.constant 0 : i32
    return %c0_i32, %c0_i32_0 : i32, i32
  }
  func.func @transform_3(%arg0: i32) -> (i32, i32) {
    %c0_i32 = arith.constant 0 : i32
    %c0_i32_0 = arith.constant 0 : i32
    %c0_i32_1 = arith.constant 0 : i32
    return %c0_i32, %c0_i32_0 : i32, i32
  }
  func.func @transform_4(%arg0: i32) -> (i32, i32) {
    %c0_i32 = arith.constant 0 : i32
    %c0_i32_0 = arith.constant 0 : i32
    %c0_i32_1 = arith.constant 0 : i32
    return %c0_i32, %c0_i32_0 : i32, i32
  }
  func.func @transform_5(%arg0: i32) -> (i32, i32) {
    %c0_i32 = arith.constant 0 : i32
    %c0_i32_0 = arith.constant 0 : i32
    %c0_i32_1 = arith.constant 0 : i32
    return %c0_i32, %c0_i32_0 : i32, i32
  }
  func.func @transform_6(%arg0: i32) -> (i32, i32) {
    %c0_i32 = arith.constant 0 : i32
    %c0_i32_0 = arith.constant 0 : i32
    %c0_i32_1 = arith.constant 0 : i32
    return %c0_i32, %c0_i32_0 : i32, i32
  }
  func.func @transform_7(%arg0: i32) -> (i32, i32) {
    %c0_i32 = arith.constant 0 : i32
    %c0_i32_0 = arith.constant 0 : i32
    %c0_i32_1 = arith.constant 0 : i32
    return %c0_i32, %c0_i32_0 : i32, i32
  }
  func.func @transform_8(%arg0: i32) -> (i32, i32, i32) {
    %c0_i32 = arith.constant 0 : i32
    %c0_i32_0 = arith.constant 0 : i32
    %c0_i32_1 = arith.constant 0 : i32
    return %arg0, %c0_i32, %c0_i32_0 : i32, i32, i32
  }
}

</mosaic_0001>

<bundles_post_ra>
// kernel: srcnn_forward.1
= control target key start
LH: loop header
LB: loop body
LE: loop exit
PB: predicated region body
PF: predicated region fallthrough
CT: control target
= control target key end

     0   :  { %s4190_s27 = smov 0   ;;  %s5825_s0 = inlined_call_operand.vmem [shape: bf16[2,384,27], index: 0, kind: input, shape index: {}]   ;;  %s5826_s1 = inlined_call_operand.vmem [shape: bf16[243,128], index: 1, kind: input, shape index: {}]   ;;  %s5827_s2 = inlined_call_operand.vmem [shape: f32[1,128], index: 2, kind: input, shape index: {}]   ;;  %s5828_s3 = inlined_call_operand.vmem [shape: bf16[128,128], index: 3, kind: input, shape index: {}]   ;;  %s5829_s4 = inlined_call_operand.vmem [shape: f32[1,128], index: 4, kind: input, shape index: {}]   ;;  %s5830_s5 = inlined_call_operand.vmem [shape: bf16[75,128], index: 5, kind: input, shape index: {}]   ;;  %s5831_s6 = inlined_call_operand.vmem [shape: f32[3,1], index: 6, kind: input, shape index: {}]   ;;  %s5832_s7 = inlined_call_operand.vmem [shape: s32[1,256], index: 7, kind: input, shape index: {}]   ;;  %s5833_s8 = inlined_call_operand.vmem [shape: f32[2,3,256], index: 8, kind: output, shape index: {}]  }
   0x1 LB: > { %s3729_s28 = sadd.s32 4294967295, %s4109_s27   ;;  %p3733_p0 = scmp.ge.s32.totalorder %s4109_s27, 1  ;;  %s4109_s27 = sphi %s4190_s27, %s18_s27  }
   0x2   : > { %p262_p1 = scmp.lt.s32.totalorder %s4109_s27, 3 }
   0x4   : > { %p263_p2 = pnand %p3733_p0, %p262_p1 }
   0x5   : > { %p296_p3 = scmp.lt.s32.totalorder (!%p263_p2), %s3729_s28, 1  ;;  %s4111_s11 = smov (!%p263_p2), 27  }
   0x6   : > { %266 = sbr.rel (%p263_p2) target bundleno = 1682 (0x692), region = 52  ;;  %s4112_s12 = smov (!%p263_p2), 54  }
   0x7   : > { %s4113_s13 = smov (!%p263_p2), 81   ;;  %s4114_s14 = smov (!%p263_p2), 108  }
   0x8   : > { %s4115_s15 = smov (!%p263_p2), 7   ;;  %s4116_s16 = smov (!%p263_p2), 34  }
   0x9   : > { %s4117_s17 = smov (!%p263_p2), 61   ;;  %s4118_s18 = smov (!%p263_p2), 88  }
   0xa   : > { %s4121_s19 = smov (!%p263_p2), 33   ;;  %s4122_s22 = smov (!%p263_p2), 32  }
   0xb   : > { %s5863_s28 = smov (!%p296_p3, %s3729_s28), 1  ;;  %vm338_vm0 = vcmask 216064   ;;  %vm531_vm1 = vcmask 437464   ;;  %vm724_vm2 = vcmask 658864   ;;  %vm2335_vm3 = vcmask 1040384   ;;  %s4123_s23 = smov 31  }
   0xc   : > { %s4056_s29 = smul.u32 192, %s5863_s28  ;;  %vm2336_vm4 = vcmask 1041408   ;;  %vm1110_vm5 = vcmask 883712   ;;  %vm1175_vm6 = vcmask 1044320   ;;  %vm1176_vm7 = vcmask 56324   ;;  %s4124_s24 = smov 30  }
   0xd   : > { %vm917_vm8 = vcmask 880264   ;;  %vm4593_vm9 = vmor %vm1176_vm7, %vm1175_vm6  ;;  %vm1370_vm10 = vcmask 273464   ;;  %vm1563_vm11 = vcmask 494864   ;;  %vm1756_vm12 = vcmask 716264   ;;  %s4125_s25 = smov 18   ;;  %s4126_s26 = smov 17  }
   0xe   : > { %s4204_s10 = scalar_lea.vmem %s5825_s0, %s4056_s29  ;;  %vm1949_vm13 = vcmask 937664   ;;  %vm2286_vm14 = vcmask 941056   ;;  %vm2945_vm15 = vcmask 1048304   ;;  %s4133_s20 = smov 127   ;;  %vm3199_vm6 = vcmask 138240  }
   0xf   : > { %v373_v0 = vld [vmem:[%s4204_s10 + $0x10] sm:$0xf]  ;;  %v371_v1 = vld [vmem:[%s4204_s10 + $0x8] sm:$0xf]  ;;  %v375_v2 = vld [vmem:[%s4204_s10 + $0x18] sm:$0xf] }
  0x10   : > { %439 = vrot.lane.b32.xlu1 %v373_v0, %s4111_s11  ;;  %435 = vrot.lane.b32.xlu0 %v371_v1, %s4111_s11  ;;  %v374_v3 = vld [vmem:[%s4204_s10 + $0x14] sm:$0xf]  ;;  %v372_v4 = vld [vmem:[%s4204_s10 + $0xc] sm:$0xf]  ;;  %s4134_s21 = smov 126   ;;  %s4135_s9 = smov 114  }
  0x11   : > { %443 = vrot.lane.b32.xlu2 %v375_v2, %s4111_s11  ;;  %v376_v5 = vld [vmem:[%s4204_s10 + $0x1c] sm:$0xf]  ;;  %v378_v6 = vld [vmem:[%s4204_s10 + $0x24] sm:$0xf]  ;;  %v377_v7 = vld [vmem:[%s4204_s10 + $0x20] sm:$0xf] }
  0x12   : > { %v379_v8 = vld [vmem:[%s4204_s10 + $0x28] sm:$0xf]  ;;  %v381_v9 = vld [vmem:[%s4204_s10 + $0x30] sm:$0xf]  ;;  %v380_v10 = vld [vmem:[%s4204_s10 + $0x2c] sm:$0xf] }
  0x13   : > { %v382_v11 = vld [vmem:[%s4204_s10 + $0x34] sm:$0xf]  ;;  %v384_v12 = vld [vmem:[%s4204_s10 + $0x3c] sm:$0xf]  ;;  %v383_v13 = vld [vmem:[%s4204_s10 + $0x38] sm:$0xf] }
  0x14   : > { %v385_v14 = vld [vmem:[%s4204_s10 + $0x40] sm:$0xf]  ;;  %v387_v15 = vld [vmem:[%s4204_s10 + $0x48] sm:$0xf]  ;;  %v386_v16 = vld [vmem:[%s4204_s10 + $0x44] sm:$0xf] }
  0x15   : > { %v388_v17 = vld [vmem:[%s4204_s10 + $0x4c] sm:$0xf]  ;;  %v390_v18 = vld [vmem:[%s4204_s10 + $0x54] sm:$0xf]  ;;  %v389_v19 = vld [vmem:[%s4204_s10 + $0x50] sm:$0xf] }
  0x16   : > { %v391_v20 = vld [vmem:[%s4204_s10 + $0x58] sm:$0xf]  ;;  %v393_v21 = vld [vmem:[%s4204_s10 + $0x60] sm:$0xf]  ;;  %v392_v22 = vld [vmem:[%s4204_s10 + $0x5c] sm:$0xf] }
  0x17   : > { %v394_v23 = vld [vmem:[%s4204_s10 + $0x64] sm:$0xf]  ;;  %v396_v24 = vld [vmem:[%s4204_s10 + $0x6c] sm:$0xf]  ;;  %v395_v25 = vld [vmem:[%s4204_s10 + $0x68] sm:$0xf] }
  0x18   : > { %441 = vrot.lane.b32.xlu1 %v374_v3, %s4111_s11  ;;  %437 = vrot.lane.b32.xlu0 %v372_v4, %s4111_s11  ;;  %v397_v26 = vld [vmem:[%s4204_s10 + $0x70] sm:$0xf]  ;;  %v399_v27 = vld [vmem:[%s4204_s10 + $0x78] sm:$0xf]  ;;  %s4139_s29 = smov 110   ;;  %s5837_s30 = smov 98  }
  0x19   : > { %445 = vrot.lane.b32.xlu2 %v376_v5, %s4111_s11  ;;  %v398_v28 = vld [vmem:[%s4204_s10 + $0x74] sm:$0xf]  ;;  %v400_v29 = vld [vmem:[%s4204_s10 + $0x7c] sm:$0xf]  ;;  %v402_v30 = vld [vmem:[%s4204_s10 + $0x84] sm:$0xf] }
  0x1a   : > { %v401_v31 = vld [vmem:[%s4204_s10 + $0x80] sm:$0xf]  ;;  %v564_v32 = vld [vmem:[%s4204_s10 + $0x10] sm:$0xf]  ;;  %v308_v34 = vld [vmem:[%s4204_s10 + $0x8] sm:$0xf] }
  0x1b   : > { %v306_v33 = vld [vmem:[%s4204_s10] sm:$0xf]  ;;  %341 = vst.msk [vmem:[#allocation2 + $0x10] sm:$0xf] %vm338_vm0, %v308_v34  ;;  %v310_v35 = vld [vmem:[%s4204_s10 + $0x10] sm:$0xf] }
  0x1c   : > { %339 = vst.msk [vmem:[#allocation2] sm:$0xf] %vm338_vm0, %v306_v33  ;;  %v566_v36 = vld [vmem:[%s4204_s10 + $0x18] sm:$0xf]  ;;  %v565_v37 = vld [vmem:[%s4204_s10 + $0x14] sm:$0xf] }
  0x1d   : > { %343 = vst.msk [vmem:[#allocation2 + $0x20] sm:$0xf] %vm338_vm0, %v310_v35  ;;  %v567_v38 = vld [vmem:[%s4204_s10 + $0x1c] sm:$0xf]  ;;  %v309_v39 = vld [vmem:[%s4204_s10 + $0xc] sm:$0xf] }
  0x1e   : > { %v307_v40 = vld [vmem:[%s4204_s10 + $0x4] sm:$0xf]  ;;  %342 = vst.msk [vmem:[#allocation2 + $0x18] sm:$0xf] %vm338_vm0, %v309_v39  ;;  %v311_v42 = vld [vmem:[%s4204_s10 + $0x14] sm:$0xf] }
  0x1f   : > { %v569_v41 = vld [vmem:[%s4204_s10 + $0x24] sm:$0xf]  ;;  %340 = vst.msk [vmem:[#allocation2 + $0x8] sm:$0xf] %vm338_vm0, %v307_v40  ;;  %v568_v43 = vld [vmem:[%s4204_s10 + $0x20] sm:$0xf] }
  0x20   : > { %449 = vrot.lane.b32.xlu1 %v378_v6, %s4111_s11  ;;  %447 = vrot.lane.b32.xlu0 %v377_v7, %s4111_s11  ;;  %344 = vst.msk [vmem:[#allocation2 + $0x28] sm:$0xf] %vm338_vm0, %v311_v42  ;;  %v570_v45 = vld [vmem:[%s4204_s10 + $0x28] sm:$0xf]  ;;  %v313_v46 = vld [vmem:[%s4204_s10 + $0x1c] sm:$0xf] }
  0x21   : > { %451 = vrot.lane.b32.xlu2 %v379_v8, %s4111_s11  ;;  %v312_v47 = vld [vmem:[%s4204_s10 + $0x18] sm:$0xf]  ;;  %346 = vst.msk [vmem:[#allocation2 + $0x38] sm:$0xf] %vm338_vm0, %v313_v46  ;;  %v314_v48 = vld [vmem:[%s4204_s10 + $0x20] sm:$0xf] }
  0x22   : > { %345 = vst.msk [vmem:[#allocation2 + $0x30] sm:$0xf] %vm338_vm0, %v312_v47  ;;  %v572_v49 = vld [vmem:[%s4204_s10 + $0x30] sm:$0xf]  ;;  %v571_v50 = vld [vmem:[%s4204_s10 + $0x2c] sm:$0xf] }
  0x23   : > { %347 = vst.msk [vmem:[#allocation2 + $0x40] sm:$0xf] %vm338_vm0, %v314_v48  ;;  %v573_v52 = vld [vmem:[%s4204_s10 + $0x34] sm:$0xf]  ;;  %v316_v53 = vld [vmem:[%s4204_s10 + $0x28] sm:$0xf] }
  0x24   : > { %v315_v54 = vld [vmem:[%s4204_s10 + $0x24] sm:$0xf]  ;;  %349 = vst.msk [vmem:[#allocation2 + $0x50] sm:$0xf] %vm338_vm0, %v316_v53  ;;  %v317_v55 = vld [vmem:[%s4204_s10 + $0x2c] sm:$0xf] }
  0x25   : > { %348 = vst.msk [vmem:[#allocation2 + $0x48] sm:$0xf] %vm338_vm0, %v315_v54  ;;  %v575_v56 = vld [vmem:[%s4204_s10 + $0x3c] sm:$0xf]  ;;  %v574_v57 = vld [vmem:[%s4204_s10 + $0x38] sm:$0xf] }
  0x26   : > { %350 = vst.msk [vmem:[#allocation2 + $0x58] sm:$0xf] %vm338_vm0, %v317_v55  ;;  %v576_v59 = vld [vmem:[%s4204_s10 + $0x40] sm:$0xf]  ;;  %v319_v62 = vld [vmem:[%s4204_s10 + $0x34] sm:$0xf] }
  0x27   : > { %v578_v63 = vld [vmem:[%s4204_s10 + $0x48] sm:$0xf]  ;;  %v318_v0 = vld [vmem:[%s4204_s10 + $0x30] sm:$0xf]  ;;  %v577_v1 = vld [vmem:[%s4204_s10 + $0x44] sm:$0xf] }
  0x28   : > { %455 = vrot.lane.b32.xlu1 %v381_v9, %s4111_s11  ;;  %453 = vrot.lane.b32.xlu0 %v380_v10, %s4111_s11  ;;  %352 = vst.msk [vmem:[#allocation2 + $0x68] sm:$0xf] %vm338_vm0, %v319_v62  ;;  %v320_v3 = vld [vmem:[%s4204_s10 + $0x38] sm:$0xf]  ;;  %v579_v4 = vld [vmem:[%s4204_s10 + $0x4c] sm:$0xf] }
  0x29   : > { %457 = vrot.lane.b32.xlu2 %v382_v11, %s4111_s11  ;;  %351 = vst.msk [vmem:[#allocation2 + $0x60] sm:$0xf] %vm338_vm0, %v318_v0  ;;  %v322_v7 = vld [vmem:[%s4204_s10 + $0x40] sm:$0xf]  ;;  %v581_v8 = vld [vmem:[%s4204_s10 + $0x54] sm:$0xf] }
  0x2a   : > { %353 = vst.msk [vmem:[#allocation2 + $0x70] sm:$0xf] %vm338_vm0, %v320_v3  ;;  %v321_v9 = vld [vmem:[%s4204_s10 + $0x3c] sm:$0xf]  ;;  %v580_v10 = vld [vmem:[%s4204_s10 + $0x50] sm:$0xf] }
  0x2b   : > { %355 = vst.msk [vmem:[#allocation2 + $0x80] sm:$0xf] %vm338_vm0, %v322_v7  ;;  %v331_v34 = vld [vmem:[%s4204_s10 + $0x64] sm:$0xf]  ;;  %v590_v35 = vld [vmem:[%s4204_s10 + $0x78] sm:$0xf] }
  0x2c   : > { %354 = vst.msk [vmem:[#allocation2 + $0x78] sm:$0xf] %vm338_vm0, %v321_v9  ;;  %v332_v39 = vld [vmem:[%s4204_s10 + $0x68] sm:$0xf]  ;;  %v591_v40 = vld [vmem:[%s4204_s10 + $0x7c] sm:$0xf] }
  0x2d   : > { %364 = vst.msk [vmem:[#allocation2 + $0xc8] sm:$0xf] %vm338_vm0, %v331_v34  ;;  %v592_v46 = vld [vmem:[%s4204_s10 + $0x80] sm:$0xf]  ;;  %v335_v48 = vld [vmem:[%s4204_s10 + $0x74] sm:$0xf] }
  0x2e   : > { %365 = vst.msk [vmem:[#allocation2 + $0xd0] sm:$0xf] %vm338_vm0, %v332_v39  ;;  %v336_v53 = vld [vmem:[%s4204_s10 + $0x78] sm:$0xf]  ;;  %v595_v55 = vld [vmem:[%s4204_s10 + $0x8c] sm:$0xf] }
  0x2f   : > { %368 = vst.msk [vmem:[#allocation2 + $0xe8] sm:$0xf] %vm338_vm0, %v335_v48  ;;  %v757_v54 = vld [vmem:[%s4204_s10 + $0x18] sm:$0xf]  ;;  %v1211_v3 = vld [vmem:[%s4204_s10 + $0x2c] sm:$0xf] }
  0x30   : > { %461 = vrot.lane.b32.xlu1 %v384_v12, %s4111_s11  ;;  %459 = vrot.lane.b32.xlu0 %v383_v13, %s4111_s11  ;;  %v323_v12 = vld [vmem:[%s4204_s10 + $0x44] sm:$0xf]  ;;  %v582_v13 = vld [vmem:[%s4204_s10 + $0x58] sm:$0xf]  ;;  %369 = vst.msk [vmem:[#allocation2 + $0xf0] sm:$0xf] %vm338_vm0, %v336_v53 }
  0x31   : > { %463 = vrot.lane.b32.xlu2 %v385_v14, %s4111_s11  ;;  %356 = vst.msk [vmem:[#allocation2 + $0x88] sm:$0xf] %vm338_vm0, %v323_v12  ;;  %v1596_v9 = vld [vmem:[%s4204_s10 + $0x38] sm:$0xf]  ;;  %v1792_v39 = vld [vmem:[%s4204_s10 + $0x4c] sm:$0xf] }
  0x32   : > { %v4035_v48 = vld [vmem:[%s5826_s1 + $0x38] sm:$0xff] }
  0x33   : > { %2342 = vmatpush.bf16.msra.mxu0 %v4035_v48  ;;  %v1215_v53 = vld [vmem:[%s4204_s10 + $0x3c] sm:$0xf] }
  0x38   : > { %467 = vrot.lane.b32.xlu1 %v387_v15, %s4111_s11  ;;  %465 = vrot.lane.b32.xlu0 %v386_v16, %s4111_s11  ;;  %v325_v16 = vld [vmem:[%s4204_s10 + $0x4c] sm:$0xf] }
  0x39   : > { %469 = vrot.lane.b32.xlu2 %v388_v17, %s4111_s11  ;;  %v584_v17 = vld [vmem:[%s4204_s10 + $0x60] sm:$0xf]  ;;  %358 = vst.msk [vmem:[#allocation2 + $0x98] sm:$0xf] %vm338_vm0, %v325_v16 }
  0x40   : > { %473 = vrot.lane.b32.xlu1 %v390_v18, %s4111_s11  ;;  %471 = vrot.lane.b32.xlu0 %v389_v19, %s4111_s11  ;;  %v324_v18 = vld [vmem:[%s4204_s10 + $0x48] sm:$0xf]  ;;  %v583_v19 = vld [vmem:[%s4204_s10 + $0x5c] sm:$0xf] }
  0x41   : > { %475 = vrot.lane.b32.xlu2 %v391_v20, %s4111_s11  ;;  %357 = vst.msk [vmem:[#allocation2 + $0x90] sm:$0xf] %vm338_vm0, %v324_v18 }
  0x48   : > { %479 = vrot.lane.b32.xlu1 %v393_v21, %s4111_s11  ;;  %477 = vrot.lane.b32.xlu0 %v392_v22, %s4111_s11  ;;  %v326_v21 = vld [vmem:[%s4204_s10 + $0x50] sm:$0xf]  ;;  %v585_v22 = vld [vmem:[%s4204_s10 + $0x64] sm:$0xf] }
  0x49   : > { %481 = vrot.lane.b32.xlu2 %v394_v23, %s4111_s11  ;;  %359 = vst.msk [vmem:[#allocation2 + $0xa0] sm:$0xf] %vm338_vm0, %v326_v21  ;;  %v759_v21 = vld [vmem:[%s4204_s10 + $0x20] sm:$0xf] }
  0x50   : > { %485 = vrot.lane.b32.xlu1 %v396_v24, %s4111_s11  ;;  %483 = vrot.lane.b32.xlu0 %v395_v25, %s4111_s11  ;;  %v328_v25 = vld [vmem:[%s4204_s10 + $0x58] sm:$0xf] }
  0x51   : > { %487 = vrot.lane.b32.xlu2 %v397_v26, %s4111_s11  ;;  %v587_v26 = vld [vmem:[%s4204_s10 + $0x6c] sm:$0xf]  ;;  %361 = vst.msk [vmem:[#allocation2 + $0xb0] sm:$0xf] %vm338_vm0, %v328_v25 }
  0x58   : > { %491 = vrot.lane.b32.xlu1 %v399_v27, %s4111_s11  ;;  %489 = vrot.lane.b32.xlu0 %v398_v28, %s4111_s11  ;;  %v327_v27 = vld [vmem:[%s4204_s10 + $0x54] sm:$0xf]  ;;  %v586_v28 = vld [vmem:[%s4204_s10 + $0x68] sm:$0xf] }
  0x59   : > { %493 = vrot.lane.b32.xlu2 %v400_v29, %s4111_s11  ;;  %360 = vst.msk [vmem:[#allocation2 + $0xa8] sm:$0xf] %vm338_vm0, %v327_v27  ;;  %v1213_v27 = vld [vmem:[%s4204_s10 + $0x34] sm:$0xf] }
  0x60   : > { %497 = vrot.lane.b32.xlu1 %v402_v30, %s4111_s11  ;;  %495 = vrot.lane.b32.xlu0 %v401_v31, %s4111_s11  ;;  %v329_v30 = vld [vmem:[%s4204_s10 + $0x5c] sm:$0xf]  ;;  %v588_v31 = vld [vmem:[%s4204_s10 + $0x70] sm:$0xf]  ;;  %s4130_s11 = smov 2  }
  0x61   : > { %628 = vrot.lane.b32.xlu2 %v564_v32, %s4112_s12  ;;  %362 = vst.msk [vmem:[#allocation2 + $0xb8] sm:$0xf] %vm338_vm0, %v329_v30 }
  0x68   : > { %632 = vrot.lane.b32.xlu1 %v566_v36, %s4112_s12  ;;  %630 = vrot.lane.b32.xlu0 %v565_v37, %s4112_s12  ;;  %v330_v36 = vld [vmem:[%s4204_s10 + $0x60] sm:$0xf]  ;;  %v589_v37 = vld [vmem:[%s4204_s10 + $0x74] sm:$0xf] }
  0x69   : > { %634 = vrot.lane.b32.xlu2 %v567_v38, %s4112_s12  ;;  %363 = vst.msk [vmem:[#allocation2 + $0xc0] sm:$0xf] %vm338_vm0, %v330_v36 }
  0x6b   : > { %v444_v44 = vpop.permute.xlu2 %443 }
  0x6c   : > { %536 = vst.msk [vmem:[#allocation2 + $0x20] sm:$0xf] %vm531_vm1, %v444_v44  ;;  %v593_v44 = vld [vmem:[%s4204_s10 + $0x84] sm:$0xf] }
  0x70   : > { %638 = vrot.lane.b32.xlu1 %v569_v41, %s4112_s12  ;;  %636 = vrot.lane.b32.xlu0 %v568_v43, %s4112_s12  ;;  %v334_v43 = vld [vmem:[%s4204_s10 + $0x70] sm:$0xf] }
  0x71   : > { %640 = vrot.lane.b32.xlu2 %v570_v45, %s4112_s12  ;;  %v333_v45 = vld [vmem:[%s4204_s10 + $0x6c] sm:$0xf]  ;;  %367 = vst.msk [vmem:[#allocation2 + $0xe0] sm:$0xf] %vm338_vm0, %v334_v43 }
  0x72   : > { %366 = vst.msk [vmem:[#allocation2 + $0xd8] sm:$0xf] %vm338_vm0, %v333_v45  ;;  %v761_v45 = vld [vmem:[%s4204_s10 + $0x28] sm:$0xf] }
  0x73   : > { %v446_v51 = vpop.permute.xlu2 %445 }
  0x74   : > { %537 = vst.msk [vmem:[#allocation2 + $0x28] sm:$0xf] %vm531_vm1, %v446_v51 }
  0x78   : > { %644 = vrot.lane.b32.xlu1 %v572_v49, %s4112_s12  ;;  %642 = vrot.lane.b32.xlu0 %v571_v50, %s4112_s12  ;;  %v594_v49 = vld [vmem:[%s4204_s10 + $0x88] sm:$0xf] }
  0x79   : > { %646 = vrot.lane.b32.xlu2 %v573_v52, %s4112_s12  ;;  %v337_v52 = vld [vmem:[%s4204_s10 + $0x7c] sm:$0xf] }
  0x7a   : > { %370 = vst.msk [vmem:[#allocation2 + $0xf8] sm:$0xf] %vm338_vm0, %v337_v52  ;;  %v1407_v52 = vld [vmem:[%s4204_s10 + $0x40] sm:$0xf]  ;;  %vm2957_vm0 = vcmask 277504  }
  0x7b   : > { %v452_v58 = vpop.permute.xlu2 %451 }
  0x7c   : > { %540 = vst.msk [vmem:[#allocation2 + $0x40] sm:$0xf] %vm531_vm1, %v452_v58 }
  0x80   : > { %650 = vrot.lane.b32.xlu1 %v575_v56, %s4112_s12  ;;  %648 = vrot.lane.b32.xlu0 %v574_v57, %s4112_s12  ;;  %v950_v57 = vld [vmem:[%s4204_s10 + $0x20] sm:$0xf] }
  0x81   : > { %652 = vrot.lane.b32.xlu2 %v576_v59, %s4112_s12 }
  0x82   : > { %v440_v60 = vpop.permute.xlu1 %439  ;;  %v436_v61 = vpop.permute.xlu0 %435 }
  0x83   : > { %534 = vst.msk [vmem:[#allocation2 + $0x10] sm:$0xf] %vm531_vm1, %v440_v60  ;;  %v458_v2 = vpop.permute.xlu2 %457  ;;  %v758_v60 = vld [vmem:[%s4204_s10 + $0x1c] sm:$0xf] }
  0x84   : > { %532 = vst.msk [vmem:[#allocation2] sm:$0xf] %vm531_vm1, %v436_v61  ;;  %v951_v61 = vld [vmem:[%s4204_s10 + $0x24] sm:$0xf] }
  0x85   : > { %543 = vst.msk [vmem:[#allocation2 + $0x58] sm:$0xf] %vm531_vm1, %v458_v2  ;;  %v1403_v2 = vld [vmem:[%s4204_s10 + $0x30] sm:$0xf] }
  0x88   : > { %656 = vrot.lane.b32.xlu1 %v578_v63, %s4112_s12  ;;  %654 = vrot.lane.b32.xlu0 %v577_v1, %s4112_s12  ;;  %v1210_v63 = vld [vmem:[%s4204_s10 + $0x28] sm:$0xf] }
  0x89   : > { %658 = vrot.lane.b32.xlu2 %v579_v4, %s4112_s12 }
  0x8a   : > { %v442_v5 = vpop.permute.xlu1 %441  ;;  %v438_v6 = vpop.permute.xlu0 %437 }
  0x8b   : > { %535 = vst.msk [vmem:[#allocation2 + $0x18] sm:$0xf] %vm531_vm1, %v442_v5  ;;  %v464_v11 = vpop.permute.xlu2 %463  ;;  %v1404_v5 = vld [vmem:[%s4204_s10 + $0x34] sm:$0xf] }
  0x8c   : > { %533 = vst.msk [vmem:[#allocation2 + $0x8] sm:$0xf] %vm531_vm1, %v438_v6 }
  0x8d   : > { %546 = vst.msk [vmem:[#allocation2 + $0x70] sm:$0xf] %vm531_vm1, %v464_v11  ;;  %v1789_v11 = vld [vmem:[%s4204_s10 + $0x40] sm:$0xf] }
  0x90   : > { %662 = vrot.lane.b32.xlu1 %v581_v8, %s4112_s12  ;;  %660 = vrot.lane.b32.xlu0 %v580_v10, %s4112_s12  ;;  %v1597_v8 = vld [vmem:[%s4204_s10 + $0x3c] sm:$0xf] }
  0x91   : > { %664 = vrot.lane.b32.xlu2 %v582_v13, %s4112_s12 }
  0x92   : > { %v450_v14 = vpop.permute.xlu1 %449  ;;  %v448_v15 = vpop.permute.xlu0 %447 }
  0x93   : > { %539 = vst.msk [vmem:[#allocation2 + $0x38] sm:$0xf] %vm531_vm1, %v450_v14  ;;  %v470_v20 = vpop.permute.xlu2 %469  ;;  %v952_v14 = vld [vmem:[%s4204_s10 + $0x28] sm:$0xf] }
  0x94   : > { %538 = vst.msk [vmem:[#allocation2 + $0x30] sm:$0xf] %vm531_vm1, %v448_v15  ;;  %v1790_v15 = vld [vmem:[%s4204_s10 + $0x44] sm:$0xf] }
  0x95   : > { %549 = vst.msk [vmem:[#allocation2 + $0x88] sm:$0xf] %vm531_vm1, %v470_v20  ;;  %v760_v20 = vld [vmem:[%s4204_s10 + $0x24] sm:$0xf] }
  0x98   : > { %668 = vrot.lane.b32.xlu1 %v584_v17, %s4112_s12  ;;  %666 = vrot.lane.b32.xlu0 %v583_v19, %s4112_s12  ;;  %v953_v17 = vld [vmem:[%s4204_s10 + $0x2c] sm:$0xf] }
  0x99   : > { %670 = vrot.lane.b32.xlu2 %v585_v22, %s4112_s12 }
  0x9a   : > { %v456_v23 = vpop.permute.xlu1 %455  ;;  %v454_v24 = vpop.permute.xlu0 %453 }
  0x9b   : > { %542 = vst.msk [vmem:[#allocation2 + $0x50] sm:$0xf] %vm531_vm1, %v456_v23  ;;  %v476_v29 = vpop.permute.xlu2 %475  ;;  %v1212_v23 = vld [vmem:[%s4204_s10 + $0x30] sm:$0xf] }
  0x9c   : > { %541 = vst.msk [vmem:[#allocation2 + $0x48] sm:$0xf] %vm531_vm1, %v454_v24 }
  0x9d   : > { %552 = vst.msk [vmem:[#allocation2 + $0xa0] sm:$0xf] %vm531_vm1, %v476_v29  ;;  %v1406_v29 = vld [vmem:[%s4204_s10 + $0x3c] sm:$0xf] }
  0xa0   : > { %674 = vrot.lane.b32.xlu1 %v587_v26, %s4112_s12  ;;  %672 = vrot.lane.b32.xlu0 %v586_v28, %s4112_s12  ;;  %v1405_v26 = vld [vmem:[%s4204_s10 + $0x38] sm:$0xf] }
  0xa1   : > { %676 = vrot.lane.b32.xlu2 %v588_v31, %s4112_s12 }
  0xa2   : > { %v462_v32 = vpop.permute.xlu1 %461  ;;  %v460_v33 = vpop.permute.xlu0 %459 }
  0xa3   : > { %545 = vst.msk [vmem:[#allocation2 + $0x68] sm:$0xf] %vm531_vm1, %v462_v32  ;;  %v482_v38 = vpop.permute.xlu2 %481  ;;  %v1599_v32 = vld [vmem:[%s4204_s10 + $0x44] sm:$0xf] }
  0xa4   : > { %544 = vst.msk [vmem:[#allocation2 + $0x60] sm:$0xf] %vm531_vm1, %v460_v33  ;;  %v1598_v33 = vld [vmem:[%s4204_s10 + $0x40] sm:$0xf] }
  0xa5   : > { %555 = vst.msk [vmem:[#allocation2 + $0xb8] sm:$0xf] %vm531_vm1, %v482_v38  ;;  %v954_v38 = vld [vmem:[%s4204_s10 + $0x30] sm:$0xf] }
  0xa8   : > { %680 = vrot.lane.b32.xlu1 %v590_v35, %s4112_s12  ;;  %678 = vrot.lane.b32.xlu0 %v589_v37, %s4112_s12  ;;  %v1791_v35 = vld [vmem:[%s4204_s10 + $0x48] sm:$0xf] }
  0xa9   : > { %682 = vrot.lane.b32.xlu2 %v591_v40, %s4112_s12 }
  0xaa   : > { %v468_v41 = vpop.permute.xlu1 %467  ;;  %v466_v42 = vpop.permute.xlu0 %465 }
  0xab   : > { %548 = vst.msk [vmem:[#allocation2 + $0x80] sm:$0xf] %vm531_vm1, %v468_v41  ;;  %v488_v47 = vpop.permute.xlu2 %487  ;;  %v955_v41 = vld [vmem:[%s4204_s10 + $0x34] sm:$0xf] }
  0xac   : > { %547 = vst.msk [vmem:[#allocation2 + $0x78] sm:$0xf] %vm531_vm1, %v466_v42 }
  0xad   : > { %558 = vst.msk [vmem:[#allocation2 + $0xd0] sm:$0xf] %vm531_vm1, %v488_v47  ;;  %v1214_v47 = vld [vmem:[%s4204_s10 + $0x38] sm:$0xf] }
  0xb0   : > { %686 = vrot.lane.b32.xlu1 %v593_v44, %s4112_s12  ;;  %684 = vrot.lane.b32.xlu0 %v592_v46, %s4112_s12  ;;  %v762_v44 = vld [vmem:[%s4204_s10 + $0x2c] sm:$0xf] }
  0xb1   : > { %688 = vrot.lane.b32.xlu2 %v594_v49, %s4112_s12 }
  0xb2   : > { %v474_v50 = vpop.permute.xlu1 %473  ;;  %v472_v51 = vpop.permute.xlu0 %471 }
  0xb3   : > { %551 = vst.msk [vmem:[#allocation2 + $0x98] sm:$0xf] %vm531_vm1, %v474_v50  ;;  %v494_v56 = vpop.permute.xlu2 %493 }
  0xb4   : > { %550 = vst.msk [vmem:[#allocation2 + $0x90] sm:$0xf] %vm531_vm1, %v472_v51  ;;  %v4034_v51 = vld [vmem:[%s5826_s1 + $0x30] sm:$0xff] }
  0xb5   : > { %561 = vst.msk [vmem:[#allocation2 + $0xe8] sm:$0xf] %vm531_vm1, %v494_v56  ;;  %2343 = vmatpush.bf16.msra.mxu0 %v4034_v51  ;;  %v4033_v56 = vld [vmem:[%s5826_s1 + $0x28] sm:$0xff] }
  0xb8   : > { %821 = vrot.lane.b32.xlu1 %v757_v54, %s4113_s13  ;;  %690 = vrot.lane.b32.xlu0 %v595_v55, %s4112_s12  ;;  %v1408_v55 = vld [vmem:[%s4204_s10 + $0x44] sm:$0xf]  ;;  %s4131_s12 = smov 1  }
  0xb9   : > { %1014 = vrot.lane.b32.xlu2 %v950_v57, %s4114_s14  ;;  %2344 = vmatpush.bf16.msra.mxu0 %v4033_v56  ;;  %v765_v56 = vld [vmem:[%s4204_s10 + $0x38] sm:$0xf] }
  0xba   : > { %v480_v58 = vpop.permute.xlu1 %479  ;;  %v478_v59 = vpop.permute.xlu0 %477 }
  0xbb   : > { %554 = vst.msk [vmem:[#allocation2 + $0xb0] sm:$0xf] %vm531_vm1, %v480_v58  ;;  %v629_v62 = vpop.permute.xlu2 %628 }
  0xbc   : > { %553 = vst.msk [vmem:[#allocation2 + $0xa8] sm:$0xf] %vm531_vm1, %v478_v59  ;;  %v4032_v59 = vld [vmem:[%s5826_s1 + $0x20] sm:$0xff] }
  0xbd   : > { %725 = vst.msk [vmem:[#allocation2] sm:$0xf] %vm724_vm2, %v629_v62  ;;  %2345 = vmatpush.bf16.msra.mxu0 %v4032_v59 }
  0xc0   : > { %823 = vrot.lane.b32.xlu1 %v758_v60, %s4113_s13  ;;  %1016 = vrot.lane.b32.xlu0 %v951_v61, %s4114_s14  ;;  %v1601_v60 = vld [vmem:[%s4204_s10 + $0x4c] sm:$0xf]  ;;  %v1600_v61 = vld [vmem:[%s4204_s10 + $0x48] sm:$0xf] }
  0xc1   : > { %1274 = vrot.lane.b32.xlu2 %v1210_v63, %s4115_s15  ;;  %v1793_v63 = vld [vmem:[%s4204_s10 + $0x50] sm:$0xf] }
  0xc2   : > { %v486_v0 = vpop.permute.xlu1 %485  ;;  %v484_v1 = vpop.permute.xlu0 %483 }
  0xc3   : > { %557 = vst.msk [vmem:[#allocation2 + $0xc8] sm:$0xf] %vm531_vm1, %v486_v0  ;;  %v635_v4 = vpop.permute.xlu2 %634  ;;  %v4031_v0 = vld [vmem:[%s5826_s1 + $0x18] sm:$0xff] }
  0xc4   : > { %556 = vst.msk [vmem:[#allocation2 + $0xc0] sm:$0xf] %vm531_vm1, %v484_v1  ;;  %v2044_v1 = vld [vmem:[%s5826_s1 + $0x78] sm:$0x3]  ;;  %2346 = vmatpush.bf16.msra.mxu0 %v4031_v0  ;;  %v1411_v0 = vld [vmem:[%s4204_s10 + $0x50] sm:$0xf] }
  0xc5   : > { %728 = vst.msk [vmem:[#allocation2 + $0x18] sm:$0xf] %vm724_vm2, %v635_v4  ;;  %v2254_v4 = vunpack.c.l.b16 %v2044_v1  ;;  %v1219_v1 = vld [vmem:[%s4204_s10 + $0x4c] sm:$0xf] }
  0xc8   : > { %1467 = vrot.lane.b32.xlu1 %v1403_v2, %s4116_s16  ;;  %1276 = vrot.lane.b32.xlu0 %v1211_v3, %s4115_s15 }
  0xc9   : > { %1469 = vrot.lane.b32.xlu2 %v1404_v5, %s4116_s16  ;;  %v4119_v5 = vmov 65535  }
  0xca   : > { %v492_v6 = vpop.permute.xlu1 %491  ;;  %v490_v7 = vpop.permute.xlu0 %489 }
  0xcb   : > { %560 = vst.msk [vmem:[#allocation2 + $0xe0] sm:$0xf] %vm531_vm1, %v492_v6  ;;  %v641_v10 = vpop.permute.xlu2 %640  ;;  %v2337_v6 = vsel %vm2335_vm3, 4294967295, %v4119_v5 }
  0xcc   : > { %559 = vst.msk [vmem:[#allocation2 + $0xd8] sm:$0xf] %vm531_vm1, %v490_v7  ;;  %v4030_v7 = vld [vmem:[%s5826_s1 + $0x10] sm:$0xff] }
  0xcd   : > { %731 = vst.msk [vmem:[#allocation2 + $0x30] sm:$0xf] %vm724_vm2, %v641_v10  ;;  %v956_v10 = vld [vmem:[%s4204_s10 + $0x38] sm:$0xf]  ;;  %2347 = vmatpush.bf16.msra.mxu0 %v4030_v7  ;;  %v1605_v7 = vld [vmem:[%s4204_s10 + $0x5c] sm:$0xf] }
  0xd0   : > { %1662 = vrot.lane.b32.xlu1 %v1597_v8, %s4117_s17  ;;  %1660 = vrot.lane.b32.xlu0 %v1596_v9, %s4117_s17  ;;  %v2270_v8 = vpack.c.b16 %v2254_v4, %v2254_v4  ;;  %v2338_v9 = vsel %vm2336_vm4, %v2337_v6, 0 }
  0xd1   : > { %1853 = vrot.lane.b32.xlu2 %v1789_v11, %s4118_s18  ;;  %v1794_v11 = vld [vmem:[%s4204_s10 + $0x54] sm:$0xf] }
  0xd2   : > { %v498_v12 = vpop.permute.xlu1 %497  ;;  %v496_v13 = vpop.permute.xlu0 %495 }
  0xd3   : > { %563 = vst.msk [vmem:[#allocation2 + $0xf8] sm:$0xf] %vm531_vm1, %v498_v12  ;;  %v647_v16 = vpop.permute.xlu2 %646 }
  0xd4   : > { %562 = vst.msk [vmem:[#allocation2 + $0xf0] sm:$0xf] %vm531_vm1, %v496_v13  ;;  %v2340_v13 = vand.u32 %v2338_v9, %v2270_v8  ;;  %v1604_v8 = vld [vmem:[%s4204_s10 + $0x58] sm:$0xf] }
  0xd5   : > { %734 = vst.msk [vmem:[#allocation2 + $0x48] sm:$0xf] %vm724_vm2, %v647_v16  ;;  %v4042_v16 = vld [vmem:[%s5826_s1 + $0x70] sm:$0xff] }
  0xd6   : > { %2431 = vmatpush.bf16.msra.mxu1 %v2340_v13 }
  0xd8   : > { %1018 = vrot.lane.b32.xlu1 %v952_v14, %s4114_s14  ;;  %1855 = vrot.lane.b32.xlu0 %v1790_v15, %s4118_s18  ;;  %v957_v14 = vld [vmem:[%s4204_s10 + $0x3c] sm:$0xf]  ;;  %v4029_v15 = vld [vmem:[%s5826_s1 + $0x8] sm:$0xff] }
  0xd9   : > { %1020 = vrot.lane.b32.xlu2 %v953_v17, %s4114_s14  ;;  %2348 = vmatpush.bf16.msra.mxu0 %v4029_v15 }
  0xda   : > { %v633_v18 = vpop.permute.xlu1 %632  ;;  %v631_v19 = vpop.permute.xlu0 %630  ;;  %2432 = vmatpush.bf16.msra.mxu1 %v4042_v16 }
  0xdb   : > { %727 = vst.msk [vmem:[#allocation2 + $0x10] sm:$0xf] %vm724_vm2, %v633_v18  ;;  %v653_v22 = vpop.permute.xlu2 %652 }
  0xdc   : > { %726 = vst.msk [vmem:[#allocation2 + $0x8] sm:$0xf] %vm724_vm2, %v631_v19  ;;  %v4028_v19 = vld [vmem:[%s5826_s1] sm:$0xff] }
  0xdd   : > { %737 = vst.msk [vmem:[#allocation2 + $0x60] sm:$0xf] %vm724_vm2, %v653_v22  ;;  %2349 = vmatpush.bf16.msra.mxu0 %v4028_v19  ;;  %v960_v19 = vld [vmem:[%s4204_s10 + $0x48] sm:$0xf] }
  0xe0   : > { %827 = vrot.lane.b32.xlu1 %v760_v20, %s4113_s13  ;;  %825 = vrot.lane.b32.xlu0 %v759_v21, %s4113_s13  ;;  %v764_v20 = vld [vmem:[%s4204_s10 + $0x34] sm:$0xf]  ;;  %v763_v21 = vld [vmem:[%s4204_s10 + $0x30] sm:$0xf] }
  0xe1   : > { %1278 = vrot.lane.b32.xlu2 %v1212_v23, %s4115_s15  ;;  %v4041_v23 = vld [vmem:[%s5826_s1 + $0x68] sm:$0xff] }
  0xe2   : > { %v639_v24 = vpop.permute.xlu1 %638  ;;  %v637_v25 = vpop.permute.xlu0 %636  ;;  %2433 = vmatpush.bf16.msra.mxu1 %v4041_v23 }
  0xe3   : > { %730 = vst.msk [vmem:[#allocation2 + $0x28] sm:$0xf] %vm724_vm2, %v639_v24  ;;  %v659_v28 = vpop.permute.xlu2 %658  ;;  %v1216_v24 = vld [vmem:[%s4204_s10 + $0x40] sm:$0xf] }
  0xe4   : > { %729 = vst.msk [vmem:[#allocation2 + $0x20] sm:$0xf] %vm724_vm2, %v637_v25  ;;  %v4040_v25 = vld [vmem:[%s5826_s1 + $0x60] sm:$0xff] }
  0xe5   : > { %740 = vst.msk [vmem:[#allocation2 + $0x78] sm:$0xf] %vm724_vm2, %v659_v28  ;;  %v1409_v28 = vld [vmem:[%s4204_s10 + $0x48] sm:$0xf] }
  0xe6   : > { %2434 = vmatpush.bf16.msra.mxu1 %v4040_v25 }
  0xe8   : > { %1471 = vrot.lane.b32.xlu1 %v1405_v26, %s4116_s16  ;;  %1280 = vrot.lane.b32.xlu0 %v1213_v27, %s4115_s15 }
  0xe9   : > { %1473 = vrot.lane.b32.xlu2 %v1406_v29, %s4116_s16  ;;  %v1217_v29 = vld [vmem:[%s4204_s10 + $0x44] sm:$0xf] }
  0xea   : > { %v645_v30 = vpop.permute.xlu1 %644  ;;  %v643_v31 = vpop.permute.xlu0 %642 }
  0xeb   : > { %733 = vst.msk [vmem:[#allocation2 + $0x40] sm:$0xf] %vm724_vm2, %v645_v30  ;;  %v665_v34 = vpop.permute.xlu2 %664 }
  0xec   : > { %732 = vst.msk [vmem:[#allocation2 + $0x38] sm:$0xf] %vm724_vm2, %v643_v31  ;;  %v4039_v31 = vld [vmem:[%s5826_s1 + $0x58] sm:$0xff] }
  0xed   : > { %743 = vst.msk [vmem:[#allocation2 + $0x90] sm:$0xf] %vm724_vm2, %v665_v34  ;;  %2435 = vmatpush.bf16.msra.mxu1 %v4039_v31  ;;  %v4038_v34 = vld [vmem:[%s5826_s1 + $0x50] sm:$0xff] }
  0xee   : > { %v1220_v31 = vld [vmem:[%s4204_s10 + $0x50] sm:$0xf] }
  0xf0   : > { %1666 = vrot.lane.b32.xlu1 %v1599_v32, %s4117_s17  ;;  %1664 = vrot.lane.b32.xlu0 %v1598_v33, %s4117_s17  ;;  %v1410_v33 = vld [vmem:[%s4204_s10 + $0x4c] sm:$0xf] }
  0xf1   : > { %1857 = vrot.lane.b32.xlu2 %v1791_v35, %s4118_s18  ;;  %2436 = vmatpush.bf16.msra.mxu1 %v4038_v34  ;;  %v1413_v34 = vld [vmem:[%s4204_s10 + $0x58] sm:$0xf] }
  0xf2   : > { %v651_v36 = vpop.permute.xlu1 %650  ;;  %v649_v37 = vpop.permute.xlu0 %648 }
  0xf3   : > { %736 = vst.msk [vmem:[#allocation2 + $0x58] sm:$0xf] %vm724_vm2, %v651_v36  ;;  %v671_v40 = vpop.permute.xlu2 %670 }
  0xf4   : > { %735 = vst.msk [vmem:[#allocation2 + $0x50] sm:$0xf] %vm724_vm2, %v649_v37 }
  0xf5   : > { %746 = vst.msk [vmem:[#allocation2 + $0xa8] sm:$0xf] %vm724_vm2, %v671_v40  ;;  %v1602_v40 = vld [vmem:[%s4204_s10 + $0x50] sm:$0xf] }
  0xf8   : > { %1022 = vrot.lane.b32.xlu1 %v954_v38, %s4114_s14  ;;  %1859 = vrot.lane.b32.xlu0 %v1792_v39, %s4118_s18  ;;  %v1603_v39 = vld [vmem:[%s4204_s10 + $0x54] sm:$0xf] }
  0xf9   : > { %1024 = vrot.lane.b32.xlu2 %v955_v41, %s4114_s14 }
  0xfa   : > { %v657_v42 = vpop.permute.xlu1 %656  ;;  %v655_v43 = vpop.permute.xlu0 %654 }
  0xfb   : > { %739 = vst.msk [vmem:[#allocation2 + $0x70] sm:$0xf] %vm724_vm2, %v657_v42  ;;  %v677_v46 = vpop.permute.xlu2 %676  ;;  %v4037_v42 = vld [vmem:[%s5826_s1 + $0x48] sm:$0xff] }
  0xfc   : > { %738 = vst.msk [vmem:[#allocation2 + $0x68] sm:$0xf] %vm724_vm2, %v655_v43  ;;  %v1795_v43 = vld [vmem:[%s4204_s10 + $0x58] sm:$0xf]  ;;  %2437 = vmatpush.bf16.msra.mxu1 %v4037_v42  ;;  %v1607_v42 = vld [vmem:[%s4204_s10 + $0x64] sm:$0xf] }
  0xfd   : > { %749 = vst.msk [vmem:[#allocation2 + $0xc0] sm:$0xf] %vm724_vm2, %v677_v46 }
 0x100   : > { %831 = vrot.lane.b32.xlu1 %v762_v44, %s4113_s13  ;;  %829 = vrot.lane.b32.xlu0 %v761_v45, %s4113_s13  ;;  %v4036_v44 = vld [vmem:[%s5826_s1 + $0x40] sm:$0xff] }
 0x101   : > { %1282 = vrot.lane.b32.xlu2 %v1214_v47, %s4115_s15  ;;  %2438 = vmatpush.bf16.msra.mxu1 %v4036_v44  ;;  %v1606_v44 = vld [vmem:[%s4204_s10 + $0x60] sm:$0xf] }
 0x102   : > { %v663_v49 = vpop.permute.xlu1 %662  ;;  %v661_v50 = vpop.permute.xlu0 %660 }
 0x103   : > { %742 = vst.msk [vmem:[#allocation2 + $0x88] sm:$0xf] %vm724_vm2, %v663_v49  ;;  %v683_v54 = vpop.permute.xlu2 %682  ;;  %v958_v49 = vld [vmem:[%s4204_s10 + $0x40] sm:$0xf] }
 0x104   : > { %741 = vst.msk [vmem:[#allocation2 + $0x80] sm:$0xf] %vm724_vm2, %v661_v50  ;;  %v1796_v50 = vld [vmem:[%s4204_s10 + $0x5c] sm:$0xf] }
 0x105   : > { %752 = vst.msk [vmem:[#allocation2 + $0xd8] sm:$0xf] %vm724_vm2, %v683_v54 }
 0x108   : > { %1475 = vrot.lane.b32.xlu1 %v1407_v52, %s4116_s16  ;;  %1284 = vrot.lane.b32.xlu0 %v1215_v53, %s4115_s15  ;;  %v959_v52 = vld [vmem:[%s4204_s10 + $0x44] sm:$0xf] }
 0x109   : > { %1477 = vrot.lane.b32.xlu2 %v1408_v55, %s4116_s16  ;;  %v766_v55 = vld [vmem:[%s4204_s10 + $0x3c] sm:$0xf] }
 0x10a   : > { %v669_v57 = vpop.permute.xlu1 %668  ;;  %v667_v58 = vpop.permute.xlu0 %666 }
 0x10b   : > { %745 = vst.msk [vmem:[#allocation2 + $0xa0] sm:$0xf] %vm724_vm2, %v669_v57  ;;  %v689_v62 = vpop.permute.xlu2 %688 }
 0x10c   : > { %744 = vst.msk [vmem:[#allocation2 + $0x98] sm:$0xf] %vm724_vm2, %v667_v58 }
 0x10d   : > { %755 = vst.msk [vmem:[#allocation2 + $0xf0] sm:$0xf] %vm724_vm2, %v689_v62 }
 0x110   : > { %1670 = vrot.lane.b32.xlu1 %v1601_v60, %s4117_s17  ;;  %1668 = vrot.lane.b32.xlu0 %v1600_v61, %s4117_s17  ;;  %v1218_v61 = vld [vmem:[%s4204_s10 + $0x48] sm:$0xf] }
 0x111   : > { %1861 = vrot.lane.b32.xlu2 %v1793_v63, %s4118_s18 }
 0x112   : > { %v675_v2 = vpop.permute.xlu1 %674  ;;  %v673_v3 = vpop.permute.xlu0 %672 }
 0x113   : > { %748 = vst.msk [vmem:[#allocation2 + $0xb8] sm:$0xf] %vm724_vm2, %v675_v2  ;;  %v1015_v12 = vpop.permute.xlu2 %1014 }
 0x114   : > { %747 = vst.msk [vmem:[#allocation2 + $0xb0] sm:$0xf] %vm724_vm2, %v673_v3  ;;  %v1078_v32 = vrot.slane %v1015_v12, 4  ;;  %v1412_v3 = vld [vmem:[%s4204_s10 + $0x54] sm:$0xf] }
 0x116   : > { %v1111_v37 = vsel %vm1110_vm5, %v1078_v32, %v1015_v12  ;;  %v1797_v12 = vld [vmem:[%s4204_s10 + $0x60] sm:$0xf] }
 0x118   : > { %1026 = vrot.lane.b32.xlu1 %v956_v10, %s4114_s14  ;;  %1863 = vrot.lane.b32.xlu0 %v1794_v11, %s4118_s18 }
 0x119   : > { %1028 = vrot.lane.b32.xlu2 %v957_v14, %s4114_s14 }
 0x11a   : > { %v681_v17 = vpop.permute.xlu1 %680  ;;  %v679_v18 = vpop.permute.xlu0 %678 }
 0x11b   : > { %751 = vst.msk [vmem:[#allocation2 + $0xd0] sm:$0xf] %vm724_vm2, %v681_v17  ;;  %v1275_v22 = vpop.permute.xlu2 %1274 }
 0x11c   : > { %750 = vst.msk [vmem:[#allocation2 + $0xc8] sm:$0xf] %vm724_vm2, %v679_v18 }
 0x120   : > { %835 = vrot.lane.b32.xlu1 %v764_v20, %s4113_s13  ;;  %833 = vrot.lane.b32.xlu0 %v763_v21, %s4113_s13  ;;  %v1798_v20 = vld [vmem:[%s4204_s10 + $0x64] sm:$0xf] }
 0x121   : > { %1286 = vrot.lane.b32.xlu2 %v1216_v24, %s4115_s15 }
 0x122   : > { %v687_v26 = vpop.permute.xlu1 %686  ;;  %v685_v27 = vpop.permute.xlu0 %684 }
 0x123   : > { %754 = vst.msk [vmem:[#allocation2 + $0xe8] sm:$0xf] %vm724_vm2, %v687_v26  ;;  %v1470_v30 = vpop.permute.xlu2 %1469 }
 0x124   : > { %753 = vst.msk [vmem:[#allocation2 + $0xe0] sm:$0xf] %vm724_vm2, %v685_v27  ;;  %v768_v27 = vld [vmem:[%s4204_s10 + $0x44] sm:$0xf] }
 0x128   : > { %1479 = vrot.lane.b32.xlu1 %v1409_v28, %s4116_s16  ;;  %1288 = vrot.lane.b32.xlu0 %v1217_v29, %s4115_s15 }
 0x129   : > { %1481 = vrot.lane.b32.xlu2 %v1410_v33, %s4116_s16 }
 0x12a   : > { %v822_v35 = vpop.permute.xlu1 %821  ;;  %v691_v36 = vpop.permute.xlu0 %690 }
 0x12b   : > { %918 = vst.msk [vmem:[#allocation2] sm:$0xf] %vm917_vm8, %v822_v35  ;;  %v1854_v41 = vpop.permute.xlu2 %1853 }
 0x12c   : > { %756 = vst.msk [vmem:[#allocation2 + $0xf8] sm:$0xf] %vm724_vm2, %v691_v36  ;;  %v1221_v36 = vld [vmem:[%s4204_s10 + $0x54] sm:$0xf] }
 0x12d   : > { %1178 = vst.msk [vmem:[#allocation2] sm:$0xff] %vm4593_vm9, %v1111_v37  ;;  %v1414_v37 = vld [vmem:[%s4204_s10 + $0x5c] sm:$0xf] }
 0x12e   : > { %1371 = vst.msk [vmem:[#allocation2 + $0x4] sm:$0xf] %vm1370_vm10, %v1275_v22  ;;  %v961_v22 = vld [vmem:[%s4204_s10 + $0x4c] sm:$0xf] }
 0x130   : > { %1674 = vrot.lane.b32.xlu1 %v1603_v39, %s4117_s17  ;;  %1672 = vrot.lane.b32.xlu0 %v1602_v40, %s4117_s17 }
 0x131   : > { %1865 = vrot.lane.b32.xlu2 %v1795_v43, %s4118_s18 }
 0x132   : > { %v824_v45 = vpop.permute.xlu1 %823  ;;  %v1017_v46 = vpop.permute.xlu0 %1016 }
 0x133   : > { %919 = vst.msk [vmem:[#allocation2 + $0x8] sm:$0xf] %vm917_vm8, %v824_v45  ;;  %v1079_v47 = vrot.slane %v1017_v46, 4  ;;  %v1021_v51 = vpop.permute.xlu2 %1020 }
 0x134   : > { %v3739_v57 = vld [vmem:[#allocation2] sm:$0xf]  ;;  %v1081_v6 = vrot.slane %v1021_v51, 4 }
 0x135   : > { %v1112_v48 = vsel %vm1110_vm5, %v1079_v47, %v1017_v46  ;;  %v1799_v47 = vld [vmem:[%s4204_s10 + $0x68] sm:$0xf] }
 0x136   : > { %1179 = vst.msk [vmem:[#allocation2 + $0x8] sm:$0xff] %vm4593_vm9, %v1112_v48  ;;  %v1114_v13 = vsel %vm1110_vm5, %v1081_v6, %v1021_v51 }
 0x138   : > { %1030 = vrot.lane.b32.xlu1 %v958_v49, %s4114_s14  ;;  %1867 = vrot.lane.b32.xlu0 %v1796_v50, %s4118_s18 }
 0x139   : > { %1032 = vrot.lane.b32.xlu2 %v959_v52, %s4114_s14 }
 0x13a   : > { %v1468_v53 = vpop.permute.xlu1 %1467  ;;  %v1277_v54 = vpop.permute.xlu0 %1276 }
 0x13b   : > { %1564 = vst.msk [vmem:[#allocation2 + $0x4] sm:$0xf] %vm1563_vm11, %v1468_v53  ;;  %v1279_v59 = vpop.permute.xlu2 %1278 }
 0x13c   : > { %1372 = vst.msk [vmem:[#allocation2 + $0xc] sm:$0xf] %vm1370_vm10, %v1277_v54  ;;  %v962_v54 = vld [vmem:[%s4204_s10 + $0x50] sm:$0xf] }
 0x13d   : > { %1565 = vst.msk [vmem:[#allocation2 + $0xc] sm:$0xf] %vm1563_vm11, %v1470_v30  ;;  %v3997_v58 = vld [vmem:[#allocation2 + $0x4] sm:$0xf0]  ;;  %v767_v30 = vld [vmem:[%s4204_s10 + $0x40] sm:$0xf] }
 0x13e   : > { %v3740_v60 = vor.u32 %v3997_v58, %v3739_v57  ;;  %v963_v57 = vld [vmem:[%s4204_s10 + $0x54] sm:$0xf] }
 0x140   : > { %839 = vrot.lane.b32.xlu1 %v766_v55, %s4113_s13  ;;  %837 = vrot.lane.b32.xlu0 %v765_v56, %s4113_s13  ;;  %v1800_v56 = vld [vmem:[%s4204_s10 + $0x6c] sm:$0xf] }
 0x141   : > { %2350 = vmatmul.bf16.vlgmr.msra.gmra.mxu0 %v3740_v60  ;;  %1290 = vrot.lane.b32.xlu2 %v1218_v61, %s4115_s15 }
 0x142   : > { %v1663_v62 = vpop.permute.xlu1 %1662  ;;  %v1661_v63 = vpop.permute.xlu0 %1660 }
 0x143   : > { %1758 = vst.msk [vmem:[#allocation2 + $0xc] sm:$0xf] %vm1756_vm12, %v1663_v62  ;;  %v1474_v2 = vpop.permute.xlu2 %1473  ;;  %v770_v62 = vld [vmem:[%s4204_s10 + $0x4c] sm:$0xf] }
 0x144   : > { %1757 = vst.msk [vmem:[#allocation2 + $0x4] sm:$0xf] %vm1756_vm12, %v1661_v63 }
 0x145   : > { %1950 = vst.msk [vmem:[#allocation2 + $0x4] sm:$0xf] %vm1949_vm13, %v1854_v41 }
 0x148   : > { %1483 = vrot.lane.b32.xlu1 %v1411_v0, %s4116_s16  ;;  %1292 = vrot.lane.b32.xlu0 %v1219_v1, %s4115_s15  ;;  %v769_v1 = vld [vmem:[%s4204_s10 + $0x48] sm:$0xf] }
 0x149   : > { %1485 = vrot.lane.b32.xlu2 %v1412_v3, %s4116_s16 }
 0x14a   : > { %v1019_v4 = vpop.permute.xlu1 %1018  ;;  %v1856_v5 = vpop.permute.xlu0 %1855 }
 0x14b   : > { %1951 = vst.msk [vmem:[#allocation2 + $0xc] sm:$0xf] %vm1949_vm13, %v1856_v5  ;;  %v1858_v9 = vpop.permute.xlu2 %1857  ;;  %v1080_v10 = vrot.slane %v1019_v4, 4  ;;  %v1415_v5 = vld [vmem:[%s4204_s10 + $0x60] sm:$0xf] }
 0x14c   : > { %v3996_v11 = vld [vmem:[#allocation2 + $0x4] sm:$0xf] }
 0x14d   : > { %v1113_v17 = vsel %vm1110_vm5, %v1080_v10, %v1019_v4 }
 0x150   : > { %1678 = vrot.lane.b32.xlu1 %v1605_v7, %s4117_s17  ;;  %1676 = vrot.lane.b32.xlu0 %v1604_v8, %s4117_s17  ;;  %v1223_v7 = vld [vmem:[%s4204_s10 + $0x5c] sm:$0xf]  ;;  %v1416_v8 = vld [vmem:[%s4204_s10 + $0x64] sm:$0xf] }
 0x151   : > { %1869 = vrot.lane.b32.xlu2 %v1797_v12, %s4118_s18  ;;  %v1609_v12 = vld [vmem:[%s4204_s10 + $0x6c] sm:$0xf] }
 0x152   : > { %v828_v14 = vpop.permute.xlu1 %827  ;;  %v826_v15 = vpop.permute.xlu0 %825  ;;  %v3741_v16 = vld [vmem:[#allocation2 + $0x8] sm:$0xf0] }
 0x153   : > { %921 = vst.msk [vmem:[#allocation2 + $0x18] sm:$0xf] %vm917_vm8, %v828_v14  ;;  %v3744_v18 = vor.u32 %v3996_v11, %v3741_v16  ;;  %v1025_v21 = vpop.permute.xlu2 %1024  ;;  %v1608_v14 = vld [vmem:[%s4204_s10 + $0x68] sm:$0xf] }
 0x154   : > { %1181 = vst.msk [vmem:[#allocation2 + $0x18] sm:$0xff] %vm4593_vm9, %v1114_v13  ;;  %v1083_v41 = vrot.slane %v1025_v21, 4 }
 0x155   : > { %920 = vst.msk [vmem:[#allocation2 + $0x10] sm:$0xf] %vm917_vm8, %v826_v15  ;;  %3925 = vmatmul.msk.bf16.vlgmr.msra.gmra.mxu1 %vm2286_vm14, %v3744_v18 }
 0x156   : > { %1180 = vst.msk [vmem:[#allocation2 + $0x10] sm:$0xff] %vm4593_vm9, %v1113_v17  ;;  %v1116_v48 = vsel %vm1110_vm5, %v1083_v41, %v1025_v21  ;;  %v1801_v17 = vld [vmem:[%s4204_s10 + $0x70] sm:$0xf]  ;;  %v1417_v41 = vld [vmem:[%s4204_s10 + $0x68] sm:$0xf] }
 0x157   : > { %1373 = vst.msk [vmem:[#allocation2 + $0x14] sm:$0xf] %vm1370_vm10, %v1279_v59 }
 0x158   : > { %1034 = vrot.lane.b32.xlu1 %v960_v19, %s4114_s14  ;;  %1871 = vrot.lane.b32.xlu0 %v1798_v20, %s4118_s18 }
 0x159   : > { %1036 = vrot.lane.b32.xlu2 %v961_v22, %s4114_s14 }
 0x15a   : > { %v1472_v23 = vpop.permute.xlu1 %1471  ;;  %v1281_v24 = vpop.permute.xlu0 %1280 }
 0x15b   : > { %1566 = vst.msk [vmem:[#allocation2 + $0x14] sm:$0xf] %vm1563_vm11, %v1472_v23  ;;  %v3999_v25 = vld [vmem:[#allocation2 + $0x14] sm:$0xf0]  ;;  %v1283_v28 = vpop.permute.xlu2 %1282 }
 0x15c   : > { %1374 = vst.msk [vmem:[#allocation2 + $0x1c] sm:$0xf] %vm1370_vm10, %v1281_v24  ;;  %v964_v24 = vld [vmem:[%s4204_s10 + $0x58] sm:$0xf] }
 0x15d   : > { %v3747_v26 = vld [vmem:[#allocation2 + $0x10] sm:$0xf]  ;;  %1567 = vst.msk [vmem:[#allocation2 + $0x1c] sm:$0xf] %vm1563_vm11, %v1474_v2  ;;  %v1222_v2 = vld [vmem:[%s4204_s10 + $0x58] sm:$0xf] }
 0x15e   : > { %v3748_v29 = vor.u32 %v3999_v25, %v3747_v26  ;;  %v1802_v26 = vld [vmem:[%s4204_s10 + $0x74] sm:$0xf] }
 0x160   : > { %2355 = vmatmul.bf16.gmra.mxu0 %v3748_v29  ;;  %843 = vrot.lane.b32.xlu1 %v768_v27, %s4113_s13  ;;  %v965_v27 = vld [vmem:[%s4204_s10 + $0x5c] sm:$0xf] }
 0x161   : > { %841 = vrot.lane.b32.xlu0 %v767_v30, %s4113_s13  ;;  %1294 = vrot.lane.b32.xlu2 %v1220_v31, %s4115_s15 }
 0x162   : > { %v1667_v32 = vpop.permute.xlu1 %1666  ;;  %v1665_v33 = vpop.permute.xlu0 %1664 }
 0x163   : > { %1760 = vst.msk [vmem:[#allocation2 + $0x1c] sm:$0xf] %vm1756_vm12, %v1667_v32  ;;  %v1478_v35 = vpop.permute.xlu2 %1477  ;;  %v772_v32 = vld [vmem:[%s4204_s10 + $0x54] sm:$0xf] }
 0x164   : > { %1759 = vst.msk [vmem:[#allocation2 + $0x14] sm:$0xf] %vm1756_vm12, %v1665_v33 }
 0x165   : > { %1952 = vst.msk [vmem:[#allocation2 + $0x14] sm:$0xf] %vm1949_vm13, %v1858_v9 }
 0x168   : > { %1487 = vrot.lane.b32.xlu1 %v1413_v34, %s4116_s16 }
 0x169   : > { %1296 = vrot.lane.b32.xlu0 %v1221_v36, %s4115_s15  ;;  %1489 = vrot.lane.b32.xlu2 %v1414_v37, %s4116_s16  ;;  %v1224_v36 = vld [vmem:[%s4204_s10 + $0x60] sm:$0xf]  ;;  %v4050_v37 = vld [vmem:[%s5828_s3 + $0x38] sm:$0xff] }
 0x16a   : > { %v1023_v39 = vpop.permute.xlu1 %1022  ;;  %v1860_v40 = vpop.permute.xlu0 %1859  ;;  %2636 = vmatpush.bf16.msra.mxu2 %v4050_v37 }
 0x16b   : > { %1953 = vst.msk [vmem:[#allocation2 + $0x1c] sm:$0xf] %vm1949_vm13, %v1860_v40  ;;  %v1862_v43 = vpop.permute.xlu2 %1861  ;;  %v1082_v45 = vrot.slane %v1023_v39, 4 }
 0x16c   : > { %v3998_v46 = vld [vmem:[#allocation2 + $0x14] sm:$0xf] }
 0x16d   : > { %v1115_v52 = vsel %vm1110_vm5, %v1082_v45, %v1023_v39  ;;  %v1418_v45 = vld [vmem:[%s4204_s10 + $0x6c] sm:$0xf] }
 0x170   : > { %1682 = vrot.lane.b32.xlu1 %v1607_v42, %s4117_s17 }
 0x171   : > { %1680 = vrot.lane.b32.xlu0 %v1606_v44, %s4117_s17  ;;  %1873 = vrot.lane.b32.xlu2 %v1799_v47, %s4118_s18  ;;  %v4049_v44 = vld [vmem:[%s5828_s3 + $0x30] sm:$0xff] }
 0x172   : > { %v832_v49 = vpop.permute.xlu1 %831  ;;  %v830_v50 = vpop.permute.xlu0 %829  ;;  %v3749_v51 = vld [vmem:[#allocation2 + $0x18] sm:$0xf0]  ;;  %2637 = vmatpush.bf16.msra.mxu2 %v4049_v44  ;;  %v1806_v44 = vld [vmem:[%s4204_s10 + $0x84] sm:$0xf] }
 0x173   : > { %923 = vst.msk [vmem:[#allocation2 + $0x28] sm:$0xf] %vm917_vm8, %v832_v49  ;;  %v3752_v53 = vor.u32 %v3998_v46, %v3749_v51  ;;  %v1029_v55 = vpop.permute.xlu2 %1028  ;;  %v4048_v46 = vld [vmem:[%s5828_s3 + $0x28] sm:$0xff] }
 0x174   : > { %1183 = vst.msk [vmem:[#allocation2 + $0x28] sm:$0xff] %vm4593_vm9, %v1116_v48  ;;  %v1085_v11 = vrot.slane %v1029_v55, 4 }
 0x175   : > { %922 = vst.msk [vmem:[#allocation2 + $0x20] sm:$0xf] %vm917_vm8, %v830_v50  ;;  %3926 = vmatmul.msk.bf16.gmra.mxu1 %vm2286_vm14, %v3752_v53  ;;  %v1611_v50 = vld [vmem:[%s4204_s10 + $0x74] sm:$0xf]  ;;  %v1610_v53 = vld [vmem:[%s4204_s10 + $0x70] sm:$0xf] }
 0x176   : > { %1182 = vst.msk [vmem:[#allocation2 + $0x20] sm:$0xff] %vm4593_vm9, %v1115_v52  ;;  %v1118_v18 = vsel %vm1110_vm5, %v1085_v11, %v1029_v55  ;;  %2638 = vmatpush.bf16.msra.mxu2 %v4048_v46  ;;  %v4047_v52 = vld [vmem:[%s5828_s3 + $0x20] sm:$0xff]  ;;  %v969_v46 = vld [vmem:[%s4204_s10 + $0x6c] sm:$0xf] }
 0x177   : > { %1375 = vst.msk [vmem:[#allocation2 + $0x24] sm:$0xf] %vm1370_vm10, %v1283_v28 }
 0x178   : > { %1038 = vrot.lane.b32.xlu1 %v962_v54, %s4114_s14 }
 0x179   : > { %1875 = vrot.lane.b32.xlu0 %v1800_v56, %s4118_s18  ;;  %1040 = vrot.lane.b32.xlu2 %v963_v57, %s4114_s14  ;;  %v1803_v56 = vld [vmem:[%s4204_s10 + $0x78] sm:$0xf] }
 0x17a   : > { %v1476_v58 = vpop.permute.xlu1 %1475  ;;  %v1285_v59 = vpop.permute.xlu0 %1284  ;;  %2639 = vmatpush.bf16.msra.mxu2 %v4047_v52 }
 0x17b   : > { %1568 = vst.msk [vmem:[#allocation2 + $0x24] sm:$0xf] %vm1563_vm11, %v1476_v58  ;;  %v4001_v60 = vld [vmem:[#allocation2 + $0x24] sm:$0xf0]  ;;  %v1287_v63 = vpop.permute.xlu2 %1286  ;;  %v4046_v58 = vld [vmem:[%s5828_s3 + $0x18] sm:$0xff] }
 0x17c   : > { %1376 = vst.msk [vmem:[#allocation2 + $0x2c] sm:$0xf] %vm1370_vm10, %v1285_v59 }
 0x17d   : > { %v3755_v61 = vld [vmem:[#allocation2 + $0x20] sm:$0xf]  ;;  %1569 = vst.msk [vmem:[#allocation2 + $0x2c] sm:$0xf] %vm1563_vm11, %v1478_v35  ;;  %v771_v35 = vld [vmem:[%s4204_s10 + $0x50] sm:$0xf] }
 0x17e   : > { %v3756_v0 = vor.u32 %v4001_v60, %v3755_v61  ;;  %2640 = vmatpush.bf16.msra.mxu2 %v4046_v58 }
 0x180   : > { %2360 = vmatmul.bf16.gmra.mxu0 %v3756_v0  ;;  %847 = vrot.lane.b32.xlu1 %v770_v62, %s4113_s13  ;;  %v966_v0 = vld [vmem:[%s4204_s10 + $0x60] sm:$0xf] }
 0x181   : > { %845 = vrot.lane.b32.xlu0 %v769_v1, %s4113_s13  ;;  %1298 = vrot.lane.b32.xlu2 %v1222_v2, %s4115_s15  ;;  %v1804_v2 = vld [vmem:[%s4204_s10 + $0x7c] sm:$0xf] }
 0x182   : > { %v1671_v3 = vpop.permute.xlu1 %1670  ;;  %v1669_v4 = vpop.permute.xlu0 %1668 }
 0x183   : > { %1762 = vst.msk [vmem:[#allocation2 + $0x2c] sm:$0xf] %vm1756_vm12, %v1671_v3  ;;  %v1482_v6 = vpop.permute.xlu2 %1481  ;;  %v4045_v3 = vld [vmem:[%s5828_s3 + $0x10] sm:$0xff] }
 0x184   : > { %1761 = vst.msk [vmem:[#allocation2 + $0x24] sm:$0xf] %vm1756_vm12, %v1669_v4  ;;  %2641 = vmatpush.bf16.msra.mxu2 %v4045_v3  ;;  %v967_v4 = vld [vmem:[%s4204_s10 + $0x64] sm:$0xf]  ;;  %v1229_v3 = vld [vmem:[%s4204_s10 + $0x74] sm:$0xf] }
 0x185   : > { %1954 = vst.msk [vmem:[#allocation2 + $0x24] sm:$0xf] %vm1949_vm13, %v1862_v43  ;;  %v1225_v43 = vld [vmem:[%s4204_s10 + $0x64] sm:$0xf] }
 0x188   : > { %1491 = vrot.lane.b32.xlu1 %v1415_v5, %s4116_s16  ;;  %v4044_v5 = vld [vmem:[%s5828_s3 + $0x8] sm:$0xff] }
 0x189   : > { %1300 = vrot.lane.b32.xlu0 %v1223_v7, %s4115_s15  ;;  %1493 = vrot.lane.b32.xlu2 %v1416_v8, %s4116_s16 }
 0x18a   : > { %v1027_v9 = vpop.permute.xlu1 %1026  ;;  %v1864_v10 = vpop.permute.xlu0 %1863  ;;  %2642 = vmatpush.bf16.msra.mxu2 %v4044_v5 }
 0x18b   : > { %1955 = vst.msk [vmem:[#allocation2 + $0x2c] sm:$0xf] %vm1949_vm13, %v1864_v10  ;;  %v1866_v13 = vpop.permute.xlu2 %1865  ;;  %v1084_v15 = vrot.slane %v1027_v9, 4  ;;  %v774_v10 = vld [vmem:[%s4204_s10 + $0x5c] sm:$0xf] }
 0x18c   : > { %v4000_v16 = vld [vmem:[#allocation2 + $0x24] sm:$0xf] }
 0x18d   : > { %v1117_v22 = vsel %vm1110_vm5, %v1084_v15, %v1027_v9  ;;  %v1226_v15 = vld [vmem:[%s4204_s10 + $0x68] sm:$0xf] }
 0x190   : > { %1686 = vrot.lane.b32.xlu1 %v1609_v12, %s4117_s17 }
 0x191   : > { %1684 = vrot.lane.b32.xlu0 %v1608_v14, %s4117_s17  ;;  %1877 = vrot.lane.b32.xlu2 %v1801_v17, %s4118_s18  ;;  %v4043_v14 = vld [vmem:[%s5828_s3] sm:$0xff] }
 0x192   : > { %v836_v19 = vpop.permute.xlu1 %835  ;;  %v834_v20 = vpop.permute.xlu0 %833  ;;  %v3757_v21 = vld [vmem:[#allocation2 + $0x28] sm:$0xf0]  ;;  %2643 = vmatpush.bf16.msra.mxu2 %v4043_v14 }
 0x193   : > { %925 = vst.msk [vmem:[#allocation2 + $0x38] sm:$0xf] %vm917_vm8, %v836_v19  ;;  %v3760_v23 = vor.u32 %v4000_v16, %v3757_v21  ;;  %v1033_v25 = vpop.permute.xlu2 %1032  ;;  %v1420_v21 = vld [vmem:[%s4204_s10 + $0x74] sm:$0xf] }
 0x194   : > { %1185 = vst.msk [vmem:[#allocation2 + $0x38] sm:$0xff] %vm4593_vm9, %v1118_v18  ;;  %v1087_v49 = vrot.slane %v1033_v25, 4  ;;  %v1419_v18 = vld [vmem:[%s4204_s10 + $0x70] sm:$0xf] }
 0x195   : > { %924 = vst.msk [vmem:[#allocation2 + $0x30] sm:$0xf] %vm917_vm8, %v834_v20  ;;  %3927 = vmatmul.msk.bf16.gmra.mxu1 %vm2286_vm14, %v3760_v23  ;;  %v1227_v20 = vld [vmem:[%s4204_s10 + $0x6c] sm:$0xf] }
 0x196   : > { %1184 = vst.msk [vmem:[#allocation2 + $0x30] sm:$0xff] %vm4593_vm9, %v1117_v22  ;;  %v1120_v57 = vsel %vm1110_vm5, %v1087_v49, %v1033_v25 }
 0x197   : > { %1377 = vst.msk [vmem:[#allocation2 + $0x34] sm:$0xf] %vm1370_vm10, %v1287_v63 }
 0x198   : > { %1042 = vrot.lane.b32.xlu1 %v964_v24, %s4114_s14 }
 0x199   : > { %1879 = vrot.lane.b32.xlu0 %v1802_v26, %s4118_s18  ;;  %1044 = vrot.lane.b32.xlu2 %v965_v27, %s4114_s14  ;;  %v1613_v26 = vld [vmem:[%s4204_s10 + $0x7c] sm:$0xf] }
 0x19a   : > { %v1480_v28 = vpop.permute.xlu1 %1479  ;;  %v1289_v29 = vpop.permute.xlu0 %1288 }
 0x19b   : > { %1570 = vst.msk [vmem:[#allocation2 + $0x34] sm:$0xf] %vm1563_vm11, %v1480_v28  ;;  %v4003_v30 = vld [vmem:[#allocation2 + $0x34] sm:$0xf0]  ;;  %v1291_v33 = vpop.permute.xlu2 %1290 }
 0x19c   : > { %1378 = vst.msk [vmem:[#allocation2 + $0x3c] sm:$0xf] %vm1370_vm10, %v1289_v29  ;;  %v1612_v28 = vld [vmem:[%s4204_s10 + $0x78] sm:$0xf] }
 0x19d   : > { %v3763_v31 = vld [vmem:[#allocation2 + $0x30] sm:$0xf]  ;;  %1571 = vst.msk [vmem:[#allocation2 + $0x3c] sm:$0xf] %vm1563_vm11, %v1482_v6 }
 0x19e   : > { %v3764_v34 = vor.u32 %v4003_v30, %v3763_v31  ;;  %v1805_v31 = vld [vmem:[%s4204_s10 + $0x80] sm:$0xf] }
 0x1a0   : > { %2365 = vmatmul.bf16.gmra.mxu0 %v3764_v34  ;;  %851 = vrot.lane.b32.xlu1 %v772_v32, %s4113_s13 }
 0x1a1   : > { %849 = vrot.lane.b32.xlu0 %v771_v35, %s4113_s13  ;;  %1302 = vrot.lane.b32.xlu2 %v1224_v36, %s4115_s15  ;;  %v4841_v36 = vld [vmem:[%s5827_s2] ss:$0 sm:$0xff] }
 0x1a2   : > { %v1675_v39 = vpop.permute.xlu1 %1674  ;;  %v1673_v40 = vpop.permute.xlu0 %1672 }
 0x1a3   : > { %1764 = vst.msk [vmem:[#allocation2 + $0x3c] sm:$0xf] %vm1756_vm12, %v1675_v39  ;;  %v1486_v42 = vpop.permute.xlu2 %1485 }
 0x1a4   : > { %1763 = vst.msk [vmem:[#allocation2 + $0x34] sm:$0xf] %vm1756_vm12, %v1673_v40 }
 0x1a5   : > { %1956 = vst.msk [vmem:[#allocation2 + $0x34] sm:$0xf] %vm1949_vm13, %v1866_v13  ;;  %v773_v13 = vld [vmem:[%s4204_s10 + $0x58] sm:$0xf] }
 0x1a8   : > { %1495 = vrot.lane.b32.xlu1 %v1417_v41, %s4116_s16  ;;  %v968_v41 = vld [vmem:[%s4204_s10 + $0x68] sm:$0xf] }
 0x1a9   : > { %1304 = vrot.lane.b32.xlu0 %v1225_v43, %s4115_s15  ;;  %1497 = vrot.lane.b32.xlu2 %v1418_v45, %s4116_s16 }
 0x1aa   : > { %v1031_v47 = vpop.permute.xlu1 %1030  ;;  %v1868_v48 = vpop.permute.xlu0 %1867 }
 0x1ab   : > { %1957 = vst.msk [vmem:[#allocation2 + $0x3c] sm:$0xf] %vm1949_vm13, %v1868_v48  ;;  %v1870_v51 = vpop.permute.xlu2 %1869  ;;  %v1086_v54 = vrot.slane %v1031_v47, 4 }
 0x1ac   : > { %v4002_v55 = vld [vmem:[#allocation2 + $0x34] sm:$0xf] }
 0x1ad   : > { %v1119_v62 = vsel %vm1110_vm5, %v1086_v54, %v1031_v47  ;;  %v776_v54 = vld [vmem:[%s4204_s10 + $0x64] sm:$0xf] }
 0x1b0   : > { %1690 = vrot.lane.b32.xlu1 %v1611_v50, %s4117_s17 }
 0x1b1   : > { %1688 = vrot.lane.b32.xlu0 %v1610_v53, %s4117_s17  ;;  %1881 = vrot.lane.b32.xlu2 %v1803_v56, %s4118_s18 }
 0x1b2   : > { %v840_v59 = vpop.permute.xlu1 %839  ;;  %v838_v60 = vpop.permute.xlu0 %837  ;;  %v3765_v61 = vld [vmem:[#allocation2 + $0x38] sm:$0xf0] }
 0x1b3   : > { %927 = vst.msk [vmem:[#allocation2 + $0x48] sm:$0xf] %vm917_vm8, %v840_v59  ;;  %v3768_v63 = vor.u32 %v4002_v55, %v3765_v61  ;;  %v1037_v1 = vpop.permute.xlu2 %1036 }
 0x1b4   : > { %1187 = vst.msk [vmem:[#allocation2 + $0x48] sm:$0xff] %vm4593_vm9, %v1120_v57  ;;  %v1089_v25 = vrot.slane %v1037_v1, 4 }
 0x1b5   : > { %926 = vst.msk [vmem:[#allocation2 + $0x40] sm:$0xf] %vm917_vm8, %v838_v60  ;;  %3928 = vmatmul.msk.bf16.gmra.mxu1 %vm2286_vm14, %v3768_v63  ;;  %v775_v60 = vld [vmem:[%s4204_s10 + $0x60] sm:$0xf] }
 0x1b6   : > { %1186 = vst.msk [vmem:[#allocation2 + $0x40] sm:$0xff] %vm4593_vm9, %v1119_v62  ;;  %v1122_v32 = vsel %vm1110_vm5, %v1089_v25, %v1037_v1  ;;  %v1228_v62 = vld [vmem:[%s4204_s10 + $0x70] sm:$0xf]  ;;  %v1421_v1 = vld [vmem:[%s4204_s10 + $0x78] sm:$0xf] }
 0x1b7   : > { %1379 = vst.msk [vmem:[#allocation2 + $0x44] sm:$0xf] %vm1370_vm10, %v1291_v33  ;;  %v1808_v25 = vld [vmem:[%s4204_s10 + $0x8c] sm:$0xf] }
 0x1b8   : > { %1046 = vrot.lane.b32.xlu1 %v966_v0, %s4114_s14 }
 0x1b9   : > { %1883 = vrot.lane.b32.xlu0 %v1804_v2, %s4118_s18  ;;  %1048 = vrot.lane.b32.xlu2 %v967_v4, %s4114_s14  ;;  %v1422_v4 = vld [vmem:[%s4204_s10 + $0x7c] sm:$0xf] }
 0x1ba   : > { %v1484_v6 = vpop.permute.xlu1 %1483  ;;  %v1293_v7 = vpop.permute.xlu0 %1292 }
 0x1bb   : > { %1572 = vst.msk [vmem:[#allocation2 + $0x44] sm:$0xf] %vm1563_vm11, %v1484_v6  ;;  %v4005_v8 = vld [vmem:[#allocation2 + $0x44] sm:$0xf0]  ;;  %v1295_v11 = vpop.permute.xlu2 %1294 }
 0x1bc   : > { %1380 = vst.msk [vmem:[#allocation2 + $0x4c] sm:$0xf] %vm1370_vm10, %v1293_v7 }
 0x1bd   : > { %v3771_v9 = vld [vmem:[#allocation2 + $0x40] sm:$0xf]  ;;  %1573 = vst.msk [vmem:[#allocation2 + $0x4c] sm:$0xf] %vm1563_vm11, %v1486_v42 }
 0x1be   : > { %v3772_v12 = vor.u32 %v4005_v8, %v3771_v9  ;;  %v2351_v24 = vpop.f32.mrf.mxu0  ;;  %v1615_v9 = vld [vmem:[%s4204_s10 + $0x84] sm:$0xf] }
 0x1bf   : > { %v2352_v45 = vadd.f32 %v4841_v36, %v2351_v24 }
 0x1c0   : > { %2370 = vmatmul.bf16.gmra.mxu0 %v3772_v12  ;;  %855 = vrot.lane.b32.xlu1 %v774_v10, %s4113_s13 }
 0x1c1   : > { %853 = vrot.lane.b32.xlu0 %v773_v13, %s4113_s13  ;;  %1306 = vrot.lane.b32.xlu2 %v1226_v15, %s4115_s15  ;;  %v1807_v13 = vld [vmem:[%s4204_s10 + $0x88] sm:$0xf] }
 0x1c2   : > { %v1679_v16 = vpop.permute.xlu1 %1678  ;;  %v1677_v17 = vpop.permute.xlu0 %1676 }
 0x1c3   : > { %1766 = vst.msk [vmem:[#allocation2 + $0x4c] sm:$0xf] %vm1756_vm12, %v1679_v16  ;;  %v1490_v19 = vpop.permute.xlu2 %1489 }
 0x1c4   : > { %1765 = vst.msk [vmem:[#allocation2 + $0x44] sm:$0xf] %vm1756_vm12, %v1677_v17 }
 0x1c5   : > { %1958 = vst.msk [vmem:[#allocation2 + $0x44] sm:$0xf] %vm1949_vm13, %v1870_v51 }
 0x1c6   : > { %v2353_v43 = vpop.f32.mrf.mxu0 }
 0x1c7   : > { %v2354_v47 = vadd.f32 %v4841_v36, %v2353_v43  ;;  %v777_v43 = vld [vmem:[%s4204_s10 + $0x68] sm:$0xf] }
 0x1c8   : > { %1499 = vrot.lane.b32.xlu1 %v1419_v18, %s4116_s16 }
 0x1c9   : > { %1308 = vrot.lane.b32.xlu0 %v1227_v20, %s4115_s15  ;;  %1501 = vrot.lane.b32.xlu2 %v1420_v21, %s4116_s16 }
 0x1ca   : > { %v1035_v22 = vpop.permute.xlu1 %1034  ;;  %v1872_v23 = vpop.permute.xlu0 %1871 }
 0x1cb   : > { %1959 = vst.msk [vmem:[#allocation2 + $0x4c] sm:$0xf] %vm1949_vm13, %v1872_v23  ;;  %v1874_v27 = vpop.permute.xlu2 %1873  ;;  %v1088_v29 = vrot.slane %v1035_v22, 4 }
 0x1cc   : > { %v4004_v30 = vld [vmem:[#allocation2 + $0x44] sm:$0xf] }
 0x1cd   : > { %v1121_v37 = vsel %vm1110_vm5, %v1088_v29, %v1035_v22  ;;  %v970_v22 = vld [vmem:[%s4204_s10 + $0x70] sm:$0xf] }
 0x1d0   : > { %1694 = vrot.lane.b32.xlu1 %v1613_v26, %s4117_s17 }
 0x1d1   : > { %1692 = vrot.lane.b32.xlu0 %v1612_v28, %s4117_s17  ;;  %1885 = vrot.lane.b32.xlu2 %v1805_v31, %s4118_s18 }
 0x1d2   : > { %v844_v33 = vpop.permute.xlu1 %843  ;;  %v2440_v34 = vpop.f32.mrf.mxu1  ;;  %v3773_v35 = vld [vmem:[#allocation2 + $0x48] sm:$0xf0] }
 0x1d3   : > { %929 = vst.msk [vmem:[#allocation2 + $0x58] sm:$0xf] %vm917_vm8, %v844_v33  ;;  %v842_v39 = vpop.permute.xlu0 %841  ;;  %v3776_v40 = vor.u32 %v4004_v30, %v3773_v35  ;;  %v1041_v42 = vpop.permute.xlu2 %1040  ;;  %v2441_v48 = vadd.f32 %v2440_v34, %v2352_v45  ;;  %v778_v35 = vld [vmem:[%s4204_s10 + $0x6c] sm:$0xf]  ;;  %v1230_v45 = vld [vmem:[%s4204_s10 + $0x78] sm:$0xf] }
 0x1d4   : > { %1189 = vst.msk [vmem:[#allocation2 + $0x58] sm:$0xff] %vm4593_vm9, %v1122_v32  ;;  %v1091_v8 = vrot.slane %v1041_v42, 4 }
 0x1d5   : > { %928 = vst.msk [vmem:[#allocation2 + $0x50] sm:$0xf] %vm917_vm8, %v842_v39  ;;  %3929 = vmatmul.msk.bf16.gmra.mxu1 %vm2286_vm14, %v3776_v40  ;;  %v2520_v55 = vmax.f32 %v2441_v48, 0.0  ;;  %v1423_v48 = vld [vmem:[%s4204_s10 + $0x80] sm:$0xf] }
 0x1d6   : > { %1188 = vst.msk [vmem:[#allocation2 + $0x50] sm:$0xff] %vm4593_vm9, %v1121_v37  ;;  %v1124_v14 = vsel %vm1110_vm5, %v1091_v8, %v1041_v42  ;;  %v1810_v8 = vld [vmem:[%s4204_s10 + $0x94] sm:$0xf] }
 0x1d7   : > { %1381 = vst.msk [vmem:[#allocation2 + $0x54] sm:$0xf] %vm1370_vm10, %v1295_v11  ;;  %v1614_v11 = vld [vmem:[%s4204_s10 + $0x80] sm:$0xf] }
 0x1d8   : > { %1050 = vrot.lane.b32.xlu1 %v968_v41, %s4114_s14 }
 0x1d9   : > { %1887 = vrot.lane.b32.xlu0 %v1806_v44, %s4118_s18  ;;  %1052 = vrot.lane.b32.xlu2 %v969_v46, %s4114_s14 }
 0x1da   : > { %v1488_v49 = vpop.permute.xlu1 %1487  ;;  %v2442_v50 = vpop.f32.mrf.mxu1 }
 0x1db   : > { %1574 = vst.msk [vmem:[#allocation2 + $0x54] sm:$0xf] %vm1563_vm11, %v1488_v49  ;;  %v1297_v51 = vpop.permute.xlu0 %1296  ;;  %v2443_v52 = vadd.f32 %v2442_v50, %v2354_v47  ;;  %v4007_v53 = vld [vmem:[#allocation2 + $0x54] sm:$0xf0]  ;;  %v1299_v58 = vpop.permute.xlu2 %1298  ;;  %v1231_v50 = vld [vmem:[%s4204_s10 + $0x7c] sm:$0xf] }
 0x1dc   : > { %1382 = vst.msk [vmem:[#allocation2 + $0x5c] sm:$0xf] %vm1370_vm10, %v1297_v51  ;;  %v1424_v51 = vld [vmem:[%s4204_s10 + $0x84] sm:$0xf] }
 0x1dd   : > { %v2521_v56 = vmax.f32 %v2443_v52, 0.0  ;;  %v3779_v57 = vld [vmem:[#allocation2 + $0x50] sm:$0xf]  ;;  %1575 = vst.msk [vmem:[#allocation2 + $0x5c] sm:$0xf] %vm1563_vm11, %v1490_v19  ;;  %v2356_v7 = vpop.f32.mrf.mxu0 }
 0x1de   : > { %v3780_v59 = vor.u32 %v4007_v53, %v3779_v57  ;;  %v2357_v26 = vadd.f32 %v4841_v36, %v2356_v7 }
 0x1df   : > { %v2552_v61 = vpack.c.bf16 %v2521_v56, %v2520_v55  ;;  %v1617_v56 = vld [vmem:[%s4204_s10 + $0x8c] sm:$0xf] }
 0x1e0   : > { %2375 = vmatmul.bf16.gmra.mxu0 %v3780_v59  ;;  %859 = vrot.lane.b32.xlu1 %v776_v54, %s4113_s13 }
 0x1e1   : > { %857 = vrot.lane.b32.xlu0 %v775_v60, %s4113_s13  ;;  %2644 = vmatmul.bf16.vlgmr.msra.gmra.mxu2 %v2552_v61  ;;  %v1809_v60 = vld [vmem:[%s4204_s10 + $0x90] sm:$0xf] }
 0x1e2   : > { %v1683_v63 = vpop.permute.xlu1 %1682  ;;  %1310 = vrot.lane.b32.xlu2 %v1228_v62, %s4115_s15 }
 0x1e3   : > { %1768 = vst.msk [vmem:[#allocation2 + $0x5c] sm:$0xf] %vm1756_vm12, %v1683_v63  ;;  %v1681_v0 = vpop.permute.xlu0 %1680  ;;  %v1494_v2 = vpop.permute.xlu2 %1493 }
 0x1e4   : > { %1767 = vst.msk [vmem:[#allocation2 + $0x54] sm:$0xf] %vm1756_vm12, %v1681_v0 }
 0x1e5   : > { %1960 = vst.msk [vmem:[#allocation2 + $0x54] sm:$0xf] %vm1949_vm13, %v1874_v27  ;;  %v2358_v24 = vpop.f32.mrf.mxu0  ;;  %v971_v27 = vld [vmem:[%s4204_s10 + $0x74] sm:$0xf] }
 0x1e6   : > { %v2359_v28 = vadd.f32 %v4841_v36, %v2358_v24  ;;  %v779_v24 = vld [vmem:[%s4204_s10 + $0x70] sm:$0xf] }
 0x1e8   : > { %1503 = vrot.lane.b32.xlu1 %v1421_v1, %s4116_s16 }
 0x1e9   : > { %1312 = vrot.lane.b32.xlu0 %v1229_v3, %s4115_s15 }
 0x1ea   : > { %v1039_v5 = vpop.permute.xlu1 %1038  ;;  %1505 = vrot.lane.b32.xlu2 %v1422_v4, %s4116_s16 }
 0x1eb   : > { %v1876_v6 = vpop.permute.xlu0 %1875  ;;  %v1878_v10 = vpop.permute.xlu2 %1877  ;;  %v1090_v12 = vrot.slane %v1039_v5, 4 }
 0x1ec   : > { %1961 = vst.msk [vmem:[#allocation2 + $0x5c] sm:$0xf] %vm1949_vm13, %v1876_v6  ;;  %v4006_v15 = vld [vmem:[#allocation2 + $0x54] sm:$0xf] }
 0x1ed   : > { %v1123_v18 = vsel %vm1110_vm5, %v1090_v12, %v1039_v5  ;;  %v972_v5 = vld [vmem:[%s4204_s10 + $0x78] sm:$0xf] }
 0x1f0   : > { %1698 = vrot.lane.b32.xlu1 %v1615_v9, %s4117_s17 }
 0x1f1   : > { %1696 = vrot.lane.b32.xlu0 %v1614_v11, %s4117_s17 }
 0x1f2   : > { %v848_v16 = vpop.permute.xlu1 %847  ;;  %v2445_v17 = vpop.f32.mrf.mxu1  ;;  %1889 = vrot.lane.b32.xlu2 %v1807_v13, %s4118_s18 }
 0x1f3   : > { %931 = vst.msk [vmem:[#allocation2 + $0x68] sm:$0xf] %vm917_vm8, %v848_v16  ;;  %v846_v19 = vpop.permute.xlu0 %845  ;;  %v3781_v20 = vld [vmem:[#allocation2 + $0x58] sm:$0xf0]  ;;  %v1045_v23 = vpop.permute.xlu2 %1044  ;;  %v2446_v29 = vadd.f32 %v2445_v17, %v2357_v26  ;;  %v1232_v26 = vld [vmem:[%s4204_s10 + $0x80] sm:$0xf] }
 0x1f4   : > { %1191 = vst.msk [vmem:[#allocation2 + $0x68] sm:$0xff] %vm4593_vm9, %v1124_v14  ;;  %v3784_v21 = vor.u32 %v4006_v15, %v3781_v20  ;;  %v1093_v55 = vrot.slane %v1045_v23, 4 }
 0x1f5   : > { %930 = vst.msk [vmem:[#allocation2 + $0x60] sm:$0xf] %vm917_vm8, %v846_v19  ;;  %v2522_v37 = vmax.f32 %v2446_v29, 0.0  ;;  %v1425_v29 = vld [vmem:[%s4204_s10 + $0x88] sm:$0xf] }
 0x1f6   : > { %1190 = vst.msk [vmem:[#allocation2 + $0x60] sm:$0xff] %vm4593_vm9, %v1123_v18  ;;  %3930 = vmatmul.msk.bf16.gmra.mxu1 %vm2286_vm14, %v3784_v21  ;;  %v1126_v61 = vsel %vm1110_vm5, %v1093_v55, %v1045_v23  ;;  %v780_v18 = vld [vmem:[%s4204_s10 + $0x74] sm:$0xf]  ;;  %v1812_v55 = vld [vmem:[%s4204_s10 + $0x9c] sm:$0xf] }
 0x1f7   : > { %1383 = vst.msk [vmem:[#allocation2 + $0x64] sm:$0xf] %vm1370_vm10, %v1299_v58  ;;  %v1616_v58 = vld [vmem:[%s4204_s10 + $0x88] sm:$0xf] }
 0x1f8   : > { %1054 = vrot.lane.b32.xlu1 %v970_v22, %s4114_s14 }
 0x1f9   : > { %1891 = vrot.lane.b32.xlu0 %v1808_v25, %s4118_s18 }
 0x1fa   : > { %v1492_v30 = vpop.permute.xlu1 %1491  ;;  %v2447_v31 = vpop.f32.mrf.mxu1  ;;  %1056 = vrot.lane.b32.xlu2 %v971_v27, %s4114_s14 }
 0x1fb   : > { %1576 = vst.msk [vmem:[#allocation2 + $0x64] sm:$0xf] %vm1563_vm11, %v1492_v30  ;;  %v1301_v32 = vpop.permute.xlu0 %1300  ;;  %v2448_v33 = vadd.f32 %v2447_v31, %v2359_v28  ;;  %v4009_v34 = vld [vmem:[#allocation2 + $0x64] sm:$0xf0]  ;;  %v1303_v41 = vpop.permute.xlu2 %1302  ;;  %v1233_v31 = vld [vmem:[%s4204_s10 + $0x84] sm:$0xf] }
 0x1fc   : > { %1384 = vst.msk [vmem:[#allocation2 + $0x6c] sm:$0xf] %vm1370_vm10, %v1301_v32  ;;  %v1426_v32 = vld [vmem:[%s4204_s10 + $0x8c] sm:$0xf] }
 0x1fd   : > { %v2523_v39 = vmax.f32 %v2448_v33, 0.0  ;;  %v3787_v40 = vld [vmem:[#allocation2 + $0x60] sm:$0xf]  ;;  %1577 = vst.msk [vmem:[#allocation2 + $0x6c] sm:$0xf] %vm1563_vm11, %v1494_v2  ;;  %v2361_v54 = vpop.f32.mrf.mxu0 }
 0x1fe   : > { %v3788_v42 = vor.u32 %v4009_v34, %v3787_v40  ;;  %v2362_v9 = vadd.f32 %v4841_v36, %v2361_v54 }
 0x1ff   : > { %v2553_v44 = vpack.c.bf16 %v2523_v39, %v2522_v37  ;;  %v1619_v39 = vld [vmem:[%s4204_s10 + $0x94] sm:$0xf] }
 0x200   : > { %2380 = vmatmul.bf16.gmra.mxu0 %v3788_v42  ;;  %863 = vrot.lane.b32.xlu1 %v778_v35, %s4113_s13 }
 0x201   : > { %861 = vrot.lane.b32.xlu0 %v777_v43, %s4113_s13  ;;  %2649 = vmatmul.bf16.gmra.mxu2 %v2553_v44  ;;  %v1811_v43 = vld [vmem:[%s4204_s10 + $0x98] sm:$0xf] }
 0x202   : > { %v1687_v46 = vpop.permute.xlu1 %1686  ;;  %1314 = vrot.lane.b32.xlu2 %v1230_v45, %s4115_s15 }
 0x203   : > { %1770 = vst.msk [vmem:[#allocation2 + $0x6c] sm:$0xf] %vm1756_vm12, %v1687_v46  ;;  %v1685_v47 = vpop.permute.xlu0 %1684  ;;  %v1498_v49 = vpop.permute.xlu2 %1497 }
 0x204   : > { %1769 = vst.msk [vmem:[#allocation2 + $0x64] sm:$0xf] %vm1756_vm12, %v1685_v47 }
 0x205   : > { %1962 = vst.msk [vmem:[#allocation2 + $0x64] sm:$0xf] %vm1949_vm13, %v1878_v10  ;;  %v2363_v7 = vpop.f32.mrf.mxu0  ;;  %v973_v10 = vld [vmem:[%s4204_s10 + $0x7c] sm:$0xf] }
 0x206   : > { %v2364_v11 = vadd.f32 %v4841_v36, %v2363_v7  ;;  %v781_v7 = vld [vmem:[%s4204_s10 + $0x78] sm:$0xf] }
 0x208   : > { %1507 = vrot.lane.b32.xlu1 %v1423_v48, %s4116_s16 }
 0x209   : > { %1316 = vrot.lane.b32.xlu0 %v1231_v50, %s4115_s15 }
 0x20a   : > { %v1043_v52 = vpop.permute.xlu1 %1042  ;;  %1509 = vrot.lane.b32.xlu2 %v1424_v51, %s4116_s16 }
 0x20b   : > { %v1880_v53 = vpop.permute.xlu0 %1879  ;;  %v1882_v57 = vpop.permute.xlu2 %1881  ;;  %v1092_v59 = vrot.slane %v1043_v52, 4 }
 0x20c   : > { %1963 = vst.msk [vmem:[#allocation2 + $0x6c] sm:$0xf] %vm1949_vm13, %v1880_v53  ;;  %v4008_v62 = vld [vmem:[#allocation2 + $0x64] sm:$0xf] }
 0x20d   : > { %v1125_v1 = vsel %vm1110_vm5, %v1092_v59, %v1043_v52  ;;  %v974_v52 = vld [vmem:[%s4204_s10 + $0x80] sm:$0xf] }
 0x210   : > { %1702 = vrot.lane.b32.xlu1 %v1617_v56, %s4117_s17 }
 0x211   : > { %1700 = vrot.lane.b32.xlu0 %v1616_v58, %s4117_s17 }
 0x212   : > { %v852_v63 = vpop.permute.xlu1 %851  ;;  %v2450_v0 = vpop.f32.mrf.mxu1  ;;  %1893 = vrot.lane.b32.xlu2 %v1809_v60, %s4118_s18 }
 0x213   : > { %933 = vst.msk [vmem:[#allocation2 + $0x78] sm:$0xf] %vm917_vm8, %v852_v63  ;;  %v850_v2 = vpop.permute.xlu0 %849  ;;  %v3789_v3 = vld [vmem:[#allocation2 + $0x68] sm:$0xf0]  ;;  %v1049_v6 = vpop.permute.xlu2 %1048  ;;  %v2451_v12 = vadd.f32 %v2450_v0, %v2362_v9  ;;  %v1234_v9 = vld [vmem:[%s4204_s10 + $0x88] sm:$0xf] }
 0x214   : > { %1193 = vst.msk [vmem:[#allocation2 + $0x78] sm:$0xff] %vm4593_vm9, %v1126_v61  ;;  %v3792_v4 = vor.u32 %v4008_v62, %v3789_v3  ;;  %v1095_v37 = vrot.slane %v1049_v6, 4 }
 0x215   : > { %932 = vst.msk [vmem:[#allocation2 + $0x70] sm:$0xf] %vm917_vm8, %v850_v2  ;;  %v2524_v19 = vmax.f32 %v2451_v12, 0.0  ;;  %v1427_v12 = vld [vmem:[%s4204_s10 + $0x90] sm:$0xf] }
 0x216   : > { %1192 = vst.msk [vmem:[#allocation2 + $0x70] sm:$0xff] %vm4593_vm9, %v1125_v1  ;;  %3931 = vmatmul.msk.bf16.gmra.mxu1 %vm2286_vm14, %v3792_v4  ;;  %v1128_v44 = vsel %vm1110_vm5, %v1095_v37, %v1049_v6  ;;  %v782_v1 = vld [vmem:[%s4204_s10 + $0x7c] sm:$0xf]  ;;  %v1814_v37 = vld [vmem:[%s4204_s10 + $0xa4] sm:$0xf] }
 0x217   : > { %1385 = vst.msk [vmem:[#allocation2 + $0x74] sm:$0xf] %vm1370_vm10, %v1303_v41  ;;  %v1618_v41 = vld [vmem:[%s4204_s10 + $0x90] sm:$0xf] }
 0x218   : > { %1058 = vrot.lane.b32.xlu1 %v972_v5, %s4114_s14 }
 0x219   : > { %1895 = vrot.lane.b32.xlu0 %v1810_v8, %s4118_s18 }
 0x21a   : > { %v1496_v13 = vpop.permute.xlu1 %1495  ;;  %v2452_v14 = vpop.f32.mrf.mxu1  ;;  %1060 = vrot.lane.b32.xlu2 %v973_v10, %s4114_s14 }
 0x21b   : > { %1578 = vst.msk [vmem:[#allocation2 + $0x74] sm:$0xf] %vm1563_vm11, %v1496_v13  ;;  %v1305_v15 = vpop.permute.xlu0 %1304  ;;  %v2453_v16 = vadd.f32 %v2452_v14, %v2364_v11  ;;  %v4011_v17 = vld [vmem:[#allocation2 + $0x74] sm:$0xf0]  ;;  %v1307_v22 = vpop.permute.xlu2 %1306  ;;  %v1235_v14 = vld [vmem:[%s4204_s10 + $0x8c] sm:$0xf] }
 0x21c   : > { %1386 = vst.msk [vmem:[#allocation2 + $0x7c] sm:$0xf] %vm1370_vm10, %v1305_v15  ;;  %v1428_v15 = vld [vmem:[%s4204_s10 + $0x94] sm:$0xf] }
 0x21d   : > { %v2525_v20 = vmax.f32 %v2453_v16, 0.0  ;;  %v3795_v21 = vld [vmem:[#allocation2 + $0x70] sm:$0xf]  ;;  %1579 = vst.msk [vmem:[#allocation2 + $0x7c] sm:$0xf] %vm1563_vm11, %v1498_v49  ;;  %v2366_v35 = vpop.f32.mrf.mxu0 }
 0x21e   : > { %v3796_v23 = vor.u32 %v4011_v17, %v3795_v21  ;;  %v2367_v56 = vadd.f32 %v4841_v36, %v2366_v35 }
 0x21f   : > { %v2554_v25 = vpack.c.bf16 %v2525_v20, %v2524_v19  ;;  %v1621_v20 = vld [vmem:[%s4204_s10 + $0x9c] sm:$0xf] }
 0x220   : > { %2385 = vmatmul.bf16.gmra.mxu0 %v3796_v23  ;;  %867 = vrot.lane.b32.xlu1 %v780_v18, %s4113_s13 }
 0x221   : > { %865 = vrot.lane.b32.xlu0 %v779_v24, %s4113_s13  ;;  %2654 = vmatmul.bf16.gmra.mxu2 %v2554_v25  ;;  %v1813_v24 = vld [vmem:[%s4204_s10 + $0xa0] sm:$0xf] }
 0x222   : > { %v1691_v27 = vpop.permute.xlu1 %1690  ;;  %1318 = vrot.lane.b32.xlu2 %v1232_v26, %s4115_s15 }
 0x223   : > { %1772 = vst.msk [vmem:[#allocation2 + $0x7c] sm:$0xf] %vm1756_vm12, %v1691_v27  ;;  %v1689_v28 = vpop.permute.xlu0 %1688  ;;  %v1502_v30 = vpop.permute.xlu2 %1501 }
 0x224   : > { %1771 = vst.msk [vmem:[#allocation2 + $0x74] sm:$0xf] %vm1756_vm12, %v1689_v28 }
 0x225   : > { %1964 = vst.msk [vmem:[#allocation2 + $0x74] sm:$0xf] %vm1949_vm13, %v1882_v57  ;;  %v2368_v54 = vpop.f32.mrf.mxu0  ;;  %v975_v57 = vld [vmem:[%s4204_s10 + $0x84] sm:$0xf] }
 0x226   : > { %v2369_v58 = vadd.f32 %v4841_v36, %v2368_v54  ;;  %v783_v54 = vld [vmem:[%s4204_s10 + $0x80] sm:$0xf] }
 0x228   : > { %1511 = vrot.lane.b32.xlu1 %v1425_v29, %s4116_s16 }
 0x229   : > { %1320 = vrot.lane.b32.xlu0 %v1233_v31, %s4115_s15 }
 0x22a   : > { %v1047_v33 = vpop.permute.xlu1 %1046  ;;  %1513 = vrot.lane.b32.xlu2 %v1426_v32, %s4116_s16 }
 0x22b   : > { %v1884_v34 = vpop.permute.xlu0 %1883  ;;  %v1886_v40 = vpop.permute.xlu2 %1885  ;;  %v1094_v42 = vrot.slane %v1047_v33, 4 }
 0x22c   : > { %1965 = vst.msk [vmem:[#allocation2 + $0x7c] sm:$0xf] %vm1949_vm13, %v1884_v34  ;;  %v4010_v45 = vld [vmem:[#allocation2 + $0x74] sm:$0xf] }
 0x22d   : > { %v1127_v48 = vsel %vm1110_vm5, %v1094_v42, %v1047_v33  ;;  %v976_v33 = vld [vmem:[%s4204_s10 + $0x88] sm:$0xf] }
 0x230   : > { %1706 = vrot.lane.b32.xlu1 %v1619_v39, %s4117_s17 }
 0x231   : > { %1704 = vrot.lane.b32.xlu0 %v1618_v41, %s4117_s17 }
 0x232   : > { %v856_v46 = vpop.permute.xlu1 %855  ;;  %v2455_v47 = vpop.f32.mrf.mxu1  ;;  %1897 = vrot.lane.b32.xlu2 %v1811_v43, %s4118_s18 }
 0x233   : > { %935 = vst.msk [vmem:[#allocation2 + $0x88] sm:$0xf] %vm917_vm8, %v856_v46  ;;  %v854_v49 = vpop.permute.xlu0 %853  ;;  %v3797_v50 = vld [vmem:[#allocation2 + $0x78] sm:$0xf0]  ;;  %v1053_v53 = vpop.permute.xlu2 %1052  ;;  %v2456_v59 = vadd.f32 %v2455_v47, %v2367_v56  ;;  %v1236_v56 = vld [vmem:[%s4204_s10 + $0x90] sm:$0xf] }
 0x234   : > { %1195 = vst.msk [vmem:[#allocation2 + $0x88] sm:$0xff] %vm4593_vm9, %v1128_v44  ;;  %v3800_v51 = vor.u32 %v4010_v45, %v3797_v50  ;;  %v1097_v19 = vrot.slane %v1053_v53, 4 }
 0x235   : > { %934 = vst.msk [vmem:[#allocation2 + $0x80] sm:$0xf] %vm917_vm8, %v854_v49  ;;  %v2526_v2 = vmax.f32 %v2456_v59, 0.0  ;;  %v1429_v59 = vld [vmem:[%s4204_s10 + $0x98] sm:$0xf] }
 0x236   : > { %1194 = vst.msk [vmem:[#allocation2 + $0x80] sm:$0xff] %vm4593_vm9, %v1127_v48  ;;  %3932 = vmatmul.msk.bf16.gmra.mxu1 %vm2286_vm14, %v3800_v51  ;;  %v1130_v25 = vsel %vm1110_vm5, %v1097_v19, %v1053_v53  ;;  %v784_v48 = vld [vmem:[%s4204_s10 + $0x84] sm:$0xf] }
 0x237   : > { %1387 = vst.msk [vmem:[#allocation2 + $0x84] sm:$0xf] %vm1370_vm10, %v1307_v22  ;;  %v1620_v22 = vld [vmem:[%s4204_s10 + $0x98] sm:$0xf] }
 0x238   : > { %1062 = vrot.lane.b32.xlu1 %v974_v52, %s4114_s14 }
 0x239   : > { %1899 = vrot.lane.b32.xlu0 %v1812_v55, %s4118_s18 }
 0x23a   : > { %v1500_v60 = vpop.permute.xlu1 %1499  ;;  %v2457_v61 = vpop.f32.mrf.mxu1  ;;  %1064 = vrot.lane.b32.xlu2 %v975_v57, %s4114_s14 }
 0x23b   : > { %1580 = vst.msk [vmem:[#allocation2 + $0x84] sm:$0xf] %vm1563_vm11, %v1500_v60  ;;  %v1309_v62 = vpop.permute.xlu0 %1308  ;;  %v2458_v63 = vadd.f32 %v2457_v61, %v2369_v58  ;;  %v4013_v0 = vld [vmem:[#allocation2 + $0x84] sm:$0xf0]  ;;  %v1237_v61 = vld [vmem:[%s4204_s10 + $0x94] sm:$0xf] }
 0x23c   : > { %1388 = vst.msk [vmem:[#allocation2 + $0x8c] sm:$0xf] %vm1370_vm10, %v1309_v62  ;;  %v1311_v5 = vpop.permute.xlu2 %1310  ;;  %v1430_v62 = vld [vmem:[%s4204_s10 + $0x9c] sm:$0xf] }
 0x23d   : > { %v2527_v3 = vmax.f32 %v2458_v63, 0.0  ;;  %v3803_v4 = vld [vmem:[#allocation2 + $0x80] sm:$0xf]  ;;  %1581 = vst.msk [vmem:[#allocation2 + $0x8c] sm:$0xf] %vm1563_vm11, %v1502_v30  ;;  %v2371_v18 = vpop.f32.mrf.mxu0 }
 0x23e   : > { %v3804_v6 = vor.u32 %v4013_v0, %v3803_v4  ;;  %v2372_v39 = vadd.f32 %v4841_v36, %v2371_v18  ;;  %v1816_v18 = vld [vmem:[%s4204_s10 + $0xac] sm:$0xf] }
 0x23f   : > { %v2555_v8 = vpack.c.bf16 %v2527_v3, %v2526_v2  ;;  %v1623_v3 = vld [vmem:[%s4204_s10 + $0xa4] sm:$0xf] }
 0x240   : > { %2390 = vmatmul.bf16.gmra.mxu0 %v3804_v6  ;;  %871 = vrot.lane.b32.xlu1 %v782_v1, %s4113_s13 }
 0x241   : > { %869 = vrot.lane.b32.xlu0 %v781_v7, %s4113_s13  ;;  %2659 = vmatmul.bf16.gmra.mxu2 %v2555_v8  ;;  %v1815_v7 = vld [vmem:[%s4204_s10 + $0xa8] sm:$0xf] }
 0x242   : > { %v1695_v10 = vpop.permute.xlu1 %1694  ;;  %1322 = vrot.lane.b32.xlu2 %v1234_v9, %s4115_s15 }
 0x243   : > { %1774 = vst.msk [vmem:[#allocation2 + $0x8c] sm:$0xf] %vm1756_vm12, %v1695_v10  ;;  %v1693_v11 = vpop.permute.xlu0 %1692 }
 0x244   : > { %1773 = vst.msk [vmem:[#allocation2 + $0x84] sm:$0xf] %vm1756_vm12, %v1693_v11  ;;  %v1506_v13 = vpop.permute.xlu2 %1505 }
 0x245   : > { %1966 = vst.msk [vmem:[#allocation2 + $0x84] sm:$0xf] %vm1949_vm13, %v1886_v40  ;;  %v2373_v35 = vpop.f32.mrf.mxu0  ;;  %v977_v40 = vld [vmem:[%s4204_s10 + $0x8c] sm:$0xf] }
 0x246   : > { %v2374_v41 = vadd.f32 %v4841_v36, %v2373_v35  ;;  %v785_v35 = vld [vmem:[%s4204_s10 + $0x88] sm:$0xf] }
 0x248   : > { %1515 = vrot.lane.b32.xlu1 %v1427_v12, %s4116_s16 }
 0x249   : > { %1324 = vrot.lane.b32.xlu0 %v1235_v14, %s4115_s15 }
 0x24a   : > { %v1051_v16 = vpop.permute.xlu1 %1050  ;;  %1517 = vrot.lane.b32.xlu2 %v1428_v15, %s4116_s16 }
 0x24b   : > { %v1888_v17 = vpop.permute.xlu0 %1887  ;;  %v1096_v23 = vrot.slane %v1051_v16, 4 }
 0x24c   : > { %1967 = vst.msk [vmem:[#allocation2 + $0x8c] sm:$0xf] %vm1949_vm13, %v1888_v17  ;;  %v1890_v21 = vpop.permute.xlu2 %1889  ;;  %v4012_v26 = vld [vmem:[#allocation2 + $0x84] sm:$0xf] }
 0x24d   : > { %v1129_v29 = vsel %vm1110_vm5, %v1096_v23, %v1051_v16  ;;  %v978_v16 = vld [vmem:[%s4204_s10 + $0x90] sm:$0xf] }
 0x250   : > { %1710 = vrot.lane.b32.xlu1 %v1621_v20, %s4117_s17 }
 0x251   : > { %1708 = vrot.lane.b32.xlu0 %v1620_v22, %s4117_s17 }
 0x252   : > { %v860_v27 = vpop.permute.xlu1 %859  ;;  %v2460_v28 = vpop.f32.mrf.mxu1  ;;  %1901 = vrot.lane.b32.xlu2 %v1813_v24, %s4118_s18 }
 0x253   : > { %937 = vst.msk [vmem:[#allocation2 + $0x98] sm:$0xf] %vm917_vm8, %v860_v27  ;;  %v858_v30 = vpop.permute.xlu0 %857  ;;  %v3805_v31 = vld [vmem:[#allocation2 + $0x88] sm:$0xf0]  ;;  %v2461_v42 = vadd.f32 %v2460_v28, %v2372_v39  ;;  %v1238_v39 = vld [vmem:[%s4204_s10 + $0x98] sm:$0xf] }
 0x254   : > { %1197 = vst.msk [vmem:[#allocation2 + $0x98] sm:$0xff] %vm4593_vm9, %v1130_v25  ;;  %v3808_v32 = vor.u32 %v4012_v26, %v3805_v31  ;;  %v1057_v34 = vpop.permute.xlu2 %1056 }
 0x255   : > { %936 = vst.msk [vmem:[#allocation2 + $0x90] sm:$0xf] %vm917_vm8, %v858_v30  ;;  %v2528_v49 = vmax.f32 %v2461_v42, 0.0  ;;  %v1099_v2 = vrot.slane %v1057_v34, 4  ;;  %v786_v30 = vld [vmem:[%s4204_s10 + $0x8c] sm:$0xf] }
 0x256   : > { %1196 = vst.msk [vmem:[#allocation2 + $0x90] sm:$0xff] %vm4593_vm9, %v1129_v29  ;;  %3933 = vmatmul.msk.bf16.gmra.mxu1 %vm2286_vm14, %v3808_v32  ;;  %v1431_v42 = vld [vmem:[%s4204_s10 + $0xa0] sm:$0xf] }
 0x257   : > { %1389 = vst.msk [vmem:[#allocation2 + $0x94] sm:$0xf] %vm1370_vm10, %v1311_v5  ;;  %v1622_v5 = vld [vmem:[%s4204_s10 + $0xa0] sm:$0xf]  ;;  %v1132_v8 = vsel %vm1110_vm5, %v1099_v2, %v1057_v34 }
 0x258   : > { %1066 = vrot.lane.b32.xlu1 %v976_v33, %s4114_s14 }
 0x259   : > { %1903 = vrot.lane.b32.xlu0 %v1814_v37, %s4118_s18 }
 0x25a   : > { %v1504_v43 = vpop.permute.xlu1 %1503  ;;  %v2462_v44 = vpop.f32.mrf.mxu1  ;;  %1068 = vrot.lane.b32.xlu2 %v977_v40, %s4114_s14 }
 0x25b   : > { %1582 = vst.msk [vmem:[#allocation2 + $0x94] sm:$0xf] %vm1563_vm11, %v1504_v43  ;;  %v1313_v45 = vpop.permute.xlu0 %1312  ;;  %v2463_v46 = vadd.f32 %v2462_v44, %v2374_v41  ;;  %v4015_v47 = vld [vmem:[#allocation2 + $0x94] sm:$0xf0]  ;;  %v1239_v44 = vld [vmem:[%s4204_s10 + $0x9c] sm:$0xf] }
 0x25c   : > { %1390 = vst.msk [vmem:[#allocation2 + $0x9c] sm:$0xf] %vm1370_vm10, %v1313_v45  ;;  %v1315_v52 = vpop.permute.xlu2 %1314  ;;  %v1432_v45 = vld [vmem:[%s4204_s10 + $0xa4] sm:$0xf] }
 0x25d   : > { %v2529_v50 = vmax.f32 %v2463_v46, 0.0  ;;  %v3811_v51 = vld [vmem:[#allocation2 + $0x90] sm:$0xf]  ;;  %1583 = vst.msk [vmem:[#allocation2 + $0x9c] sm:$0xf] %vm1563_vm11, %v1506_v13  ;;  %v2376_v1 = vpop.f32.mrf.mxu0 }
 0x25e   : > { %v3812_v53 = vor.u32 %v4015_v47, %v3811_v51  ;;  %v2377_v20 = vadd.f32 %v4841_v36, %v2376_v1  ;;  %v1818_v1 = vld [vmem:[%s4204_s10 + $0xb4] sm:$0xf] }
 0x25f   : > { %v2556_v55 = vpack.c.bf16 %v2529_v50, %v2528_v49  ;;  %v1625_v50 = vld [vmem:[%s4204_s10 + $0xac] sm:$0xf] }
 0x260   : > { %2395 = vmatmul.bf16.gmra.mxu0 %v3812_v53  ;;  %875 = vrot.lane.b32.xlu1 %v784_v48, %s4113_s13 }
 0x261   : > { %873 = vrot.lane.b32.xlu0 %v783_v54, %s4113_s13  ;;  %2664 = vmatmul.bf16.gmra.mxu2 %v2556_v55  ;;  %v1817_v54 = vld [vmem:[%s4204_s10 + $0xb0] sm:$0xf] }
 0x262   : > { %v1699_v57 = vpop.permute.xlu1 %1698  ;;  %1326 = vrot.lane.b32.xlu2 %v1236_v56, %s4115_s15 }
 0x263   : > { %1776 = vst.msk [vmem:[#allocation2 + $0x9c] sm:$0xf] %vm1756_vm12, %v1699_v57  ;;  %v1697_v58 = vpop.permute.xlu0 %1696 }
 0x264   : > { %1775 = vst.msk [vmem:[#allocation2 + $0x94] sm:$0xf] %vm1756_vm12, %v1697_v58  ;;  %v1510_v60 = vpop.permute.xlu2 %1509 }
 0x265   : > { %1968 = vst.msk [vmem:[#allocation2 + $0x94] sm:$0xf] %vm1949_vm13, %v1890_v21  ;;  %v2378_v19 = vpop.f32.mrf.mxu0  ;;  %v979_v21 = vld [vmem:[%s4204_s10 + $0x94] sm:$0xf] }
 0x266   : > { %v2379_v22 = vadd.f32 %v4841_v36, %v2378_v19  ;;  %v1240_v19 = vld [vmem:[%s4204_s10 + $0xa0] sm:$0xf] }
 0x268   : > { %1519 = vrot.lane.b32.xlu1 %v1429_v59, %s4116_s16 }
 0x269   : > { %1328 = vrot.lane.b32.xlu0 %v1237_v61, %s4115_s15 }
 0x26a   : > { %v1055_v63 = vpop.permute.xlu1 %1054  ;;  %1521 = vrot.lane.b32.xlu2 %v1430_v62, %s4116_s16 }
 0x26b   : > { %v1892_v0 = vpop.permute.xlu0 %1891  ;;  %v1098_v6 = vrot.slane %v1055_v63, 4 }
 0x26c   : > { %1969 = vst.msk [vmem:[#allocation2 + $0x9c] sm:$0xf] %vm1949_vm13, %v1892_v0  ;;  %v1894_v4 = vpop.permute.xlu2 %1893  ;;  %v4014_v9 = vld [vmem:[#allocation2 + $0x94] sm:$0xf] }
 0x26d   : > { %v1131_v11 = vsel %vm1110_vm5, %v1098_v6, %v1055_v63  ;;  %v980_v63 = vld [vmem:[%s4204_s10 + $0x98] sm:$0xf] }
 0x270   : > { %1714 = vrot.lane.b32.xlu1 %v1623_v3, %s4117_s17 }
 0x271   : > { %1712 = vrot.lane.b32.xlu0 %v1622_v5, %s4117_s17 }
 0x272   : > { %v864_v10 = vpop.permute.xlu1 %863  ;;  %1905 = vrot.lane.b32.xlu2 %v1815_v7, %s4118_s18 }
 0x273   : > { %939 = vst.msk [vmem:[#allocation2 + $0xa8] sm:$0xf] %vm917_vm8, %v864_v10  ;;  %v862_v12 = vpop.permute.xlu0 %861  ;;  %v2465_v13 = vpop.f32.mrf.mxu1  ;;  %v3813_v14 = vld [vmem:[#allocation2 + $0x98] sm:$0xf0] }
 0x274   : > { %1199 = vst.msk [vmem:[#allocation2 + $0xa8] sm:$0xff] %vm4593_vm9, %v1132_v8  ;;  %v3816_v15 = vor.u32 %v4014_v9, %v3813_v14  ;;  %v1061_v17 = vpop.permute.xlu2 %1060  ;;  %v2466_v23 = vadd.f32 %v2465_v13, %v2377_v20  ;;  %v788_v13 = vld [vmem:[%s4204_s10 + $0x94] sm:$0xf] }
 0x275   : > { %938 = vst.msk [vmem:[#allocation2 + $0xa0] sm:$0xf] %vm917_vm8, %v862_v12  ;;  %v1101_v49 = vrot.slane %v1061_v17, 4 }
 0x276   : > { %1198 = vst.msk [vmem:[#allocation2 + $0xa0] sm:$0xff] %vm4593_vm9, %v1131_v11  ;;  %3934 = vmatmul.msk.bf16.gmra.mxu1 %vm2286_vm14, %v3816_v15  ;;  %v2530_v32 = vmax.f32 %v2466_v23, 0.0 }
 0x277   : > { %1391 = vst.msk [vmem:[#allocation2 + $0xa4] sm:$0xf] %vm1370_vm10, %v1315_v52  ;;  %v1624_v52 = vld [vmem:[%s4204_s10 + $0xa8] sm:$0xf]  ;;  %v1134_v55 = vsel %vm1110_vm5, %v1101_v49, %v1061_v17  ;;  %v787_v17 = vld [vmem:[%s4204_s10 + $0x90] sm:$0xf] }
 0x278   : > { %1070 = vrot.lane.b32.xlu1 %v978_v16, %s4114_s14 }
 0x279   : > { %1907 = vrot.lane.b32.xlu0 %v1816_v18, %s4118_s18 }
 0x27a   : > { %v1508_v24 = vpop.permute.xlu1 %1507  ;;  %1072 = vrot.lane.b32.xlu2 %v979_v21, %s4114_s14 }
 0x27b   : > { %1584 = vst.msk [vmem:[#allocation2 + $0xa4] sm:$0xf] %vm1563_vm11, %v1508_v24  ;;  %v1317_v25 = vpop.permute.xlu0 %1316  ;;  %v2467_v26 = vpop.f32.mrf.mxu1  ;;  %v4017_v27 = vld [vmem:[#allocation2 + $0xa4] sm:$0xf0]  ;;  %v1241_v24 = vld [vmem:[%s4204_s10 + $0xa4] sm:$0xf] }
 0x27c   : > { %1392 = vst.msk [vmem:[#allocation2 + $0xac] sm:$0xf] %vm1370_vm10, %v1317_v25  ;;  %v2468_v28 = vadd.f32 %v2467_v26, %v2379_v22  ;;  %v1319_v31 = vpop.permute.xlu2 %1318  ;;  %v1433_v22 = vld [vmem:[%s4204_s10 + $0xa8] sm:$0xf]  ;;  %v1434_v25 = vld [vmem:[%s4204_s10 + $0xac] sm:$0xf] }
 0x27d   : > { %v3819_v29 = vld [vmem:[#allocation2 + $0xa0] sm:$0xf]  ;;  %1585 = vst.msk [vmem:[#allocation2 + $0xac] sm:$0xf] %vm1563_vm11, %v1510_v60  ;;  %v2381_v48 = vpop.f32.mrf.mxu0 }
 0x27e   : > { %v2531_v33 = vmax.f32 %v2468_v28, 0.0  ;;  %v3820_v34 = vor.u32 %v4017_v27, %v3819_v29  ;;  %v2382_v3 = vadd.f32 %v4841_v36, %v2381_v48  ;;  %v5158_v48 = vld [vmem:[%s5827_s2] ss:$0 sm:$0xff] }
 0x280   : > { %2400 = vmatmul.bf16.gmra.mxu0 %v3820_v34  ;;  %879 = vrot.lane.b32.xlu1 %v786_v30, %s4113_s13  ;;  %v2557_v37 = vpack.c.bf16 %v2531_v33, %v2530_v32  ;;  %v1627_v30 = vld [vmem:[%s4204_s10 + $0xb4] sm:$0xf]  ;;  %v1626_v32 = vld [vmem:[%s4204_s10 + $0xb0] sm:$0xf]  ;;  %v1819_v34 = vld [vmem:[%s4204_s10 + $0xb8] sm:$0xf] }
 0x281   : > { %877 = vrot.lane.b32.xlu0 %v785_v35, %s4113_s13 }
 0x282   : > { %2669 = vmatmul.bf16.gmra.mxu2 %v2557_v37  ;;  %v1703_v40 = vpop.permute.xlu1 %1702  ;;  %1330 = vrot.lane.b32.xlu2 %v1238_v39, %s4115_s15 }
 0x283   : > { %1778 = vst.msk [vmem:[#allocation2 + $0xac] sm:$0xf] %vm1756_vm12, %v1703_v40  ;;  %v1701_v41 = vpop.permute.xlu0 %1700 }
 0x284   : > { %1777 = vst.msk [vmem:[#allocation2 + $0xa4] sm:$0xf] %vm1756_vm12, %v1701_v41  ;;  %v1514_v43 = vpop.permute.xlu2 %1513 }
 0x285   : > { %1970 = vst.msk [vmem:[#allocation2 + $0xa4] sm:$0xf] %vm1949_vm13, %v1894_v4  ;;  %v2383_v2 = vpop.f32.mrf.mxu0  ;;  %v981_v4 = vld [vmem:[%s4204_s10 + $0x9c] sm:$0xf] }
 0x286   : > { %v2384_v5 = vadd.f32 %v4841_v36, %v2383_v2 }
 0x288   : > { %1523 = vrot.lane.b32.xlu1 %v1431_v42, %s4116_s16 }
 0x289   : > { %1332 = vrot.lane.b32.xlu0 %v1239_v44, %s4115_s15 }
 0x28a   : > { %v1059_v46 = vpop.permute.xlu1 %1058  ;;  %1525 = vrot.lane.b32.xlu2 %v1432_v45, %s4116_s16  ;;  %v1820_v45 = vld [vmem:[%s4204_s10 + $0xbc] sm:$0xf]  ;;  %s5836_s10 = smov 111  }
 0x28b   : > { %v1896_v47 = vpop.permute.xlu0 %1895  ;;  %v1100_v53 = vrot.slane %v1059_v46, 4 }
 0x28c   : > { %1971 = vst.msk [vmem:[#allocation2 + $0xac] sm:$0xf] %vm1949_vm13, %v1896_v47  ;;  %v1898_v51 = vpop.permute.xlu2 %1897  ;;  %v4016_v56 = vld [vmem:[#allocation2 + $0xa4] sm:$0xf] }
 0x28d   : > { %v1133_v58 = vsel %vm1110_vm5, %v1100_v53, %v1059_v46 }
 0x290   : > { %1718 = vrot.lane.b32.xlu1 %v1625_v50, %s4117_s17 }
 0x291   : > { %1716 = vrot.lane.b32.xlu0 %v1624_v52, %s4117_s17 }
 0x292   : > { %v868_v57 = vpop.permute.xlu1 %867  ;;  %1909 = vrot.lane.b32.xlu2 %v1817_v54, %s4118_s18 }
 0x293   : > { %941 = vst.msk [vmem:[#allocation2 + $0xb8] sm:$0xf] %vm917_vm8, %v868_v57  ;;  %v866_v59 = vpop.permute.xlu0 %865  ;;  %v2470_v60 = vpop.f32.mrf.mxu1  ;;  %v3821_v61 = vld [vmem:[#allocation2 + $0xa8] sm:$0xf0] }
 0x294   : > { %1201 = vst.msk [vmem:[#allocation2 + $0xb8] sm:$0xff] %vm4593_vm9, %v1134_v55  ;;  %v3824_v62 = vor.u32 %v4016_v56, %v3821_v61  ;;  %v1065_v0 = vpop.permute.xlu2 %1064  ;;  %v2471_v6 = vadd.f32 %v2470_v60, %v2382_v3 }
 0x295   : > { %940 = vst.msk [vmem:[#allocation2 + $0xb0] sm:$0xf] %vm917_vm8, %v866_v59  ;;  %v1103_v29 = vrot.slane %v1065_v0, 4 }
 0x296   : > { %1200 = vst.msk [vmem:[#allocation2 + $0xb0] sm:$0xff] %vm4593_vm9, %v1133_v58  ;;  %3935 = vmatmul.msk.bf16.gmra.mxu1 %vm2286_vm14, %v3824_v62  ;;  %v2532_v36 = vmax.f32 %v2471_v6, 0.0 }
 0x297   : > { %1393 = vst.msk [vmem:[#allocation2 + $0xb4] sm:$0xf] %vm1370_vm10, %v1319_v31  ;;  %v1136_v35 = vsel %vm1110_vm5, %v1103_v29, %v1065_v0 }
 0x298   : > { %1074 = vrot.lane.b32.xlu1 %v980_v63, %s4114_s14 }
 0x299   : > { %1911 = vrot.lane.b32.xlu0 %v1818_v1, %s4118_s18 }
 0x29a   : > { %v1512_v7 = vpop.permute.xlu1 %1511  ;;  %1076 = vrot.lane.b32.xlu2 %v981_v4, %s4114_s14  ;;  %v2645_v4 = vpop.f32.mrf.mxu2  ;;  %s4137_s14 = smov 112  }
 0x29b   : > { %1586 = vst.msk [vmem:[#allocation2 + $0xb4] sm:$0xf] %vm1563_vm11, %v1512_v7  ;;  %v1321_v8 = vpop.permute.xlu0 %1320  ;;  %v2472_v9 = vpop.f32.mrf.mxu1  ;;  %v4019_v10 = vld [vmem:[#allocation2 + $0xb4] sm:$0xf0] }
 0x29c   : > { %1394 = vst.msk [vmem:[#allocation2 + $0xbc] sm:$0xf] %vm1370_vm10, %v1321_v8  ;;  %v2473_v11 = vadd.f32 %v2472_v9, %v2384_v5  ;;  %v1323_v14 = vpop.permute.xlu2 %1322 }
 0x29d   : > { %v3827_v12 = vld [vmem:[#allocation2 + $0xb0] sm:$0xf]  ;;  %1587 = vst.msk [vmem:[#allocation2 + $0xbc] sm:$0xf] %vm1563_vm11, %v1514_v43  ;;  %v2386_v28 = vpop.f32.mrf.mxu0 }
 0x29e   : > { %v2533_v15 = vmax.f32 %v2473_v11, 0.0  ;;  %v3828_v16 = vor.u32 %v4019_v10, %v3827_v12  ;;  %v2387_v49 = vadd.f32 %v5158_v48, %v2386_v28 }
 0x2a0   : > { %2405 = vmatmul.bf16.gmra.mxu0 %v3828_v16  ;;  %883 = vrot.lane.b32.xlu1 %v788_v13, %s4113_s13  ;;  %v2558_v18 = vpack.c.bf16 %v2533_v15, %v2532_v36 }
 0x2a1   : > { %881 = vrot.lane.b32.xlu0 %v787_v17, %s4113_s13  ;;  %s4136_s13 = smov 113  }
 0x2a2   : > { %2674 = vmatmul.bf16.gmra.mxu2 %v2558_v18  ;;  %v1707_v20 = vpop.permute.xlu1 %1706  ;;  %1334 = vrot.lane.b32.xlu2 %v1240_v19, %s4115_s15  ;;  %v2647_v16 = vpop.f32.mrf.mxu2 }
 0x2a3   : > { %1780 = vst.msk [vmem:[#allocation2 + $0xbc] sm:$0xf] %vm1756_vm12, %v1707_v20  ;;  %v1705_v21 = vpop.permute.xlu0 %1704 }
 0x2a4   : > { %1779 = vst.msk [vmem:[#allocation2 + $0xb4] sm:$0xf] %vm1756_vm12, %v1705_v21  ;;  %v1518_v23 = vpop.permute.xlu2 %1517 }
 0x2a5   : > { %1972 = vst.msk [vmem:[#allocation2 + $0xb4] sm:$0xf] %vm1949_vm13, %v1898_v51  ;;  %v2388_v47 = vpop.f32.mrf.mxu0 }
 0x2a6   : > { %v2389_v50 = vadd.f32 %v5158_v48, %v2388_v47 }
 0x2a8   : > { %1527 = vrot.lane.b32.xlu1 %v1433_v22, %s4116_s16  ;;  %v5185_v22 = vld [vmem:[%s5829_s4] ss:$0 sm:$0xff] }
 0x2a9   : > { %1336 = vrot.lane.b32.xlu0 %v1241_v24, %s4115_s15  ;;  %s4127_s15 = smov 16  }
 0x2aa   : > { %v1063_v26 = vpop.permute.xlu1 %1062  ;;  %1529 = vrot.lane.b32.xlu2 %v1434_v25, %s4116_s16  ;;  %v2650_v28 = vpop.f32.mrf.mxu2 }
 0x2ab   : > { %v1900_v27 = vpop.permute.xlu0 %1899  ;;  %v1102_v33 = vrot.slane %v1063_v26, 4 }
 0x2ac   : > { %1973 = vst.msk [vmem:[#allocation2 + $0xbc] sm:$0xf] %vm1949_vm13, %v1900_v27  ;;  %v1902_v31 = vpop.permute.xlu2 %1901  ;;  %v4018_v37 = vld [vmem:[#allocation2 + $0xb4] sm:$0xf] }
 0x2ad   : > { %v1135_v40 = vsel %vm1110_vm5, %v1102_v33, %v1063_v26  ;;  %v2646_v33 = vadd.f32 %v5185_v22, %v2645_v4 }
 0x2b0   : > { %1722 = vrot.lane.b32.xlu1 %v1627_v30, %s4117_s17 }
 0x2b1   : > { %1720 = vrot.lane.b32.xlu0 %v1626_v32, %s4117_s17  ;;  %s4128_s17 = smov 15  }
 0x2b2   : > { %v872_v39 = vpop.permute.xlu1 %871  ;;  %1913 = vrot.lane.b32.xlu2 %v1819_v34, %s4118_s18 }
 0x2b3   : > { %943 = vst.msk [vmem:[#allocation2 + $0xc8] sm:$0xf] %vm917_vm8, %v872_v39  ;;  %v870_v41 = vpop.permute.xlu0 %869  ;;  %v2475_v42 = vpop.f32.mrf.mxu1  ;;  %v3829_v43 = vld [vmem:[#allocation2 + $0xb8] sm:$0xf0] }
 0x2b4   : > { %1203 = vst.msk [vmem:[#allocation2 + $0xc8] sm:$0xff] %vm4593_vm9, %v1136_v35  ;;  %v3832_v44 = vor.u32 %v4018_v37, %v3829_v43  ;;  %v1069_v46 = vpop.permute.xlu2 %1068  ;;  %v2476_v51 = vadd.f32 %v2475_v42, %v2387_v49  ;;  %v2725_v37 = vmax.f32 %v2646_v33, 0.0  ;;  %v2651_v49 = vadd.f32 %v5185_v22, %v2650_v28 }
 0x2b5   : > { %942 = vst.msk [vmem:[#allocation2 + $0xc0] sm:$0xf] %vm917_vm8, %v870_v41  ;;  %v1105_v6 = vrot.slane %v1069_v46, 4  ;;  %v2652_v41 = vpop.f32.mrf.mxu2 }
 0x2b6   : > { %1202 = vst.msk [vmem:[#allocation2 + $0xc0] sm:$0xff] %vm4593_vm9, %v1135_v40  ;;  %3936 = vmatmul.msk.bf16.gmra.mxu1 %vm2286_vm14, %v3832_v44  ;;  %v2534_v58 = vmax.f32 %v2476_v51, 0.0  ;;  %v2648_v40 = vadd.f32 %v5185_v22, %v2647_v16 }
 0x2b7   : > { %1395 = vst.msk [vmem:[#allocation2 + $0xc4] sm:$0xf] %vm1370_vm10, %v1323_v14  ;;  %v1138_v8 = vsel %vm1110_vm5, %v1105_v6, %v1069_v46 }
 0x2b8   : > { %v2726_v44 = vmax.f32 %v2648_v40, 0.0 }
 0x2b9   : > { %1915 = vrot.lane.b32.xlu0 %v1820_v45, %s4118_s18  ;;  %s4129_s18 = smov 14  }
 0x2ba   : > { %v1516_v52 = vpop.permute.xlu1 %1515 }
 0x2bb   : > { %1588 = vst.msk [vmem:[#allocation2 + $0xc4] sm:$0xf] %vm1563_vm11, %v1516_v52  ;;  %v1325_v53 = vpop.permute.xlu0 %1324  ;;  %v2477_v54 = vpop.f32.mrf.mxu1  ;;  %v4021_v55 = vld [vmem:[#allocation2 + $0xc4] sm:$0xf0] }
 0x2bc   : > { %1396 = vst.msk [vmem:[#allocation2 + $0xcc] sm:$0xf] %vm1370_vm10, %v1325_v53  ;;  %v2478_v56 = vadd.f32 %v2477_v54, %v2389_v50  ;;  %v1327_v62 = vpop.permute.xlu2 %1326 }
 0x2bd   : > { %v3835_v57 = vld [vmem:[#allocation2 + $0xc0] sm:$0xf]  ;;  %1589 = vst.msk [vmem:[#allocation2 + $0xcc] sm:$0xf] %vm1563_vm11, %v1518_v23  ;;  %v2391_v5 = vpop.f32.mrf.mxu0  ;;  %v2655_v51 = vpop.f32.mrf.mxu2 }
 0x2be   : > { %v2535_v59 = vmax.f32 %v2478_v56, 0.0  ;;  %v3836_v60 = vor.u32 %v4021_v55, %v3835_v57  ;;  %v2392_v18 = vadd.f32 %v5158_v48, %v2391_v5  ;;  %v2727_v56 = vmax.f32 %v2651_v49, 0.0 }
 0x2c0   : > { %2410 = vmatmul.bf16.gmra.mxu0 %v3836_v60  ;;  %v2559_v61 = vpack.c.bf16 %v2535_v59, %v2534_v58 }
 0x2c2   : > { %2679 = vmatmul.bf16.gmra.mxu2 %v2559_v61  ;;  %v1711_v63 = vpop.permute.xlu1 %1710 }
 0x2c3   : > { %1782 = vst.msk [vmem:[#allocation2 + $0xcc] sm:$0xf] %vm1756_vm12, %v1711_v63  ;;  %v1709_v0 = vpop.permute.xlu0 %1708 }
 0x2c4   : > { %1781 = vst.msk [vmem:[#allocation2 + $0xc4] sm:$0xf] %vm1756_vm12, %v1709_v0  ;;  %v1522_v2 = vpop.permute.xlu2 %1521 }
 0x2c5   : > { %1974 = vst.msk [vmem:[#allocation2 + $0xc4] sm:$0xf] %vm1949_vm13, %v1902_v31  ;;  %v2393_v17 = vpop.f32.mrf.mxu0 }
 0x2c6   : > { %v2394_v19 = vadd.f32 %v5158_v48, %v2393_v17 }
 0x2ca   : > { %v1067_v1 = vpop.permute.xlu1 %1066 }
 0x2cb   : > { %v1904_v3 = vpop.permute.xlu0 %1903  ;;  %v1104_v7 = vrot.slane %v1067_v1, 4 }
 0x2cc   : > { %1975 = vst.msk [vmem:[#allocation2 + $0xcc] sm:$0xf] %vm1949_vm13, %v1904_v3  ;;  %v4020_v9 = vld [vmem:[#allocation2 + $0xc4] sm:$0xf]  ;;  %v1906_v15 = vpop.permute.xlu2 %1905 }
 0x2cd   : > { %v1137_v11 = vsel %vm1110_vm5, %v1104_v7, %v1067_v1  ;;  %v2657_v1 = vpop.f32.mrf.mxu2 }
 0x2d2   : > { %v876_v10 = vpop.permute.xlu1 %875 }
 0x2d3   : > { %945 = vst.msk [vmem:[#allocation2 + $0xd8] sm:$0xf] %vm917_vm8, %v876_v10  ;;  %v874_v12 = vpop.permute.xlu0 %873  ;;  %v2480_v13 = vpop.f32.mrf.mxu1  ;;  %v3837_v14 = vld [vmem:[#allocation2 + $0xc8] sm:$0xf0] }
 0x2d4   : > { %1205 = vst.msk [vmem:[#allocation2 + $0xd8] sm:$0xff] %vm4593_vm9, %v1138_v8  ;;  %v3840_v36 = vor.u32 %v4020_v9, %v3837_v14  ;;  %v2481_v20 = vadd.f32 %v2480_v13, %v2392_v18  ;;  %v1073_v32 = vpop.permute.xlu2 %1072 }
 0x2d5   : > { %944 = vst.msk [vmem:[#allocation2 + $0xd0] sm:$0xf] %vm917_vm8, %v874_v12  ;;  %v1107_v47 = vrot.slane %v1073_v32, 4  ;;  %v2660_v16 = vpop.f32.mrf.mxu2 }
 0x2d6   : > { %1204 = vst.msk [vmem:[#allocation2 + $0xd0] sm:$0xff] %vm4593_vm9, %v1137_v11  ;;  %3937 = vmatmul.msk.bf16.gmra.mxu1 %vm2286_vm14, %v3840_v36  ;;  %v2536_v29 = vmax.f32 %v2481_v20, 0.0  ;;  %v2656_v36 = vadd.f32 %v5185_v22, %v2655_v51 }
 0x2d7   : > { %1397 = vst.msk [vmem:[#allocation2 + $0xd4] sm:$0xf] %vm1370_vm10, %v1327_v62  ;;  %v1140_v52 = vsel %vm1110_vm5, %v1107_v47, %v1073_v32  ;;  %v2653_v62 = vadd.f32 %v5185_v22, %v2652_v41 }
 0x2d8   : > { %v2729_v18 = vmax.f32 %v2656_v36, 0.0 }
 0x2d9   : > { %v2728_v5 = vmax.f32 %v2653_v62, 0.0 }
 0x2da   : > { %v1520_v21 = vpop.permute.xlu1 %1519 }
 0x2db   : > { %1590 = vst.msk [vmem:[#allocation2 + $0xd4] sm:$0xf] %vm1563_vm11, %v1520_v21  ;;  %v1329_v23 = vpop.permute.xlu0 %1328  ;;  %v2482_v24 = vpop.f32.mrf.mxu1  ;;  %v4023_v25 = vld [vmem:[#allocation2 + $0xd4] sm:$0xf0]  ;;  %v2658_v21 = vadd.f32 %v5185_v22, %v2657_v1 }
 0x2dc   : > { %1398 = vst.msk [vmem:[#allocation2 + $0xdc] sm:$0xf] %vm1370_vm10, %v1329_v23  ;;  %v2483_v26 = vadd.f32 %v2482_v24, %v2394_v19  ;;  %v1331_v42 = vpop.permute.xlu2 %1330 }
 0x2dd   : > { %v3843_v27 = vld [vmem:[#allocation2 + $0xd0] sm:$0xf]  ;;  %1591 = vst.msk [vmem:[#allocation2 + $0xdc] sm:$0xf] %vm1563_vm11, %v1522_v2  ;;  %v2396_v46 = vpop.f32.mrf.mxu0  ;;  %v2730_v24 = vmax.f32 %v2658_v21, 0.0 }
 0x2de   : > { %v2537_v30 = vmax.f32 %v2483_v26, 0.0  ;;  %v3844_v31 = vor.u32 %v4023_v25, %v3843_v27  ;;  %v2397_v0 = vadd.f32 %v5158_v48, %v2396_v46  ;;  %v2662_v26 = vpop.f32.mrf.mxu2 }
 0x2e0   : > { %2415 = vmatmul.bf16.gmra.mxu0 %v3844_v31  ;;  %v2560_v34 = vpack.c.bf16 %v2537_v30, %v2536_v29  ;;  %v2661_v30 = vadd.f32 %v5185_v22, %v2660_v16 }
 0x2e2   : > { %2684 = vmatmul.bf16.gmra.mxu2 %v2560_v34  ;;  %v1715_v35 = vpop.permute.xlu1 %1714 }
 0x2e3   : > { %1784 = vst.msk [vmem:[#allocation2 + $0xdc] sm:$0xf] %vm1756_vm12, %v1715_v35  ;;  %v1713_v39 = vpop.permute.xlu0 %1712  ;;  %v2731_v35 = vmax.f32 %v2661_v30, 0.0 }
 0x2e4   : > { %1783 = vst.msk [vmem:[#allocation2 + $0xd4] sm:$0xf] %vm1756_vm12, %v1713_v39  ;;  %v1526_v55 = vpop.permute.xlu2 %1525 }
 0x2e5   : > { %2757 = vxpose.xlu1.b32.start [1/16] %v2725_v37, 128  ;;  %1976 = vst.msk [vmem:[#allocation2 + $0xd4] sm:$0xf] %vm1949_vm13, %v1906_v15  ;;  %v2398_v63 = vpop.f32.mrf.mxu0 }
 0x2e6   : > { %v2399_v2 = vadd.f32 %v5158_v48, %v2398_v63 }
 0x2ea   : > { %v1071_v43 = vpop.permute.xlu1 %1070 }
 0x2eb   : > { %v1908_v45 = vpop.permute.xlu0 %1907  ;;  %v1106_v50 = vrot.slane %v1071_v43, 4 }
 0x2ec   : > { %1977 = vst.msk [vmem:[#allocation2 + $0xdc] sm:$0xf] %vm1949_vm13, %v1908_v45  ;;  %v4022_v53 = vld [vmem:[#allocation2 + $0xd4] sm:$0xf]  ;;  %v1910_v10 = vpop.permute.xlu2 %1909 }
 0x2ed   : > { %2758 = vxpose.xlu1.b32.cont [2/16] %v2726_v44, 128  ;;  %v1139_v57 = vsel %vm1110_vm5, %v1106_v50, %v1071_v43  ;;  %v2663_v44 = vadd.f32 %v5185_v22, %v2662_v26 }
 0x2f2   : > { %v880_v54 = vpop.permute.xlu1 %879 }
 0x2f3   : > { %947 = vst.msk [vmem:[#allocation2 + $0xe8] sm:$0xf] %vm917_vm8, %v880_v54  ;;  %v878_v58 = vpop.permute.xlu0 %877  ;;  %v2485_v59 = vpop.f32.mrf.mxu1  ;;  %v3845_v60 = vld [vmem:[#allocation2 + $0xd8] sm:$0xf0] }
 0x2f4   : > { %1207 = vst.msk [vmem:[#allocation2 + $0xe8] sm:$0xff] %vm4593_vm9, %v1140_v52  ;;  %v3848_v61 = vor.u32 %v4022_v53, %v3845_v60  ;;  %v2486_v3 = vadd.f32 %v2485_v59, %v2397_v0  ;;  %v1077_v20 = vpop.permute.xlu2 %1076  ;;  %v2732_v52 = vmax.f32 %v2663_v44, 0.0 }
 0x2f5   : > { %946 = vst.msk [vmem:[#allocation2 + $0xe0] sm:$0xf] %vm917_vm8, %v878_v58  ;;  %2759 = vxpose.xlu1.b32.cont [3/16] %v2727_v56, 128  ;;  %v1109_v28 = vrot.slane %v1077_v20, 4 }
 0x2f6   : > { %1206 = vst.msk [vmem:[#allocation2 + $0xe0] sm:$0xff] %vm4593_vm9, %v1139_v57  ;;  %3938 = vmatmul.msk.bf16.gmra.mxu1 %vm2286_vm14, %v3848_v61  ;;  %v2538_v12 = vmax.f32 %v2486_v3, 0.0 }
 0x2f7   : > { %1399 = vst.msk [vmem:[#allocation2 + $0xe4] sm:$0xf] %vm1370_vm10, %v1331_v42  ;;  %v1142_v32 = vsel %vm1110_vm5, %v1109_v28, %v1077_v20  ;;  %v2665_v42 = vpop.f32.mrf.mxu2 }
 0x2f8   : > { %v2666_v61 = vadd.f32 %v5185_v22, %v2665_v42 }
 0x2fa   : > { %v1524_v4 = vpop.permute.xlu1 %1523  ;;  %v2733_v1 = vmax.f32 %v2666_v61, 0.0 }
 0x2fb   : > { %1592 = vst.msk [vmem:[#allocation2 + $0xe4] sm:$0xf] %vm1563_vm11, %v1524_v4  ;;  %v1333_v6 = vpop.permute.xlu0 %1332  ;;  %v2487_v7 = vpop.f32.mrf.mxu1  ;;  %v4025_v8 = vld [vmem:[#allocation2 + $0xe4] sm:$0xf0] }
 0x2fc   : > { %1400 = vst.msk [vmem:[#allocation2 + $0xec] sm:$0xf] %vm1370_vm10, %v1333_v6  ;;  %v2488_v9 = vadd.f32 %v2487_v7, %v2399_v2  ;;  %v1335_v29 = vpop.permute.xlu2 %1334 }
 0x2fd   : > { %2760 = vxpose.xlu1.b32.cont [4/16] %v2728_v5, 128  ;;  %v3851_v11 = vld [vmem:[#allocation2 + $0xe0] sm:$0xf]  ;;  %1593 = vst.msk [vmem:[#allocation2 + $0xec] sm:$0xf] %vm1563_vm11, %v1526_v55  ;;  %v2401_v27 = vpop.f32.mrf.mxu0 }
 0x2fe   : > { %v2539_v13 = vmax.f32 %v2488_v9, 0.0  ;;  %v3852_v14 = vor.u32 %v4025_v8, %v3851_v11  ;;  %v2402_v46 = vadd.f32 %v5158_v48, %v2401_v27 }
 0x2ff   : > { %v2667_v57 = vpop.f32.mrf.mxu2 }
 0x300   : > { %2420 = vmatmul.bf16.gmra.mxu0 %v3852_v14  ;;  %v2561_v15 = vpack.c.bf16 %v2539_v13, %v2538_v12  ;;  %v2668_v4 = vadd.f32 %v5185_v22, %v2667_v57 }
 0x302   : > { %2689 = vmatmul.bf16.gmra.mxu2 %v2561_v15  ;;  %v1719_v17 = vpop.permute.xlu1 %1718  ;;  %v2734_v5 = vmax.f32 %v2668_v4, 0.0 }
 0x303   : > { %1786 = vst.msk [vmem:[#allocation2 + $0xec] sm:$0xf] %vm1756_vm12, %v1719_v17  ;;  %v1717_v19 = vpop.permute.xlu0 %1716 }
 0x304   : > { %1785 = vst.msk [vmem:[#allocation2 + $0xe4] sm:$0xf] %vm1756_vm12, %v1717_v19  ;;  %v1530_v47 = vpop.permute.xlu2 %1529 }
 0x305   : > { %2761 = vxpose.xlu1.b32.cont [5/16] %v2729_v18, 128  ;;  %1978 = vst.msk [vmem:[#allocation2 + $0xe4] sm:$0xf] %vm1949_vm13, %v1910_v10  ;;  %v2403_v45 = vpop.f32.mrf.mxu0 }
 0x306   : > { %v2404_v49 = vadd.f32 %v5158_v48, %v2403_v45 }
 0x307   : > { %v2670_v3 = vpop.f32.mrf.mxu2 }
 0x308   : > { %v2671_v8 = vadd.f32 %v5185_v22, %v2670_v3 }
 0x30a   : > { %v1075_v23 = vpop.permute.xlu1 %1074  ;;  %v2735_v11 = vmax.f32 %v2671_v8, 0.0 }
 0x30b   : > { %v1912_v25 = vpop.permute.xlu0 %1911  ;;  %v1108_v31 = vrot.slane %v1075_v23, 4 }
 0x30c   : > { %1979 = vst.msk [vmem:[#allocation2 + $0xec] sm:$0xf] %vm1949_vm13, %v1912_v25  ;;  %v4024_v33 = vld [vmem:[#allocation2 + $0xe4] sm:$0xf]  ;;  %v1914_v0 = vpop.permute.xlu2 %1913 }
 0x30d   : > { %2762 = vxpose.xlu1.b32.cont [6/16] %v2730_v24, 128  ;;  %v1141_v37 = vsel %vm1110_vm5, %v1108_v31, %v1075_v23 }
 0x30f   : > { %v2672_v9 = vpop.f32.mrf.mxu2 }
 0x310   : > { %v2673_v36 = vadd.f32 %v5185_v22, %v2672_v9 }
 0x312   : > { %v884_v34 = vpop.permute.xlu1 %883  ;;  %v2736_v20 = vmax.f32 %v2673_v36, 0.0 }
 0x313   : > { %949 = vst.msk [vmem:[#allocation2 + $0xf8] sm:$0xf] %vm917_vm8, %v884_v34  ;;  %v882_v39 = vpop.permute.xlu0 %881  ;;  %v2490_v40 = vpop.f32.mrf.mxu1  ;;  %v3853_v41 = vld [vmem:[#allocation2 + $0xe8] sm:$0xf0] }
 0x314   : > { %1209 = vst.msk [vmem:[#allocation2 + $0xf8] sm:$0xff] %vm4593_vm9, %v1142_v32  ;;  %v3856_v43 = vor.u32 %v4024_v33, %v3853_v41  ;;  %v2491_v50 = vadd.f32 %v2490_v40, %v2402_v46 }
 0x315   : > { %948 = vst.msk [vmem:[#allocation2 + $0xf0] sm:$0xf] %vm917_vm8, %v882_v39  ;;  %2763 = vxpose.xlu1.b32.cont [7/16] %v2731_v35, 128 }
 0x316   : > { %1208 = vst.msk [vmem:[#allocation2 + $0xf0] sm:$0xff] %vm4593_vm9, %v1141_v37  ;;  %3939 = vmatmul.msk.bf16.gmra.mxu1 %vm2286_vm14, %v3856_v43  ;;  %v2540_v58 = vmax.f32 %v2491_v50, 0.0 }
 0x317   : > { %1401 = vst.msk [vmem:[#allocation2 + $0xf4] sm:$0xf] %vm1370_vm10, %v1335_v29 }
 0x31a   : > { %v1528_v51 = vpop.permute.xlu1 %1527 }
 0x31b   : > { %v1337_v53 = vpop.permute.xlu0 %1336  ;;  %v2492_v54 = vpop.f32.mrf.mxu1  ;;  %v4027_v55 = vld [vmem:[#allocation2 + $0xf4] sm:$0xf0]  ;;  %1594 = vst.msk [vmem:[#allocation2 + $0xf4] sm:$0xf] %vm1563_vm11, %v1528_v51 }
 0x31c   : > { %1402 = vst.msk [vmem:[#allocation2 + $0xfc] sm:$0xf] %vm1370_vm10, %v1337_v53  ;;  %v2493_v38 = vadd.f32 %v2492_v54, %v2404_v49 }
 0x31d   : > { %2764 = vxpose.xlu1.b32.cont [8/16] %v2732_v52, 128  ;;  %v3859_v56 = vld [vmem:[#allocation2 + $0xf0] sm:$0xf]  ;;  %1595 = vst.msk [vmem:[#allocation2 + $0xfc] sm:$0xf] %vm1563_vm11, %v1530_v47  ;;  %v2406_v7 = vpop.f32.mrf.mxu0 }
 0x31e   : > { %v2541_v59 = vmax.f32 %v2493_v38, 0.0  ;;  %v3860_v60 = vor.u32 %v4027_v55, %v3859_v56  ;;  %v2407_v16 = vadd.f32 %v5158_v48, %v2406_v7 }
 0x320   : > { %2425 = vmatmul.bf16.gmra.mxu0 %v3860_v60  ;;  %v2562_v62 = vpack.c.bf16 %v2541_v59, %v2540_v58 }
 0x322   : > { %2694 = vmatmul.bf16.gmra.mxu2 %v2562_v62  ;;  %v1723_v63 = vpop.permute.xlu1 %1722 }
 0x323   : > { %v1721_v2 = vpop.permute.xlu0 %1720  ;;  %1788 = vst.msk [vmem:[#allocation2 + $0xfc] sm:$0xf] %vm1756_vm12, %v1723_v63 }
 0x324   : > { %1787 = vst.msk [vmem:[#allocation2 + $0xf4] sm:$0xf] %vm1756_vm12, %v1721_v2 }
 0x325   : > { %2765 = vxpose.xlu1.b32.cont [9/16] %v2733_v1, 128  ;;  %1980 = vst.msk [vmem:[#allocation2 + $0xf4] sm:$0xf] %vm1949_vm13, %v1914_v0  ;;  %v2408_v15 = vpop.f32.mrf.mxu0  ;;  %v2675_v17 = vpop.f32.mrf.mxu2 }
 0x326   : > { %v2409_v18 = vadd.f32 %v5158_v48, %v2408_v15  ;;  %v2676_v26 = vadd.f32 %v5185_v22, %v2675_v17 }
 0x328   : > { %v2737_v29 = vmax.f32 %v2676_v26, 0.0 }
 0x32b   : > { %v1916_v6 = vpop.permute.xlu0 %1915 }
 0x32c   : > { %1981 = vst.msk [vmem:[#allocation2 + $0xfc] sm:$0xf] %vm1949_vm13, %v1916_v6  ;;  %v4026_v10 = vld [vmem:[#allocation2 + $0xf4] sm:$0xf] }
 0x32d   : > { %2766 = vxpose.xlu1.b32.cont [10/16] %v2734_v5, 128  ;;  %v2677_v28 = vpop.f32.mrf.mxu2 }
 0x32e   : > { %v2678_v30 = vadd.f32 %v5185_v22, %v2677_v28 }
 0x330   : > { %v2738_v32 = vmax.f32 %v2678_v30, 0.0 }
 0x333   : > { %v2495_v12 = vpop.f32.mrf.mxu1  ;;  %v3861_v13 = vld [vmem:[#allocation2 + $0xf8] sm:$0xf0] }
 0x334   : > { %v3864_v14 = vor.u32 %v4026_v10, %v3861_v13  ;;  %v2496_v19 = vadd.f32 %v2495_v12, %v2407_v16 }
 0x335   : > { %2767 = vxpose.xlu1.b32.cont [11/16] %v2735_v11, 128 }
 0x336   : > { %3940 = vmatmul.msk.bf16.gmra.mxu1 %vm2286_vm14, %v3864_v14  ;;  %v2542_v24 = vmax.f32 %v2496_v19, 0.0  ;;  %vm3041_vm14 = vcmask 269312  }
 0x33b   : > { %v2497_v21 = vpop.f32.mrf.mxu1 }
 0x33c   : > { %v2498_v23 = vadd.f32 %v2497_v21, %v2409_v18 }
 0x33d   : > { %2768 = vxpose.xlu1.b32.cont [12/16] %v2736_v20, 128  ;;  %v2411_v33 = vpop.f32.mrf.mxu0 }
 0x33e   : > { %v2543_v25 = vmax.f32 %v2498_v23, 0.0  ;;  %v2412_v42 = vadd.f32 %v5158_v48, %v2411_v33 }
 0x340   : > { %v2563_v27 = vpack.c.bf16 %v2543_v25, %v2542_v24 }
 0x342   : > { %2699 = vmatmul.bf16.gmra.mxu2 %v2563_v27 }
 0x345   : > { %2769 = vxpose.xlu1.b32.cont [13/16] %v2737_v29, 128  ;;  %v2680_v31 = vpop.f32.mrf.mxu2  ;;  %v2413_v40 = vpop.f32.mrf.mxu0 }
 0x346   : > { %v2681_v34 = vadd.f32 %v5185_v22, %v2680_v31  ;;  %v2414_v43 = vadd.f32 %v5158_v48, %v2413_v40 }
 0x348   : > { %v2739_v35 = vmax.f32 %v2681_v34, 0.0 }
 0x34d   : > { %2770 = vxpose.xlu1.b32.cont [14/16] %v2738_v32, 128  ;;  %v2682_v39 = vpop.f32.mrf.mxu2 }
 0x34e   : > { %v2683_v41 = vadd.f32 %v5185_v22, %v2682_v39 }
 0x350   : > { %v2740_v45 = vmax.f32 %v2683_v41, 0.0 }
 0x353   : > { %v2500_v37 = vpop.f32.mrf.mxu1 }
 0x354   : > { %v2501_v44 = vadd.f32 %v2500_v37, %v2412_v42 }
 0x355   : > { %2771 = vxpose.xlu1.b32.cont [15/16] %v2739_v35, 128 }
 0x356   : > { %v2544_v49 = vmax.f32 %v2501_v44, 0.0 }
 0x35b   : > { %v2502_v46 = vpop.f32.mrf.mxu1 }
 0x35c   : > { %v2503_v47 = vadd.f32 %v2502_v46, %v2414_v43 }
 0x35d   : > { %2772 = vxpose.xlu1.b32.end [16/16] %v2740_v45, 128  ;;  %v2416_v55 = vpop.f32.mrf.mxu0 }
 0x35e   : > { %v2545_v50 = vmax.f32 %v2503_v47, 0.0  ;;  %v2417_v60 = vadd.f32 %v5158_v48, %v2416_v55 }
 0x360   : > { %v2564_v51 = vpack.c.bf16 %v2545_v50, %v2544_v49 }
 0x362   : > { %2704 = vmatmul.bf16.gmra.mxu2 %v2564_v51 }
 0x365   : > { %v2685_v52 = vpop.f32.mrf.mxu2  ;;  %v2418_v59 = vpop.f32.mrf.mxu0 }
 0x366   : > { %v2686_v53 = vadd.f32 %v5185_v22, %v2685_v52  ;;  %v2419_v61 = vadd.f32 %v5158_v48, %v2418_v59 }
 0x368   : > { %v2741_v54 = vmax.f32 %v2686_v53, 0.0 }
 0x36a   : > { %2789 = vxpose.xlu2.b32.start [1/16] %v2741_v54, 128 }
 0x36d   : > { %v2687_v38 = vpop.f32.mrf.mxu2 }
 0x36e   : > { %v2688_v56 = vadd.f32 %v5185_v22, %v2687_v38 }
 0x370   : > { %v2742_v57 = vmax.f32 %v2688_v56, 0.0 }
 0x372   : > { %2790 = vxpose.xlu2.b32.cont [2/16] %v2742_v57, 128 }
 0x373   : > { %v2505_v58 = vpop.f32.mrf.mxu1 }
 0x374   : > { %v2506_v62 = vadd.f32 %v2505_v58, %v2417_v60 }
 0x376   : > { %v2546_v1 = vmax.f32 %v2506_v62, 0.0 }
 0x37b   : > { %v2507_v63 = vpop.f32.mrf.mxu1 }
 0x37c   : > { %v2508_v0 = vadd.f32 %v2507_v63, %v2419_v61 }
 0x37d   : > { %v2421_v8 = vpop.f32.mrf.mxu0 }
 0x37e   : > { %v2547_v2 = vmax.f32 %v2508_v0, 0.0  ;;  %v2422_v15 = vadd.f32 %v5158_v48, %v2421_v8 }
 0x380   : > { %v2565_v3 = vpack.c.bf16 %v2547_v2, %v2546_v1 }
 0x382   : > { %2709 = vmatmul.bf16.gmra.mxu2 %v2565_v3 }
 0x385   : > { %v2690_v4 = vpop.f32.mrf.mxu2  ;;  %v2423_v36 = vpop.f32.mrf.mxu0 }
 0x386   : > { %v2691_v5 = vadd.f32 %v5185_v22, %v2690_v4  ;;  %v2424_v17 = vadd.f32 %v5158_v48, %v2423_v36 }
 0x388   : > { %v2743_v6 = vmax.f32 %v2691_v5, 0.0 }
 0x389   : > { %v5258_v7 = vpop.trf.xlu1 }
 0x38a   : > { %2791 = vxpose.xlu2.b32.cont [3/16] %v2743_v6, 128 }
 0x38d   : > { %v2692_v9 = vpop.f32.mrf.mxu2 }
 0x38e   : > { %v2693_v10 = vadd.f32 %v5185_v22, %v2692_v9 }
 0x390   : > { %v2744_v11 = vmax.f32 %v2693_v10, 0.0 }
 0x391   : > { %v5261_v12 = vpop.trf.xlu1 }
 0x392   : > { %2792 = vxpose.xlu2.b32.cont [4/16] %v2744_v11, 128  ;;  %v2821_v13 = vpack.c.bf16 %v5261_v12, %v5258_v7 }
 0x393   : > { %v2510_v14 = vpop.f32.mrf.mxu1 }
 0x394   : > { %v2511_v18 = vadd.f32 %v2510_v14, %v2422_v15 }
 0x396   : > { %v2548_v21 = vmax.f32 %v2511_v18, 0.0 }
 0x399   : > { %v5266_v16 = vpop.trf.xlu1 }
 0x39b   : > { %v2512_v19 = vpop.f32.mrf.mxu1 }
 0x39c   : > { %v2513_v20 = vadd.f32 %v2512_v19, %v2424_v17 }
 0x39d   : > { %v2426_v31 = vpop.f32.mrf.mxu0 }
 0x39e   : > { %v2549_v23 = vmax.f32 %v2513_v20, 0.0  ;;  %v2427_v41 = vadd.f32 %v5158_v48, %v2426_v31  ;;  %v5292_v20 = vld [vmem:[%s5830_s5] sm:$0xff]  ;;  %v4120_v31 = vmov 0.0  }
 0x39f   : > { %2946 = vst.msk [vmem:[#allocation3] sm:$0xff] %vm2945_vm15, %v4120_v31 }
 0x3a0   : > { %v2566_v24 = vpack.c.bf16 %v2549_v23, %v2548_v21  ;;  %2947 = vst.msk [vmem:[#allocation3 + $0x20] sm:$0xff] %vm2945_vm15, %v4120_v31 }
 0x3a1   : > { %v5269_v25 = vpop.trf.xlu1  ;;  %2948 = vst.msk [vmem:[#allocation3 + $0x40] sm:$0xff] %vm2945_vm15, %v4120_v31 }
 0x3a2   : > { %2714 = vmatmul.bf16.gmra.mxu2 %v2566_v24  ;;  %v2823_v26 = vpack.c.bf16 %v5269_v25, %v5266_v16  ;;  %2949 = vst.msk [vmem:[#allocation3 + $0x60] sm:$0xff] %vm2945_vm15, %v4120_v31 }
 0x3a3   : > { %2950 = vst.msk [vmem:[#allocation3 + $0x80] sm:$0xff] %vm2945_vm15, %v4120_v31 }
 0x3a4   : > { %2962 = vst.msk [vmem:[#allocation3 + $0x98] sm:$0xff] %vm2957_vm0, %v4120_v31 }
 0x3a5   : > { %v2695_v27 = vpop.f32.mrf.mxu2  ;;  %v2428_v40 = vpop.f32.mrf.mxu0  ;;  %2963 = vst.msk [vmem:[#allocation3 + $0xb8] sm:$0xff] %vm2957_vm0, %v4120_v31 }
 0x3a6   : > { %v2696_v28 = vadd.f32 %v5185_v22, %v2695_v27  ;;  %v2429_v43 = vadd.f32 %v5158_v48, %v2428_v40  ;;  %2964 = vst.msk [vmem:[#allocation3 + $0xd8] sm:$0xff] %vm2957_vm0, %v4120_v31 }
 0x3a7   : > { %2965 = vst.msk [vmem:[#allocation3 + $0xf8] sm:$0xff] %vm2957_vm0, %v4120_v31 }
 0x3a8   : > { %v2745_v29 = vmax.f32 %v2696_v28, 0.0  ;;  %2966 = vst.msk [vmem:[#allocation3 + $0x118] sm:$0xff] %vm2957_vm0, %v4120_v31 }
 0x3a9   : > { %v5274_v30 = vpop.trf.xlu1 }
 0x3aa   : > { %2793 = vxpose.xlu2.b32.cont [5/16] %v2745_v29, 128 }
 0x3ad   : > { %v2697_v32 = vpop.f32.mrf.mxu2 }
 0x3ae   : > { %v2698_v33 = vadd.f32 %v5185_v22, %v2697_v32  ;;  %v2990_v32 = vld [vmem:[#allocation3] sm:$0x7] }
 0x3af   : > { %3004 = vrot.lane.b32.xlu0 %v2990_v32, %s4116_s16 }
 0x3b0   : > { %v2746_v34 = vmax.f32 %v2698_v33, 0.0  ;;  %v3018_v33 = vld [vmem:[#allocation3] sm:$0x38] }
 0x3b1   : > { %v2778_v35 = vpop.trf.xlu1 }
 0x3b2   : > { %2794 = vxpose.xlu2.b32.cont [6/16] %v2746_v34, 128  ;;  %v2825_v37 = vpack.c.bf16 %v2778_v35, %v5274_v30  ;;  %v3032_v34 = vrot.slane %v3018_v33, 3  ;;  %v3053_v35 = vld [vmem:[#allocation3 + $0x20] sm:$0x1] }
 0x3b3   : > { %v2515_v39 = vpop.f32.mrf.mxu1  ;;  %v3063_v40 = vrot.slane %v3053_v35, 6 }
 0x3b4   : > { %v2516_v44 = vadd.f32 %v2515_v39, %v2427_v41 }
 0x3b6   : > { %v2550_v47 = vmax.f32 %v2516_v44, 0.0 }
 0x3b7   : > { %3035 = vrot.lane.b32.xlu0 %v3032_v34, %s4121_s19  ;;  %v3251_v34 = vld [vmem:[#allocation3 + $0x60] sm:$0x38] }
 0x3b9   : > { %v2779_v42 = vpop.trf.xlu1 }
 0x3bb   : > { %v2517_v45 = vpop.f32.mrf.mxu1 }
 0x3bc   : > { %v2518_v46 = vadd.f32 %v2517_v45, %v2429_v43  ;;  %v3116_v45 = vld [vmem:[#allocation3 + $0x20] sm:$0x70] }
 0x3be   : > { %v2551_v49 = vmax.f32 %v2518_v46, 0.0  ;;  %v3130_v46 = vrot.slane %v3116_v45, 4 }
 0x3c0   : > { %v2567_v50 = vpack.c.bf16 %v2551_v49, %v2550_v47 }
 0x3c1   : > { %v2780_v51 = vpop.trf.xlu1 }
 0x3c2   : > { %2719 = vmatmul.bf16.gmra.mxu2 %v2567_v50  ;;  %v2827_v52 = vpack.c.bf16 %v2780_v51, %v2779_v42  ;;  %v3084_v42 = vld [vmem:[#allocation3 + $0x20] sm:$0xe]  ;;  %v3148_v50 = vld [vmem:[#allocation3 + $0x20] sm:$0x80] }
 0x3c3   : > { %v3098_v43 = vrot.slane %v3084_v42, 1  ;;  %v3151_v51 = vld [vmem:[#allocation3 + $0x40] sm:$0x3]  ;;  %v3275_v42 = vld [vmem:[#allocation3 + $0x60] sm:$0xc0] }
 0x3c5   : > { %v2700_v53 = vpop.f32.mrf.mxu2 }
 0x3c6   : > { %v2701_v54 = vadd.f32 %v5185_v22, %v2700_v53  ;;  %v3161_v53 = vrot.slane %v3151_v51, 7 }
 0x3c8   : > { %v2747_v55 = vmax.f32 %v2701_v54, 0.0 }
 0x3c9   : > { %v2781_v38 = vpop.trf.xlu1 }
 0x3ca   : > { %2795 = vxpose.xlu2.b32.cont [7/16] %v2747_v55, 128 }
 0x3cd   : > { %v2702_v56 = vpop.f32.mrf.mxu2 }
 0x3ce   : > { %v2703_v57 = vadd.f32 %v5185_v22, %v2702_v56 }
 0x3d0   : > { %v2748_v58 = vmax.f32 %v2703_v57, 0.0 }
 0x3d1   : > { %v2782_v48 = vpop.trf.xlu1 }
 0x3d2   : > { %2796 = vxpose.xlu2.b32.cont [8/16] %v2748_v58, 128  ;;  %v2829_v17 = vpack.c.bf16 %v2782_v48, %v2781_v38  ;;  %v3184_v38 = vld [vmem:[#allocation3 + $0x40] sm:$0x1c] }
 0x3d3   : > { %v3190_v56 = vrot.slane %v3184_v38, 2 }
 0x3d9   : > { %v2783_v59 = vpop.trf.xlu1 }
 0x3e1   : > { %v2784_v60 = vpop.trf.xlu1 }
 0x3e2   : > { %v2831_v14 = vpack.c.bf16 %v2784_v60, %v2783_v59 }
 0x3e5   : > { %v2705_v61 = vpop.f32.mrf.mxu2 }
 0x3e6   : > { %v2706_v62 = vadd.f32 %v5185_v22, %v2705_v61 }
 0x3e8   : > { %v2749_v63 = vmax.f32 %v2706_v62, 0.0 }
 0x3e9   : > { %v2785_v0 = vpop.trf.xlu1 }
 0x3ea   : > { %2797 = vxpose.xlu2.b32.cont [9/16] %v2749_v63, 128 }
 0x3ed   : > { %v2707_v1 = vpop.f32.mrf.mxu2 }
 0x3ee   : > { %v2708_v2 = vadd.f32 %v5185_v22, %v2707_v1 }
 0x3f0   : > { %v2750_v3 = vmax.f32 %v2708_v2, 0.0 }
 0x3f1   : > { %v2786_v4 = vpop.trf.xlu1 }
 0x3f2   : > { %2798 = vxpose.xlu2.b32.cont [10/16] %v2750_v3, 128  ;;  %v2833_v9 = vpack.c.bf16 %v2786_v4, %v2785_v0 }
 0x3f9   : > { %v2787_v5 = vpop.trf.xlu1 }
 0x401   : > { %v2788_v6 = vpop.trf.xlu1 }
 0x402   : > { %v2835_v8 = vpack.c.bf16 %v2788_v6, %v2787_v5  ;;  %v5359_v6 = vld [vmem:[%s5830_s5 + $0x18] sm:$0xff] }
 0x404   : > { %2877 = vmatpush.bf16.msra.mxu3 %v2835_v8 }
 0x405   : > { %v2710_v10 = vpop.f32.mrf.mxu2 }
 0x406   : > { %v2711_v11 = vadd.f32 %v5185_v22, %v2710_v10 }
 0x408   : > { %v2751_v36 = vmax.f32 %v2711_v11, 0.0  ;;  %2878 = vmatpush.bf16.msra.mxu3 %v2833_v9 }
 0x40a   : > { %2799 = vxpose.xlu2.b32.cont [11/16] %v2751_v36, 128 }
 0x40c   : > { %2879 = vmatpush.bf16.msra.mxu3 %v2831_v14 }
 0x40d   : > { %v2712_v15 = vpop.f32.mrf.mxu2 }
 0x40e   : > { %v2713_v18 = vadd.f32 %v5185_v22, %v2712_v15 }
 0x410   : > { %v2752_v19 = vmax.f32 %v2713_v18, 0.0  ;;  %2880 = vmatpush.bf16.msra.mxu3 %v2829_v17 }
 0x412   : > { %2800 = vxpose.xlu2.b32.cont [12/16] %v2752_v19, 128 }
 0x414   : > { %2881 = vmatpush.bf16.msra.mxu3 %v2827_v52  ;;  %v3160_v52 = vrot.slane %v3148_v50, 7 }
 0x416   : > { %v3162_v54 = vsel %vm2335_vm3, %v3160_v52, %v3161_v53 }
 0x418   : > { %2882 = vmatpush.bf16.msra.mxu3 %v2825_v37  ;;  %v5318_v37 = vld [vmem:[%s5830_s5 + $0x10] sm:$0xff] }
 0x41c   : > { %2883 = vmatpush.bf16.msra.mxu3 %v2823_v26  ;;  %v5303_v26 = vld [vmem:[%s5830_s5 + $0x8] sm:$0xff] }
 0x420   : > { %2884 = vmatpush.bf16.msra.mxu3 %v2821_v13 }
 0x423   : > { %2885 = vmatmul.bf16.vlgmr.msra.gmra.mxu3 %v5292_v20 }
 0x425   : > { %v2715_v21 = vpop.f32.mrf.mxu2 }
 0x426   : > { %v2716_v23 = vadd.f32 %v5185_v22, %v2715_v21 }
 0x428   : > { %v2753_v24 = vmax.f32 %v2716_v23, 0.0 }
 0x42a   : > { %2801 = vxpose.xlu2.b32.cont [13/16] %v2753_v24, 128  ;;  %v3991_v24 = vld [vmem:[%s5830_s5 + $0x20] sm:$0xf] }
 0x42d   : > { %v2717_v27 = vpop.f32.mrf.mxu2 }
 0x42e   : > { %v2718_v16 = vadd.f32 %v5185_v22, %v2717_v27  ;;  %v4055_v27 = vld [vmem:[%s5830_s5 + $0x20] sm:$0x30] }
 0x430   : > { %v2754_v25 = vmax.f32 %v2718_v16, 0.0 }
 0x432   : > { %2802 = vxpose.xlu2.b32.cont [14/16] %v2754_v25, 128  ;;  %v5373_v25 = vor.u32 %v4055_v27, %v3991_v24 }
 0x433   : > { %2890 = vmatmul.bf16.gmra.mxu3 %v5303_v26 }
 0x443   : > { %2895 = vmatmul.bf16.gmra.mxu3 %v5318_v37 }
 0x445   : > { %v2720_v7 = vpop.f32.mrf.mxu2 }
 0x446   : > { %v2721_v12 = vadd.f32 %v5185_v22, %v2720_v7  ;;  %v3208_v7 = vld [vmem:[#allocation3 + $0x40] sm:$0xe0] }
 0x448   : > { %v2755_v13 = vmax.f32 %v2721_v12, 0.0 }
 0x44a   : > { %2803 = vxpose.xlu2.b32.cont [15/16] %v2755_v13, 128  ;;  %v3214_v13 = vrot.slane %v3208_v7, 5  ;;  %v3383_v7 = vld [vmem:[#allocation3 + $0xb8] sm:$0x1c] }
 0x44d   : > { %v2722_v28 = vpop.f32.mrf.mxu2 }
 0x44e   : > { %v2723_v29 = vadd.f32 %v5185_v22, %v2722_v28  ;;  %v3050_v22 = vld [vmem:[#allocation3] sm:$0xc0] }
 0x44f   : > { %v3062_v39 = vrot.slane %v3050_v22, 6 }
 0x450   : > { %v2756_v30 = vmax.f32 %v2723_v29, 0.0  ;;  %v5378_v29 = vpop.permute.xlu0 %3004 }
 0x451   : > { %v3064_v41 = vsel %vm2336_vm4, %v3062_v39, %v3063_v40  ;;  %v3257_v40 = vrot.slane %v3251_v34, 3 }
 0x452   : > { %2804 = vxpose.xlu2.b32.end [16/16] %v2756_v30, 128  ;;  %3071 = vrot.lane.b32.xlu0 %v3064_v41, %s4122_s22  ;;  %v3230_v30 = vld [vmem:[#allocation3 + $0x60] sm:$0x7] }
 0x453   : > { %2900 = vmatmul.bf16.gmra.mxu3 %v5359_v6 }
 0x458   : > { %v5382_v45 = vpop.permute.xlu0 %3035 }
 0x45a   : > { %3101 = vrot.lane.b32.xlu0 %v3098_v43, %s4123_s23  ;;  %v3278_v43 = vld [vmem:[#allocation3 + $0x80] sm:$0x1] }
 0x45b   : > { %v3288_v50 = vrot.slane %v3278_v43, 6  ;;  %v3431_v43 = vld [vmem:[#allocation3 + $0xd8] sm:$0x7] }
 0x462   : > { %3133 = vrot.lane.b32.xlu0 %v3130_v46, %s4124_s24  ;;  %v3287_v46 = vrot.slane %v3275_v42, 6 }
 0x463   : > { %2905 = vmatmul.bf16.gmra.mxu3 %v5373_v25 }
 0x46a   : > { %3169 = vrot.lane.b32.xlu0 %v3162_v54, %s4125_s25  ;;  %v3289_v54 = vsel %vm2336_vm4, %v3287_v46, %v3288_v50 }
 0x472   : > { %3193 = vrot.lane.b32.xlu0 %v3190_v56, %s4126_s26 }
 0x473   : > { %v5324_v44 = vpop.trf.xlu2 }
 0x47b   : > { %v5327_v47 = vpop.trf.xlu2 }
 0x47c   : > { %v2822_v49 = vpack.c.bf16 %v5327_v47, %v5324_v44  ;;  %v3347_v47 = vld [vmem:[#allocation3 + $0x98] sm:$0x80] }
 0x483   : > { %v5333_v55 = vpop.trf.xlu2 }
 0x48b   : > { %v5336_v57 = vpop.trf.xlu2 }
 0x48c   : > { %v2824_v58 = vpack.c.bf16 %v5336_v57, %v5333_v55 }
 0x493   : > { %v5340_v48 = vpop.trf.xlu2 }
 0x49b   : > { %v5342_v59 = vpop.trf.xlu2 }
 0x49c   : > { %v2826_v60 = vpack.c.bf16 %v5342_v59, %v5340_v48 }
 0x4a3   : > { %v5346_v61 = vpop.trf.xlu2 }
 0x4a6   : > { %v2886_v62 = vpop.f32.mrf.mxu3 }
 0x4a7   : > { %2969 = vst [vmem:[#allocation3 + $0x8] sm:$0xff] %v2886_v62  ;;  %v3311_v62 = vld [vmem:[#allocation3 + $0x80] sm:$0xe] }
 0x4ab   : > { %v5348_v63 = vpop.trf.xlu2 }
 0x4ac   : > { %v2828_v0 = vpack.c.bf16 %v5348_v63, %v5346_v61 }
 0x4ae   : > { %v2991_v1 = vld [vmem:[#allocation3 + $0x8] sm:$0x7]  ;;  %v2888_v2 = vpop.f32.mrf.mxu3  ;;  %v3019_v3 = vld [vmem:[#allocation3 + $0x8] sm:$0x38]  ;;  %v3051_v15 = vld [vmem:[#allocation3 + $0x8] sm:$0xc0] }
 0x4af   : > { %3006 = vrot.lane.b32.xlu0 %v2991_v1, %s4116_s16  ;;  %2971 = vst [vmem:[#allocation3 + $0x28] sm:$0xff] %v2888_v2  ;;  %v3033_v5 = vrot.slane %v3019_v3, 3  ;;  %v3065_v18 = vrot.slane %v3051_v15, 6  ;;  %v3317_v1 = vrot.slane %v3311_v62, 1 }
 0x4b3   : > { %v5353_v4 = vpop.trf.xlu2 }
 0x4b6   : > { %v3085_v8 = vld [vmem:[#allocation3 + $0x28] sm:$0xe]  ;;  %v3117_v11 = vld [vmem:[#allocation3 + $0x28] sm:$0x70]  ;;  %v3054_v17 = vld [vmem:[#allocation3 + $0x28] sm:$0x1]  ;;  %v2891_v21 = vpop.f32.mrf.mxu3 }
 0x4b7   : > { %3037 = vrot.lane.b32.xlu0 %v3033_v5, %s4121_s19  ;;  %v3099_v10 = vrot.slane %v3085_v8, 1  ;;  %v3131_v36 = vrot.slane %v3117_v11, 4  ;;  %v3066_v19 = vrot.slane %v3054_v17, 6  ;;  %2973 = vst [vmem:[#allocation3 + $0x48] sm:$0xff] %v2891_v21  ;;  %v3149_v3 = vld [vmem:[#allocation3 + $0x28] sm:$0x80] }
 0x4b8   : > { %v3163_v15 = vrot.slane %v3149_v3, 7 }
 0x4b9   : > { %v3067_v16 = vsel %vm2336_vm4, %v3065_v18, %v3066_v19  ;;  %v4132_v18 = vmov 0   ;;  %v3363_v19 = vrot.slane %v3347_v47, 7 }
 0x4ba   : > { %4099 = vset.pattern.permute.xlu0 %v4132_v18 }
 0x4bb   : > { %v5362_v9 = vpop.trf.xlu2 }
 0x4be   : > { %v2893_v32 = vpop.f32.mrf.mxu3  ;;  %v3185_v33 = vld [vmem:[#allocation3 + $0x48] sm:$0x1c]  ;;  %v3209_v35 = vld [vmem:[#allocation3 + $0x48] sm:$0xe0]  ;;  %v3152_v5 = vld [vmem:[#allocation3 + $0x48] sm:$0x3] }
 0x4bf   : > { %3103 = vrot.lane.b32.xlu0 %v3099_v10, %s4123_s23  ;;  %2975 = vst [vmem:[#allocation3 + $0x68] sm:$0xff] %v2893_v32  ;;  %v3191_v22 = vrot.slane %v3185_v33, 2  ;;  %v3215_v41 = vrot.slane %v3209_v35, 5  ;;  %v2830_v10 = vpack.c.bf16 %v5362_v9, %v5353_v4  ;;  %v3164_v17 = vrot.slane %v3152_v5, 7  ;;  %v3407_v32 = vld [vmem:[#allocation3 + $0xb8] sm:$0xe0] }
 0x4c0   : > { %v3413_v33 = vrot.slane %v3407_v32, 5 }
 0x4c1   : > { %3195 = vrot.lane.b32.xlu2 %v3191_v22, %s4126_s26  ;;  %3219 = vrot.lane.b32.xlu1 %v3215_v41, %s4127_s15 }
 0x4c3   : > { %v2815_v14 = vpop.trf.xlu2 }
 0x4c4   : > { %v5388_v38 = vpop.permute.xlu0 %3071 }
 0x4c6   : > { %v2896_v51 = vpop.f32.mrf.mxu3  ;;  %v3231_v61 = vld [vmem:[#allocation3 + $0x68] sm:$0x7]  ;;  %v3252_v48 = vld [vmem:[#allocation3 + $0x68] sm:$0x38]  ;;  %v3276_v63 = vld [vmem:[#allocation3 + $0x68] sm:$0xc0] }
 0x4c7   : > { %3135 = vrot.lane.b32.xlu0 %v3131_v36, %s4124_s24  ;;  %2977 = vst [vmem:[#allocation3 + $0x88] sm:$0xff] %v2896_v51  ;;  %v3258_v59 = vrot.slane %v3252_v48, 3  ;;  %v3290_v55 = vrot.slane %v3276_v63, 6  ;;  %v3510_v48 = vld [vmem:[#allocation3 + $0xf8] sm:$0xe] }
 0x4c8   : > { %v3516_v63 = vrot.slane %v3510_v48, 1 }
 0x4cb   : > { %v2816_v23 = vpop.trf.xlu2 }
 0x4cc   : > { %v2832_v2 = vpack.c.bf16 %v2816_v23, %v2815_v14  ;;  %v5393_v36 = vpop.permute.xlu0 %3101  ;;  %v3165_v14 = vsel %vm2335_vm3, %v3163_v15, %v3164_v17 }
 0x4ce   : > { %v3312_v8 = vld [vmem:[#allocation3 + $0x88] sm:$0xe]  ;;  %v2898_v44 = vpop.f32.mrf.mxu3 }
 0x4cf   : > { %3073 = vrot.lane.b32.xlu0 %v3067_v16, %s4122_s22  ;;  %v3318_v11 = vrot.slane %v3312_v8, 1  ;;  %2979 = vst [vmem:[#allocation3 + $0xa8] sm:$0xff] %v2898_v44 }
 0x4d1   : > { %3322 = vrot.lane.b32.xlu1 %v3318_v11, %s4131_s12 }
 0x4d3   : > { %v2817_v12 = vpop.trf.xlu2 }
 0x4d4   : > { %v5407_v4 = vpop.permute.xlu0 %3133 }
 0x4d6   : > { %v3381_v24 = vld [vmem:[#allocation3 + $0xa8] sm:$0x1c]  ;;  %v3348_v22 = vld [vmem:[#allocation3 + $0xa8] sm:$0x3]  ;;  %v2901_v46 = vpop.f32.mrf.mxu3 }
 0x4d7   : > { %3217 = vrot.lane.b32.xlu0 %v3214_v13, %s4127_s15  ;;  %v3387_v27 = vrot.slane %v3381_v24, 2  ;;  %v3405_v13 = vld [vmem:[#allocation3 + $0xa8] sm:$0xe0]  ;;  %2981 = vst [vmem:[#allocation3 + $0xc8] sm:$0xff] %v2901_v46 }
 0x4db   : > { %v2818_v28 = vpop.trf.xlu2 }
 0x4dc   : > { %v2834_v56 = vpack.c.bf16 %v2818_v28, %v2817_v12  ;;  %v5442_v12 = vld [vmem:[%s5832_s7] sm:$0x3]  ;;  %v3411_v28 = vrot.slane %v3405_v13, 5 }
 0x4dd   : > { %vm3021_vm1 = vcmp.ge.s32.totalorder %v5442_v12, 1  ;;  %vm3022_vm2 = vcmp.lt.s32.totalorder %v5442_v12, 17  ;;  %vm2993_vm8 = vcmp.ge.s32.totalorder %v5442_v12, 2  ;;  %vm2994_vm9 = vcmp.lt.s32.totalorder %v5442_v12, 18 }
 0x4de   : > { %vm3023_vm5 = vmand %vm3021_vm1, %vm3022_vm2  ;;  %v2903_v5 = vpop.f32.mrf.mxu3  ;;  %v3450_v11 = vld [vmem:[#allocation3 + $0xc8] sm:$0x38]  ;;  %vm3087_vm11 = vcmp.ge.s32.totalorder %v5442_v12, 4294967295  ;;  %vm3088_vm12 = vcmp.lt.s32.totalorder %v5442_v12, 15  ;;  %vm3119_vm15 = vcmp.ge.s32.totalorder %v5442_v12, 4294967294  ;;  %vm3120_vm1 = vcmp.lt.s32.totalorder %v5442_v12, 14 }
 0x4df   : > { %3236 = vrot.lane.b32.xlu0 %v3230_v30, %s4128_s17  ;;  %v5452_v34 = vsel %vm3023_vm5, 1, %v4132_v18  ;;  %2983 = vst [vmem:[#allocation3 + $0xe8] sm:$0xff] %v2903_v5  ;;  %v3456_v15 = vrot.slane %v3450_v11, 3  ;;  %vm2995_vm10 = vmand %vm2993_vm8, %vm2994_vm9  ;;  %vm3077_vm8 = vcmask 261120   ;;  %vm3107_vm9 = vcmask 252928  }
 0x4e0   : > { %vm3089_vm13 = vmand %vm3087_vm11, %vm3088_vm12  ;;  %vm3139_vm11 = vcmask 244736  }
 0x4e1   : > { %vm3121_vm5 = vmand %vm3119_vm15, %vm3120_vm1  ;;  %vm3175_vm15 = vcmask 146432   ;;  %vm5835_vm1 = vcmask 130048  }
 0x4e3   : > { %v2819_v39 = vpop.trf.xlu2 }
 0x4e7   : > { %3260 = vrot.lane.b32.xlu0 %v3257_v40, %s4129_s18  ;;  %v3025_v40 = vperm.slane %v5452_v34, 0 }
 0x4e9   : > { %vm5462_vm7 = vcmp.eq.s32.totalorder %v3025_v40, 1 }
 0x4eb   : > { %v2820_v52 = vpop.trf.xlu2 }
 0x4ec   : > { %v2836_v53 = vpack.c.bf16 %v2820_v52, %v2819_v39  ;;  %v3358_v39 = vrot.slane %v3348_v22, 7 }
 0x4ee   : > { %2911 = vmatpush.bf16.msrb.mxu3 %v2836_v53 }
 0x4ef   : > { %3296 = vrot.lane.b32.xlu0 %v3289_v54, %s4130_s11 }
 0x4f2   : > { %2912 = vmatpush.bf16.msrb.mxu3 %v2834_v56  ;;  %v3452_v56 = vld [vmem:[#allocation3 + $0xd8] sm:$0x38] }
 0x4f3   : > { %v3458_v62 = vrot.slane %v3452_v56, 3 }
 0x4f6   : > { %2913 = vmatpush.bf16.msrb.mxu3 %v2832_v2  ;;  %v3477_v2 = vld [vmem:[#allocation3 + $0xf8] sm:$0x1] }
 0x4f7   : > { %3320 = vrot.lane.b32.xlu0 %v3317_v1, %s4131_s12  ;;  %v3429_v1 = vld [vmem:[#allocation3 + $0xc8] sm:$0x7] }
 0x4fa   : > { %2914 = vmatpush.bf16.msrb.mxu3 %v2830_v10  ;;  %v3491_v10 = vrot.slane %v3477_v2, 6 }
 0x4fe   : > { %2915 = vmatpush.bf16.msrb.mxu3 %v2828_v0  ;;  %v3279_v0 = vld [vmem:[#allocation3 + $0x88] sm:$0x1] }
 0x4ff   : > { %3171 = vrot.lane.b32.xlu0 %v3165_v14, %s4125_s25  ;;  %v3291_v57 = vrot.slane %v3279_v0, 6 }
 0x502   : > { %2916 = vmatpush.bf16.msrb.mxu3 %v2826_v60  ;;  %v5425_v60 = vpop.permute.xlu0 %3169 }
 0x506   : > { %2917 = vmatpush.bf16.msrb.mxu3 %v2824_v58  ;;  %v3292_v58 = vsel %vm2336_vm4, %v3290_v55, %v3291_v57  ;;  %v3472_v55 = vld [vmem:[#allocation3 + $0xc8] sm:$0xc0]  ;;  %v3475_v57 = vld [vmem:[#allocation3 + $0xe8] sm:$0x1] }
 0x507   : > { %3238 = vrot.lane.b32.xlu0 %v3231_v61, %s4128_s17  ;;  %v2906_v61 = vpop.f32.mrf.mxu3  ;;  %v3485_v44 = vrot.slane %v3475_v57, 6 }
 0x508   : > { %2985 = vst [vmem:[#allocation3 + $0x108] sm:$0xff] %v2906_v61 }
 0x50a   : > { %2918 = vmatpush.bf16.msrb.mxu3 %v2822_v49  ;;  %v3194_v9 = vpop.permute.xlu0 %3193  ;;  %v3350_v49 = vld [vmem:[#allocation3 + $0xb8] sm:$0x3] }
 0x50b   : > { %v3364_v21 = vrot.slane %v3350_v49, 7  ;;  %v5493_v49 = vsel %vm2995_vm10, 1, %v4132_v18 }
 0x50d   : > { %2919 = vmatmul.bf16.vlgmr.msrb.gmra.mxu3 %v5292_v20  ;;  %v3365_v23 = vsel %vm2335_vm3, %v3363_v19, %v3364_v21  ;;  %v2997_v21 = vperm.slane %v5493_v49, 0 }
 0x50e   : > { %3370 = vrot.lane.b32.xlu2 %v3365_v23, %s4133_s20  ;;  %v5504_v23 = vsel %vm3089_vm13, 1, %v4132_v18  ;;  %vm5834_vm13 = vcmask 7168  }
 0x50f   : > { %3262 = vrot.lane.b32.xlu0 %v3258_v59, %s4129_s18  ;;  %v3508_v59 = vld [vmem:[#allocation3 + $0xe8] sm:$0xe]  ;;  %vm5506_vm2 = vcmp.eq.s32.totalorder %v2997_v21, 1  ;;  %v3091_v12 = vperm.slane %v5504_v23, 0 }
 0x510   : > { %v3514_v0 = vrot.slane %v3508_v59, 1 }
 0x511   : > { %vm5529_vm10 = vcmp.eq.s32.totalorder %v3091_v12, 1 }
 0x517   : > { %3298 = vrot.lane.b32.xlu0 %v3292_v58, %s4130_s11  ;;  %v3532_v58 = vld [vmem:[#allocation3 + $0xe8] sm:$0x70] }
 0x518   : > { %v3538_v47 = vrot.slane %v3532_v58, 4 }
 0x51b   : > { %v5459_v50 = vpop.permute.xlu2 %3195 }
 0x51c   : > { %v5469_v52 = vsel %vm3199_vm6, %v3194_v9, %v5459_v50  ;;  %v3484_v9 = vrot.slane %v3472_v55, 6 }
 0x51d   : > { %2924 = vmatmul.bf16.gmra.mxu3 %v5303_v26  ;;  %v3389_v26 = vrot.slane %v3383_v7, 2  ;;  %v3204_v53 = vsel %vm5462_vm7, %v5469_v52, 0.0 }
 0x51e   : > { %v3486_v19 = vsel %vm2336_vm4, %v3484_v9, %v3485_v44  ;;  %v3558_v44 = vld [vmem:[#allocation3 + $0xf8] sm:$0x80] }
 0x51f   : > { %3390 = vrot.lane.b32.xlu0 %v3387_v27, %s4134_s21  ;;  %3394 = vrot.lane.b32.xlu2 %v3389_v26, %s4134_s21  ;;  %v2908_v27 = vpop.f32.mrf.mxu3 }
 0x520   : > { %2987 = vst [vmem:[#allocation3 + $0x128] sm:$0x7] %v2908_v27 }
 0x521   : > { %v5431_v20 = vpop.permute.xlu0 %3006 }
 0x522   : > { %v3010_v26 = vsel %vm2957_vm0, %v5378_v29, %v5431_v20  ;;  %v5524_v29 = vsel %vm3121_vm5, 1, %v4132_v18  ;;  %vm3242_vm5 = vcmask 121856  }
 0x523   : > { %v3014_v32 = vsel %vm5506_vm2, %v3010_v26, 0.0 }
 0x527   : > { %3414 = vrot.lane.b32.xlu0 %v3411_v28, %s4135_s9  ;;  %3418 = vrot.lane.b32.xlu2 %v3413_v33, %s4135_s9 }
 0x529   : > { %v5435_v16 = vpop.permute.xlu0 %3037 }
 0x52a   : > { %v3042_v13 = vsel %vm3041_vm14, %v5382_v45, %v5435_v16 }
 0x52b   : > { %v3046_v33 = vsel %vm5462_vm7, %v3042_v13, 0.0  ;;  %v3594_v13 = vld [vmem:[#allocation3 + $0x118] sm:$0x1c] }
 0x52c   : > { %v3600_v12 = vrot.slane %v3594_v13, 2 }
 0x52d   : > { %2929 = vmatmul.bf16.gmra.mxu3 %v5318_v37  ;;  %v3345_v37 = vld [vmem:[#allocation3 + $0x88] sm:$0x80] }
 0x52e   : > { %v3357_v35 = vrot.slane %v3345_v37, 7  ;;  %v3048_v37 = vadd.f32 %v3046_v33, %v3014_v32 }
 0x52f   : > { %3439 = vrot.lane.b32.xlu2 %v3431_v43, %s4136_s13 }
 0x530   : > { %v3359_v42 = vsel %vm2335_vm3, %v3357_v35, %v3358_v39  ;;  %v3123_v39 = vperm.slane %v5524_v29, 0 }
 0x531   : > { %v5447_v30 = vpop.permute.xlu0 %3103  ;;  %3366 = vrot.lane.b32.xlu0 %v3359_v42, %s4133_s20 }
 0x532   : > { %v3108_v35 = vsel %vm3107_vm9, %v5393_v36, %v5447_v30  ;;  %vm5539_vm12 = vcmp.eq.s32.totalorder %v3123_v39, 1 }
 0x533   : > { %v5517_v28 = vpop.permute.xlu1 %3219  ;;  %v3112_v18 = vsel %vm5529_vm10, %v3108_v35, 0.0 }
 0x537   : > { %3463 = vrot.lane.b32.xlu2 %v3458_v62, %s4137_s14 }
 0x539   : > { %v5455_v41 = vpop.permute.xlu0 %3135  ;;  %3435 = vrot.lane.b32.xlu0 %v3429_v1, %s4136_s13 }
 0x53d   : > { %2934 = vmatmul.bf16.gmra.mxu3 %v5359_v6  ;;  %v3474_v6 = vld [vmem:[#allocation3 + $0xd8] sm:$0xc0] }
 0x53e   : > { %v3490_v8 = vrot.slane %v3474_v6, 6 }
 0x540   : > { %v3492_v17 = vsel %vm2336_vm4, %v3490_v8, %v3491_v10 }
 0x541   : > { %v5474_v54 = vpop.permute.xlu0 %3073  ;;  %3497 = vrot.lane.b32.xlu2 %v3492_v17, %s5836_s10  ;;  %3459 = vrot.lane.b32.xlu0 %v3456_v15, %s4137_s14 }
 0x542   : > { %v3078_v45 = vsel %vm3077_vm8, %v5388_v38, %v5474_v54  ;;  %v3140_v38 = vsel %vm3139_vm11, %v5407_v4, %v5455_v41 }
 0x543   : > { %v3082_v42 = vadd.f32 %v3078_v45, %v3048_v37  ;;  %v5546_v46 = vpop.permute.xlu1 %3322  ;;  %v3144_v1 = vsel %vm5539_vm12, %v3140_v38, 0.0 }
 0x545   : > { %v3114_v56 = vadd.f32 %v3112_v18, %v3082_v42 }
 0x547   : > { %v3146_v2 = vadd.f32 %v3144_v1, %v3114_v56 }
 0x549   : > { %v5478_v3 = vpop.permute.xlu0 %3217  ;;  %3521 = vrot.lane.b32.xlu2 %v3516_v63, %s4139_s29  ;;  %3517 = vrot.lane.b32.xlu0 %v3514_v0, %s4139_s29  ;;  %v3534_v0 = vld [vmem:[#allocation3 + $0xf8] sm:$0x70] }
 0x54a   : > { %v3224_v10 = vsel %vm5835_vm1, %v5478_v3, %v5517_v28  ;;  %vm5838_vm1 = vcmask 15360   ;;  %v3540_v55 = vrot.slane %v3534_v0, 4 }
 0x54c   : > { %3545 = vrot.lane.b32.xlu1 %v3540_v55, %s5837_s30  ;;  %v3614_v55 = vld [vmem:[#allocation3 + $0x108] sm:$0xe0] }
 0x54d   : > { %2939 = vmatmul.bf16.gmra.mxu3 %v5373_v25 }
 0x551   : > { %v5484_v14 = vpop.permute.xlu0 %3236  ;;  %3541 = vrot.lane.b32.xlu2 %v3538_v47, %s5837_s30  ;;  %3493 = vrot.lane.b32.xlu0 %v3486_v19, %s5836_s10  ;;  %v3561_v47 = vld [vmem:[#allocation3 + $0x118] sm:$0x3]  ;;  %v3574_v19 = vrot.slane %v3558_v44, 7  ;;  %s4141_s10 = smov 97   ;;  %s4142_s30 = smov 96   ;;  %v3620_v44 = vrot.slane %v3614_v55, 5 }
 0x552   : > { %v3575_v21 = vrot.slane %v3561_v47, 7 }
 0x554   : > { %v3576_v27 = vsel %vm2335_vm3, %v3574_v19, %v3575_v21 }
 0x555   : > { %3581 = vrot.lane.b32.xlu1 %v3576_v27, %s4141_s10 }
 0x559   : > { %v5490_v25 = vpop.permute.xlu0 %3260 }
 0x55d   : > { %3605 = vrot.lane.b32.xlu1 %v3600_v12, %s4142_s30 }
 0x561   : > { %v3297_v24 = vpop.permute.xlu0 %3296 }
 0x569   : > { %v3321_v40 = vpop.permute.xlu0 %3320 }
 0x56a   : > { %v3327_v36 = vsel %vm5834_vm13, %v3321_v40, %v5546_v46  ;;  %vm3266_vm13 = vcmask 113664  }
 0x56b   : > { %v3331_v62 = vsel %vm5462_vm7, %v3327_v36, 0.0 }
 0x571   : > { %v5554_v6 = vpop.permute.xlu0 %3171 }
 0x572   : > { %v3176_v4 = vsel %vm3175_vm15, %v5425_v60, %v5554_v6 }
 0x573   : > { %v3180_v5 = vsel %vm5506_vm2, %v3176_v4, 0.0 }
 0x574   : > { %v3182_v8 = vadd.f32 %v3180_v5, %v3146_v2 }
 0x576   : > { %v3206_v11 = vadd.f32 %v3204_v53, %v3182_v8  ;;  %v3556_v8 = vld [vmem:[#allocation3 + $0xe8] sm:$0x80] }
 0x578   : > { %v3228_v15 = vadd.f32 %v3224_v10, %v3206_v11  ;;  %v3559_v10 = vld [vmem:[#allocation3 + $0x108] sm:$0x3] }
 0x579   : > { %v5568_v17 = vpop.permute.xlu0 %3238 }
 0x57a   : > { %v3243_v60 = vsel %vm3242_vm5, %v5484_v14, %v5568_v17 }
 0x57b   : > { %v3247_v61 = vsel %vm5529_vm10, %v3243_v60, 0.0  ;;  %v3569_v60 = vrot.slane %v3559_v10, 7 }
 0x57c   : > { %v3249_v48 = vadd.f32 %v3247_v61, %v3228_v15  ;;  %v3568_v15 = vrot.slane %v3556_v8, 7 }
 0x581   : > { %v5575_v59 = vpop.permute.xlu0 %3262 }
 0x582   : > { %v3267_v52 = vsel %vm3266_vm13, %v5490_v25, %v5575_v59 }
 0x583   : > { %v3271_v53 = vsel %vm5539_vm12, %v3267_v52, 0.0 }
 0x584   : > { %v3273_v3 = vadd.f32 %v3271_v53, %v3249_v48 }
 0x589   : > { %v5582_v63 = vpop.permute.xlu0 %3298 }
 0x58a   : > { %v3303_v14 = vsel %vm5838_vm1, %v3297_v24, %v5582_v63  ;;  %vm2967_vm1 = vcmask 272384  }
 0x58b   : > { %v3307_v57 = vsel %vm5506_vm2, %v3303_v14, 0.0  ;;  %2968 = vst.msk [vmem:[#allocation3 + $0x138] sm:$0x7] %vm2967_vm1, %v4120_v31  ;;  %v3592_v31 = vld [vmem:[#allocation3 + $0x108] sm:$0x1c]  ;;  %vm3465_vm1 = vcmask 916480  }
 0x58c   : > { %v3309_v58 = vadd.f32 %v3307_v57, %v3273_v3  ;;  %v3570_v3 = vsel %vm2335_vm3, %v3568_v15, %v3569_v60 }
 0x58e   : > { %v5589_v9 = vadd.f32 %v3331_v62, %v3309_v58 }
 0x590   : > { %v2920_v25 = vpop.f32.mrf.mxu3 }
 0x591   : > { %2970 = vst [vmem:[#allocation3 + $0x10] sm:$0xff] %v2920_v25  ;;  %v5606_v19 = vpop.permute.xlu0 %3390 }
 0x598   : > { %v2922_v24 = vpop.f32.mrf.mxu3  ;;  %v2992_v26 = vld [vmem:[#allocation3 + $0x10] sm:$0x7]  ;;  %v3020_v32 = vld [vmem:[#allocation3 + $0x10] sm:$0x38]  ;;  %v3052_v36 = vld [vmem:[#allocation3 + $0x10] sm:$0xc0] }
 0x599   : > { %2972 = vst [vmem:[#allocation3 + $0x30] sm:$0xff] %v2922_v24  ;;  %3008 = vrot.lane.b32.xlu0 %v2992_v26, %s4116_s16  ;;  %v3034_v33 = vrot.slane %v3020_v32, 3  ;;  %v3068_v62 = vrot.slane %v3052_v36, 6  ;;  %s4143_s16 = smov 95  }
 0x5a0   : > { %v2925_v45 = vpop.f32.mrf.mxu3  ;;  %v3086_v37 = vld [vmem:[#allocation3 + $0x30] sm:$0xe]  ;;  %v3118_v40 = vld [vmem:[#allocation3 + $0x30] sm:$0x70]  ;;  %v3055_v38 = vld [vmem:[#allocation3 + $0x30] sm:$0x1] }
 0x5a1   : > { %2974 = vst [vmem:[#allocation3 + $0x50] sm:$0xff] %v2925_v45  ;;  %3039 = vrot.lane.b32.xlu0 %v3034_v33, %s4121_s19  ;;  %v3100_v35 = vrot.slane %v3086_v37, 1  ;;  %v3132_v42 = vrot.slane %v3118_v40, 4  ;;  %v3069_v56 = vrot.slane %v3055_v38, 6  ;;  %v3150_v21 = vld [vmem:[#allocation3 + $0x30] sm:$0x80] }
 0x5a2   : > { %v3166_v13 = vrot.slane %v3150_v21, 7  ;;  %s4144_s19 = smov 94   ;;  %v3598_v21 = vrot.slane %v3592_v31, 2 }
 0x5a3   : > { %v3070_v2 = vsel %vm2336_vm4, %v3068_v62, %v3069_v56 }
 0x5a8   : > { %v2927_v39 = vpop.f32.mrf.mxu3  ;;  %v3186_v11 = vld [vmem:[#allocation3 + $0x50] sm:$0x1c]  ;;  %v3210_v0 = vld [vmem:[#allocation3 + $0x50] sm:$0xe0]  ;;  %v3153_v47 = vld [vmem:[#allocation3 + $0x50] sm:$0x3] }
 0x5a9   : > { %2976 = vst [vmem:[#allocation3 + $0x70] sm:$0xff] %v2927_v39  ;;  %3105 = vrot.lane.b32.xlu0 %v3100_v35, %s4123_s23  ;;  %v3192_v61 = vrot.slane %v3186_v11, 2  ;;  %v3216_v57 = vrot.slane %v3210_v0, 5  ;;  %v3167_v26 = vrot.slane %v3153_v47, 7  ;;  %v5614_v35 = vpop.permute.xlu0 %3414  ;;  %s5850_s23 = smov 98  }
 0x5ab   : > { %v3168_v45 = vsel %vm2335_vm3, %v3166_v13, %v3167_v26  ;;  %v3640_v26 = vld [vmem:[#allocation3 + $0x138] sm:$0x7] }
 0x5b0   : > { %v2930_v18 = vpop.f32.mrf.mxu3  ;;  %v3232_v39 = vld [vmem:[#allocation3 + $0x70] sm:$0x7]  ;;  %v3253_v36 = vld [vmem:[#allocation3 + $0x70] sm:$0x38]  ;;  %v3277_v60 = vld [vmem:[#allocation3 + $0x70] sm:$0xc0] }
 0x5b1   : > { %2978 = vst [vmem:[#allocation3 + $0x90] sm:$0xff] %v2930_v18  ;;  %3137 = vrot.lane.b32.xlu0 %v3132_v42, %s4124_s24  ;;  %v5619_v62 = vpop.permute.xlu0 %3366 }
 0x5b8   : > { %v2932_v1 = vpop.f32.mrf.mxu3  ;;  %v3313_v4 = vld [vmem:[#allocation3 + $0x90] sm:$0xe]  ;;  %v3346_v27 = vld [vmem:[#allocation3 + $0x90] sm:$0x80] }
 0x5b9   : > { %2980 = vst [vmem:[#allocation3 + $0xb0] sm:$0xff] %v2932_v1  ;;  %3075 = vrot.lane.b32.xlu0 %v3070_v2, %s4122_s22  ;;  %v3319_v5 = vrot.slane %v3313_v4, 1  ;;  %v3360_v12 = vrot.slane %v3346_v27, 7  ;;  %v3259_v1 = vrot.slane %v3253_v36, 3  ;;  %v3638_v4 = vld [vmem:[#allocation3 + $0x128] sm:$0x7]  ;;  %v5624_v11 = vpop.permute.xlu0 %3435 }
 0x5ba   : > { %s5849_s22 = smov 111   ;;  %v3026_v36 = vperm.slane %v5452_v34, 1  ;;  %v3659_v34 = vld [vmem:[%s5831_s6] sm:$0x7] }
 0x5bb   : > { %3324 = vrot.lane.b32.xlu2 %v3319_v5, %s4131_s12  ;;  %v3616_v5 = vld [vmem:[#allocation3 + $0x118] sm:$0xe0] }
 0x5bc   : > { %v3622_v10 = vrot.slane %v3616_v5, 5 }
 0x5c0   : > { %v2935_v48 = vpop.f32.mrf.mxu3  ;;  %v3382_v52 = vld [vmem:[#allocation3 + $0xb0] sm:$0x1c]  ;;  %v3406_v14 = vld [vmem:[#allocation3 + $0xb0] sm:$0xe0]  ;;  %v3349_v24 = vld [vmem:[#allocation3 + $0xb0] sm:$0x3] }
 0x5c1   : > { %2982 = vst [vmem:[#allocation3 + $0xd0] sm:$0xff] %v2935_v48  ;;  %3197 = vrot.lane.b32.xlu0 %v3192_v61, %s4126_s26  ;;  %v3388_v53 = vrot.slane %v3382_v52, 2  ;;  %v3412_v58 = vrot.slane %v3406_v14, 5  ;;  %v3361_v32 = vrot.slane %v3349_v24, 7  ;;  %v3280_v61 = vld [vmem:[#allocation3 + $0x90] sm:$0x1]  ;;  %v5629_v55 = vpop.permute.xlu0 %3459 }
 0x5c2   : > { %s3995_s26 = sshll.u32 %s5863_s28, 3 }
 0x5c3   : > { %3577 = vrot.lane.b32.xlu2 %v3570_v3, %s4141_s10  ;;  %3392 = vrot.lane.b32.xlu1 %v3388_v53, %s4134_s21  ;;  %v3362_v37 = vsel %vm2335_vm3, %v3360_v12, %v3361_v32  ;;  %v3293_v53 = vrot.slane %v3277_v60, 6  ;;  %v3294_v3 = vrot.slane %v3280_v61, 6 }
 0x5c8   : > { %v2937_v25 = vpop.f32.mrf.mxu3  ;;  %v3430_v40 = vld [vmem:[#allocation3 + $0xd0] sm:$0x7]  ;;  %v3451_v56 = vld [vmem:[#allocation3 + $0xd0] sm:$0x38]  ;;  %v3473_v48 = vld [vmem:[#allocation3 + $0xd0] sm:$0xc0] }
 0x5c9   : > { %2984 = vst [vmem:[#allocation3 + $0xf0] sm:$0xff] %v2937_v25  ;;  %3221 = vrot.lane.b32.xlu0 %v3216_v57, %s4127_s15  ;;  %v3457_v2 = vrot.slane %v3451_v56, 3  ;;  %v3487_v0 = vrot.slane %v3473_v48, 6  ;;  %v3295_v57 = vsel %vm2336_vm4, %v3293_v53, %v3294_v3  ;;  %v5636_v47 = vpop.permute.xlu0 %3517  ;;  %v5655_v56 = vpop.permute.xlu2 %3370  ;;  %v3124_v3 = vperm.slane %v5524_v29, 1 }
 0x5cb   : > { %3623 = vrot.lane.b32.xlu2 %v3620_v44, %s4143_s16  ;;  %3416 = vrot.lane.b32.xlu1 %v3412_v58, %s4135_s9 }
 0x5d0   : > { %v2940_v33 = vpop.f32.mrf.mxu3  ;;  %v3509_v8 = vld [vmem:[#allocation3 + $0xf0] sm:$0xe]  ;;  %v3476_v52 = vld [vmem:[#allocation3 + $0xf0] sm:$0x1]  ;;  %v3533_v25 = vld [vmem:[#allocation3 + $0xf0] sm:$0x70] }
 0x5d1   : > { %2986 = vst [vmem:[#allocation3 + $0x110] sm:$0xff] %v2940_v33  ;;  %3173 = vrot.lane.b32.xlu0 %v3168_v45, %s4125_s25  ;;  %v3515_v15 = vrot.slane %v3509_v8, 1  ;;  %v3488_v14 = vrot.slane %v3476_v52, 6  ;;  %v3539_v44 = vrot.slane %v3533_v25, 4  ;;  %v3557_v13 = vld [vmem:[#allocation3 + $0xf0] sm:$0x80]  ;;  %v5640_v32 = vpop.permute.xlu0 %3493 }
 0x5d2   : > { %v3571_v33 = vrot.slane %v3557_v13, 7  ;;  %v3092_v8 = vperm.slane %v5504_v23, 1 }
 0x5d3   : > { %3368 = vrot.lane.b32.xlu1 %v3362_v37, %s4133_s20  ;;  %v3489_v58 = vsel %vm2336_vm4, %v3487_v0, %v3488_v14  ;;  %v2998_v37 = vperm.slane %v5493_v49, 1 }
 0x5d5   : > { %vm5646_vm4 = vcmp.eq.s32.totalorder %v2998_v37, 1 }
 0x5d8   : > { %v3615_v42 = vld [vmem:[#allocation3 + $0x110] sm:$0xe0]  ;;  %v2942_v18 = vpop.f32.mrf.mxu3  ;;  %v3593_v27 = vld [vmem:[#allocation3 + $0x110] sm:$0x1c]  ;;  %v3560_v12 = vld [vmem:[#allocation3 + $0x110] sm:$0x3] }
 0x5d9   : > { %3240 = vrot.lane.b32.xlu0 %v3232_v39, %s4128_s17  ;;  %v3621_v38 = vrot.slane %v3615_v42, 5  ;;  %2988 = vst [vmem:[#allocation3 + $0x130] sm:$0x7] %v2942_v18  ;;  %v3599_v24 = vrot.slane %v3593_v27, 2  ;;  %v3572_v45 = vrot.slane %v3560_v12, 7 }
 0x5db   : > { %3437 = vrot.lane.b32.xlu1 %v3430_v40, %s4136_s13  ;;  %3625 = vrot.lane.b32.xlu2 %v3621_v38, %s4143_s16  ;;  %v3573_v39 = vsel %vm2335_vm3, %v3571_v33, %v3572_v45  ;;  %vm5658_vm3 = vcmp.eq.s32.totalorder %v3026_v36, 1 }
 0x5e0   : > { %v3639_v49 = vld [vmem:[#allocation3 + $0x130] sm:$0x7] }
 0x5e1   : > { %3264 = vrot.lane.b32.xlu0 %v3259_v1, %s4129_s18  ;;  %s305_s18 = scalar_lea.vmem %s5833_s8, %s3995_s26 }
 0x5e3   : > { %3461 = vrot.lane.b32.xlu1 %v3457_v2, %s4137_s14  ;;  %3644 = vrot.lane.b32.xlu2 %v3638_v4, %s4144_s19 }
 0x5e9   : > { %3627 = vrot.lane.b32.xlu0 %v3622_v10, %s4143_s16  ;;  %v5670_v10 = vpop.permute.xlu1 %3545 }
 0x5eb   : > { %3519 = vrot.lane.b32.xlu1 %v3515_v15, %s4139_s29  ;;  %v3395_v15 = vpop.permute.xlu2 %3394 }
 0x5f1   : > { %3300 = vrot.lane.b32.xlu0 %v3295_v57, %s4130_s11  ;;  %v5680_v52 = vpop.permute.xlu1 %3581 }
 0x5f3   : > { %3495 = vrot.lane.b32.xlu1 %v3489_v58, %s5849_s22  ;;  %v5682_v53 = vpop.permute.xlu2 %3418 }
 0x5f9   : > { %3543 = vrot.lane.b32.xlu0 %v3539_v44, %s5850_s23  ;;  %v5685_v14 = vpop.permute.xlu1 %3605 }
 0x5fb   : > { %3601 = vrot.lane.b32.xlu1 %v3598_v21, %s4142_s30  ;;  %v5689_v58 = vpop.permute.xlu2 %3439 }
 0x601   : > { %3603 = vrot.lane.b32.xlu0 %v3599_v24, %s4142_s30 }
 0x603   : > { %3648 = vrot.lane.b32.xlu1 %v3640_v26, %s4144_s19  ;;  %v5706_v12 = vpop.permute.xlu2 %3463 }
 0x609   : > { %3579 = vrot.lane.b32.xlu0 %v3573_v39, %s4141_s10  ;;  %v3335_v39 = vld [vmem:[#allocation3 + $0x88] sm:$0x70] }
 0x60b   : > { %v3009_v42 = vpop.permute.xlu0 %3008  ;;  %v5713_v37 = vpop.permute.xlu2 %3497 }
 0x60c   : > { %v3011_v18 = vsel %vm2957_vm0, %v5431_v20, %v3009_v42  ;;  %vm5672_vm0 = vcmp.eq.s32.totalorder %v3092_v8, 1 }
 0x60d   : > { %v3015_v38 = vsel %vm5646_vm4, %v3011_v18, 0.0  ;;  %v3339_v18 = vrot.slane %v3335_v39, 4 }
 0x611   : > { %3646 = vrot.lane.b32.xlu0 %v3639_v49, %s4144_s19 }
 0x613   : > { %v3040_v2 = vpop.permute.xlu0 %3039 }
 0x614   : > { %v3043_v4 = vsel %vm3041_vm14, %v5435_v16, %v3040_v2  ;;  %vm5691_vm14 = vcmp.eq.s32.totalorder %v3124_v3, 1 }
 0x615   : > { %v3047_v20 = vsel %vm5658_vm3, %v3043_v4, 0.0  ;;  %v3343_v4 = vadd.f32 %v3339_v18, %v5589_v9 }
 0x616   : > { %v3049_v5 = vadd.f32 %v3047_v20, %v3015_v38 }
 0x619   : > { %3662 = vperm.xlu0 %4099, %v3659_v34  }
 0x61b   : > { %v3106_v61 = vpop.permute.xlu0 %3105 }
 0x61c   : > { %v3109_v16 = vsel %vm3107_vm9, %v5447_v30, %v3106_v61  ;;  %vm3396_vm9 = vcmask 1031168  }
 0x61d   : > { %v3113_v48 = vsel %vm5672_vm0, %v3109_v16, 0.0 }
 0x623   : > { %v3138_v23 = vpop.permute.xlu0 %3137 }
 0x624   : > { %v3141_v25 = vsel %vm3139_vm11, %v5455_v41, %v3138_v23  ;;  %vm5859_vm11 = vcmask 130048  }
 0x625   : > { %v3145_v29 = vsel %vm5691_vm14, %v3141_v25, 0.0 }
 0x62b   : > { %v3076_v0 = vpop.permute.xlu0 %3075 }
 0x62c   : > { %v3079_v57 = vsel %vm3077_vm8, %v5474_v54, %v3076_v0  ;;  %vm3420_vm8 = vcmask 932864  }
 0x62d   : > { %v3083_v31 = vadd.f32 %v3079_v57, %v3049_v5 }
 0x62f   : > { %v3115_v44 = vadd.f32 %v3113_v48, %v3083_v31 }
 0x631   : > { %v3147_v21 = vadd.f32 %v3145_v29, %v3115_v44 }
 0x633   : > { %v3198_v27 = vpop.permute.xlu0 %3197 }
 0x634   : > { %v3201_v54 = vsel %vm3199_vm6, %v5459_v50, %v3198_v27  ;;  %vm3372_vm6 = vcmask 1039360  }
 0x635   : > { %v3205_v24 = vsel %vm5658_vm3, %v3201_v54, 0.0  ;;  %v3393_v26 = vpop.permute.xlu1 %3392 }
 0x636   : > { %v5704_v13 = vsel %vm3396_vm9, %v3393_v26, %v3395_v15  ;;  %v3397_v49 = vsel %vm3396_vm9, %v5606_v19, %v3393_v26  ;;  %v5731_v19 = vpop.permute.xlu2 %3521  ;;  %vm3499_vm9 = vcmask 908288  }
 0x637   : > { %v3402_v41 = vsel %vm5691_vm14, %v5704_v13, 0.0  ;;  %v3401_v15 = vsel %vm5539_vm12, %v3397_v49, 0.0 }
 0x63b   : > { %v3222_v33 = vpop.permute.xlu0 %3221 }
 0x63c   : > { %v3225_v9 = vsel %vm5859_vm11, %v5517_v28, %v3222_v33  ;;  %vm5860_vm11 = vcmask 7168  }
 0x63d   : > { %v5711_v45 = vpop.permute.xlu1 %3416 }
 0x643   : > { %v3174_v50 = vpop.permute.xlu0 %3173 }
 0x644   : > { %v3177_v42 = vsel %vm3175_vm15, %v5554_v6, %v3174_v50  ;;  %v3421_v6 = vsel %vm3420_vm8, %v5614_v35, %v5711_v45  ;;  %vm3441_vm15 = vcmask 924672  }
 0x645   : > { %v3181_v38 = vsel %vm5646_vm4, %v3177_v42, 0.0  ;;  %v3369_v36 = vpop.permute.xlu1 %3368  ;;  %v3336_v42 = vld [vmem:[#allocation3 + $0x90] sm:$0x70] }
 0x646   : > { %v3183_v2 = vadd.f32 %v3181_v38, %v3147_v21  ;;  %v3373_v20 = vsel %vm3372_vm6, %v5619_v62, %v3369_v36  ;;  %v3425_v62 = vsel %vm5506_vm2, %v3421_v6, 0.0  ;;  %v3542_v21 = vpop.permute.xlu2 %3541  ;;  %v3340_v6 = vrot.slane %v3336_v42, 4 }
 0x647   : > { %v3377_v5 = vsel %vm5529_vm10, %v3373_v20, 0.0 }
 0x648   : > { %v3207_v34 = vadd.f32 %v3205_v24, %v3183_v2  ;;  %v3379_v8 = vadd.f32 %v3377_v5, %v3343_v4  ;;  %v3374_v5 = vsel %vm3372_vm6, %v3369_v36, %v5655_v56  ;;  %vm3629_vm6 = vcmask 777216  }
 0x64a   : > { %v3403_v61 = vadd.f32 %v3401_v15, %v3379_v8  ;;  %v3229_v48 = vadd.f32 %v3225_v9, %v3207_v34 }
 0x64b   : > { %v3241_v16 = vpop.permute.xlu0 %3240 }
 0x64c   : > { %v3244_v35 = vsel %vm3242_vm5, %v5568_v17, %v3241_v16  ;;  %v3427_v23 = vadd.f32 %v3425_v62, %v3403_v61  ;;  %vm3523_vm5 = vcmask 900096   ;;  %v3422_v62 = vsel %vm3420_vm8, %v5711_v45, %v5682_v53 }
 0x64d   : > { %v3248_v3 = vsel %vm5672_vm0, %v3244_v35, 0.0  ;;  %v3438_v0 = vpop.permute.xlu1 %3437  ;;  %vm3607_vm8 = vcmask 785408  }
 0x64e   : > { %v3250_v57 = vadd.f32 %v3248_v3, %v3229_v48  ;;  %v3442_v25 = vsel %vm3441_vm15, %v5624_v11, %v3438_v0  ;;  %v3325_v26 = vpop.permute.xlu2 %3324  ;;  %v3443_v48 = vsel %vm3441_vm15, %v3438_v0, %v5689_v58  ;;  %v3426_v3 = vsel %vm5646_vm4, %v3422_v62, 0.0 }
 0x64f   : > { %v3446_v28 = vsel %vm5462_vm7, %v3442_v25, 0.0  ;;  %v3447_v45 = vsel %vm5658_vm3, %v3443_v48, 0.0 }
 0x650   : > { %v3448_v31 = vadd.f32 %v3446_v28, %v3427_v23 }
 0x653   : > { %v3265_v44 = vpop.permute.xlu0 %3264 }
 0x654   : > { %v3268_v29 = vsel %vm3266_vm13, %v5575_v59, %v3265_v44  ;;  %v3328_v59 = vsel %vm5860_vm11, %v5546_v46, %v3325_v26  ;;  %vm5861_vm13 = vcmask 15360   ;;  %vm3547_vm11 = vcmask 801792  }
 0x655   : > { %v3272_v17 = vsel %vm5691_vm14, %v3268_v29, 0.0  ;;  %v3462_v27 = vpop.permute.xlu1 %3461  ;;  %v3332_v20 = vsel %vm5658_vm3, %v3328_v59, 0.0 }
 0x656   : > { %v3274_v54 = vadd.f32 %v3272_v17, %v3250_v57  ;;  %v3466_v11 = vsel %vm3465_vm1, %v5629_v55, %v3462_v27  ;;  %v3578_v46 = vpop.permute.xlu2 %3577  ;;  %v3467_v58 = vsel %vm3465_vm1, %v3462_v27, %v5706_v12 }
 0x657   : > { %v3470_v49 = vadd.f32 %v3466_v11, %v3448_v31 }
 0x65b   : > { %v5749_v24 = vpop.permute.xlu0 %3627 }
 0x65d   : > { %v3520_v33 = vpop.permute.xlu1 %3519 }
 0x65e   : > { %v3524_v2 = vsel %vm3523_vm5, %v5636_v47, %v3520_v33  ;;  %v3624_v53 = vpop.permute.xlu2 %3623  ;;  %v3525_v13 = vsel %vm3523_vm5, %v3520_v33, %v5731_v19 }
 0x65f   : > { %v3528_v47 = vsel %vm5539_vm12, %v3524_v2, 0.0  ;;  %v3529_v29 = vsel %vm5691_vm14, %v3525_v13, 0.0 }
 0x663   : > { %v3301_v39 = vpop.permute.xlu0 %3300 }
 0x664   : > { %v3304_v50 = vsel %vm5861_vm13, %v5582_v63, %v3301_v39 }
 0x665   : > { %v3308_v18 = vsel %vm5646_vm4, %v3304_v50, 0.0  ;;  %v3496_v38 = vpop.permute.xlu1 %3495 }
 0x666   : > { %v3310_v4 = vadd.f32 %v3308_v18, %v3274_v54  ;;  %v3500_v55 = vsel %vm3499_vm9, %v5640_v32, %v3496_v38  ;;  %v3378_v32 = vsel %vm5672_vm0, %v3374_v5, 0.0  ;;  %v3501_v7 = vsel %vm3499_vm9, %v3496_v38, %v5713_v37  ;;  %v3626_v37 = vpop.permute.xlu2 %3625 }
 0x667   : > { %v3504_v63 = vsel %vm5529_vm10, %v3500_v55, 0.0  ;;  %v3505_v28 = vsel %vm5672_vm0, %v3501_v7, 0.0  ;;  %v3630_v11 = vsel %vm3629_vm6, %v3624_v53, %v3626_v37  ;;  %v3631_v39 = vsel %vm3629_vm6, %v3626_v37, %v5749_v24 }
 0x668   : > { %v3334_v34 = vadd.f32 %v3332_v20, %v3310_v4  ;;  %v3506_v8 = vadd.f32 %v3504_v63, %v3470_v49  ;;  %v3635_v51 = vsel %vm5672_vm0, %v3631_v39, 0.0 }
 0x66a   : > { %v3344_v15 = vadd.f32 %v3340_v6, %v3334_v34  ;;  %v3530_v61 = vadd.f32 %v3528_v47, %v3506_v8 }
 0x66b   : > { %v3544_v9 = vpop.permute.xlu0 %3543 }
 0x66c   : > { %v3380_v16 = vadd.f32 %v3378_v32, %v3344_v15  ;;  %v3548_v56 = vsel %vm3547_vm11, %v3542_v21, %v3544_v9  ;;  %v3549_v44 = vsel %vm3547_vm11, %v3544_v9, %v5670_v10 }
 0x66d   : > { %v3552_v36 = vsel %vm5506_vm2, %v3548_v56, 0.0  ;;  %v3553_v12 = vsel %vm5646_vm4, %v3549_v44, 0.0  ;;  %v3602_v17 = vpop.permute.xlu1 %3601  ;;  %vm3583_vm2 = vcmask 793600  }
 0x66e   : > { %v3404_v35 = vadd.f32 %v3402_v41, %v3380_v16  ;;  %v3554_v23 = vadd.f32 %v3552_v36, %v3530_v61  ;;  %v3645_v4 = vpop.permute.xlu2 %3644 }
 0x670   : > { %v3428_v57 = vadd.f32 %v3426_v3, %v3404_v35 }
 0x672   : > { %v3449_v25 = vadd.f32 %v3447_v45, %v3428_v57 }
 0x673   : > { %v3604_v0 = vpop.permute.xlu0 %3603 }
 0x674   : > { %v3471_v41 = vadd.f32 %v3467_v58, %v3449_v25  ;;  %v3608_v50 = vsel %vm3607_vm8, %v3602_v17, %v3604_v0  ;;  %v3609_v42 = vsel %vm3607_vm8, %v3604_v0, %v5685_v14 }
 0x675   : > { %v3649_v49 = vpop.permute.xlu1 %3648 }
 0x676   : > { %v3507_v31 = vadd.f32 %v3505_v28, %v3471_v41 }
 0x678   : > { %v3531_v21 = vadd.f32 %v3529_v29, %v3507_v31 }
 0x67a   : > { %v3555_v27 = vadd.f32 %v3553_v12, %v3531_v21 }
 0x67b   : > { %v3580_v19 = vpop.permute.xlu0 %3579 }
 0x67c   : > { %v3584_v54 = vsel %vm3583_vm2, %v3578_v46, %v3580_v19  ;;  %v3585_v26 = vsel %vm3583_vm2, %v3580_v19, %v5680_v52  ;;  %v3634_v52 = vsel %vm5529_vm10, %v3630_v11, 0.0  ;;  %vm3670_vm10 = vcmask 1043456  }
 0x67d   : > { %v3588_v10 = vsel %vm5462_vm7, %v3584_v54, 0.0  ;;  %v3589_v33 = vsel %vm5658_vm3, %v3585_v26, 0.0  ;;  %vm3650_vm7 = vcmask 769024  }
 0x67e   : > { %v3590_v40 = vadd.f32 %v3588_v10, %v3554_v23  ;;  %v3591_v59 = vadd.f32 %v3589_v33, %v3555_v27 }
 0x680   : > { %v3612_v18 = vadd.f32 %v3608_v50, %v3590_v40  ;;  %v3613_v38 = vadd.f32 %v3609_v42, %v3591_v59 }
 0x682   : > { %v3636_v1 = vadd.f32 %v3634_v52, %v3612_v18  ;;  %v3637_v2 = vadd.f32 %v3635_v51, %v3613_v38 }
 0x683   : > { %v3647_v24 = vpop.permute.xlu0 %3646 }
 0x684   : > { %v3651_v55 = vsel %vm3650_vm7, %v3645_v4, %v3647_v24  ;;  %v3652_v20 = vsel %vm3650_vm7, %v3647_v24, %v3649_v49 }
 0x685   : > { %v3655_v14 = vsel %vm5539_vm12, %v3651_v55, 0.0  ;;  %v3656_v46 = vsel %vm5691_vm14, %v3652_v20, 0.0 }
 0x686   : > { %v3657_v63 = vadd.f32 %v3655_v14, %v3636_v1  ;;  %v3658_v22 = vadd.f32 %v3656_v46, %v3637_v2 }
 0x68b   : > { %v3663_v5 = vpop.permute.xlu0 %3662 }
 0x68c   : > { %v3666_v60 = vadd.f32 %v3663_v5, %v3658_v22  ;;  %v3665_v6 = vadd.f32 %v3663_v5, %v3657_v63 }
 0x68e   : > { %v3669_v34 = vrot.slane %v3666_v60, 4 }
 0x690   : > { %v3671_v8 = vsel %vm3670_vm10, %v3665_v6, %v3669_v34 }
 0x691   : > { %3673 = vst [vmem:[%s305_s18] sm:$0x77] %v3671_v8 }
 0x692 PF: > { %s18_s27 = sadd.s32 1, %s4109_s27  }
 0x693   : > { %p15_p4 = scmp.ge.s32.totalorder %s18_s27, 4  }
 0x695   :  { %17 = sbr.rel (!%p15_p4) target bundleno = 1 (0x1), region = 82 }

</bundles_post_ra>
